<compile_context>
chip_gen: v5e
topology: v5e:2x2
jax: 0.10.0
libtpu: 0.0.40
codegen_flags: <defaults>
</compile_context>

<pallas_src>
import math

import jax
import jax.numpy as jnp
from jax.experimental import pallas as pl
from jax.experimental.pallas import tpu as pltpu

EPS = 1e-5
NEG_SLOPE = 0.01


def _leaky(x):
    return jnp.where(x > 0, x, NEG_SLOPE * x)


def _graph_norm(h, gamma, beta, alpha):
    # h: (GPB, N, H); mean/var over nodes (axis 1), per feature, per graph.
    mean = jnp.mean(h, axis=1, keepdims=True)
    hc = h - alpha * mean
    var = jnp.mean(hc * hc, axis=1, keepdims=True)
    scale = gamma * jax.lax.rsqrt(var + EPS)      # gamma folded into rsqrt
    return hc * scale + beta


def gm_embedder_kernel(a_ref, x_ref, p_ref, out_ref):
    gpb, n, in_dim = x_ref.shape
    hidden = p_ref.shape[1]

    # Packed parameter tile rows: [W1 (IN); W2 (H); g1w; g1b; g1a; g2w; g2b; g2a; pad]
    w1 = p_ref[0:in_dim, :]                              # (IN, H)
    w2 = p_ref[in_dim:in_dim + hidden, :]                # (H, H)
    b = in_dim + hidden
    g1w = p_ref[b + 0:b + 1, :]
    g1b = p_ref[b + 1:b + 2, :]
    g1a = p_ref[b + 2:b + 3, :]
    g2w = p_ref[b + 3:b + 4, :]
    g2b = p_ref[b + 4:b + 5, :]
    g2a = p_ref[b + 5:b + 6, :]

    a = a_ref[...]                                       # (GPB, N, N)

    # ---- conv1: Â @ (X @ W1) ----
    # Flatten graphs into one M = gpb*N matmul against the shared W1
    # (layout-preserving reshape: N is a multiple of the 8-row sublane tile).
    h = jnp.dot(x_ref[...].reshape(gpb * n, in_dim), w1,
                preferred_element_type=jnp.float32).reshape(gpb, n, hidden)
    h = jnp.einsum('gnm,gmo->gno', a, h, preferred_element_type=jnp.float32)
    h1 = _leaky(_graph_norm(h, g1w, g1b, g1a))
    r1 = jnp.mean(h1, axis=1)                            # (GPB, H)

    # ---- conv2: Â @ (h1 @ W2) ----
    h = jnp.dot(h1.reshape(gpb * n, hidden), w2,
                preferred_element_type=jnp.float32).reshape(gpb, n, hidden)
    h = jnp.einsum('gnm,gmo->gno', a, h, preferred_element_type=jnp.float32)
    h2 = _leaky(_graph_norm(h, g2w, g2b, g2a))
    r2 = jnp.mean(h2, axis=1)                            # (GPB, H)

    # Single store per step: per-graph [r1 | r2] row, lane-concatenated.
    out_ref[0] = _leaky(jnp.concatenate([r1, r2], axis=-1))   # (GPB, 2H)


def _default_grid_steps():
    # v7x has 2 TensorCores/chip -> split the batch so both cores get work.
    # v5e/v6e have a single TC -> one grid step removes all per-step overhead.
    try:
        kind = jax.devices()[0].device_kind.lower()
    except Exception:
        kind = ""
    return 2 if ("v7" in kind or "7x" in kind) else 1


def gm_embedder_forward(a_hat, x, params, num_grid_steps=None):
    """a_hat: (G, N, N), x: (G, N, IN) -> (G, 2*hidden) embeddings."""
    (w1, w2, g1w, g1b, g1a, g2w, g2b, g2a) = params
    G, N, in_dim = x.shape
    hidden = w1.shape[1]

    if num_grid_steps is None:
        num_grid_steps = _default_grid_steps()
    num_steps = max(1, min(int(num_grid_steps), G))
    gpb = pl.cdiv(G, num_steps)                  # graphs per grid step
    g_pad = gpb * num_steps
    if g_pad != G:                               # pad the batch (not gcd-shrink)
        pad = g_pad - G
        a_hat = jnp.pad(a_hat, ((0, pad), (0, 0), (0, 0)))
        x = jnp.pad(x, ((0, pad), (0, 0), (0, 0)))

    # Pack W1, W2 and the six (1, H) GraphNorm vectors into ONE sublane tile.
    rows = in_dim + hidden + 6
    rows_pad = -(-rows // 8) * 8
    packed = jnp.concatenate(
        [w1, w2, g1w, g1b, g1a, g2w, g2b, g2a,
         jnp.zeros((rows_pad - rows, hidden), jnp.float32)], axis=0)

    flops_per_graph = 2 * (N * in_dim * hidden + 2 * N * N * hidden
                           + N * hidden * hidden)
    cost = pl.CostEstimate(
        flops=g_pad * flops_per_graph,
        transcendentals=g_pad * 2 * hidden,
        bytes_accessed=4 * (g_pad * (N * N + N * in_dim + 2 * hidden)
                            + rows_pad * hidden))

    out = pl.pallas_call(
        gm_embedder_kernel,
        out_shape=jax.ShapeDtypeStruct((num_steps, gpb, 2 * hidden), jnp.float32),
        grid_spec=pl.GridSpec(
            grid=(num_steps,),
            in_specs=[
                pl.BlockSpec((gpb, N, N), lambda g: (g, 0, 0)),        # Â
                pl.BlockSpec((gpb, N, in_dim), lambda g: (g, 0, 0)),   # X
                pl.BlockSpec((rows_pad, hidden), lambda g: (0, 0)),    # packed params
            ],
            out_specs=pl.BlockSpec((1, gpb, 2 * hidden), lambda g: (g, 0, 0)),
        ),
        compiler_params=pltpu.CompilerParams(
            dimension_semantics=("parallel",)),
        cost_estimate=cost,
    )(a_hat, x, packed)

    return out.reshape(g_pad, 2 * hidden)[:G]    # per-graph hstack(r1, r2)


# ----------------------------- glue / setup ---------------------------------

def kaiming_uniform(key, shape, a=NEG_SLOPE):
    # Mirrors torch.nn.init.kaiming_uniform_ on a 2D (in, out) GraphConv weight
    # (torch's fan_in on 2D tensors is size(1)).
    fan_in = shape[1]
    gain = math.sqrt(2.0 / (1.0 + a * a))
    bound = gain * math.sqrt(3.0 / fan_in)
    return jax.random.uniform(key, shape, jnp.float32, -bound, bound)


def build_normalized_adjacency(src, dst, edge_w, num_nodes):
    a = jnp.zeros((num_nodes, num_nodes), jnp.float32).at[dst, src].add(edge_w)
    out_deg = jnp.clip(jnp.zeros((num_nodes,), jnp.float32).at[src].add(1.0), 1.0, None)
    in_deg = jnp.clip(jnp.zeros((num_nodes,), jnp.float32).at[dst].add(1.0), 1.0, None)
    return (in_deg[:, None] ** -0.5) * a * (out_deg[None, :] ** -0.5)


def reference_forward_single(a_hat, x, params):
    (w1, w2, g1w, g1b, g1a, g2w, g2b, g2a) = params

    def gn(h, gamma, beta, alpha):
        mean = jnp.mean(h, axis=0, keepdims=True)
        hc = h - alpha * mean
        var = jnp.mean(hc * hc, axis=0, keepdims=True)
        return gamma * hc / jnp.sqrt(var + EPS) + beta

    h1 = _leaky(gn(a_hat @ (x @ w1), g1w, g1b, g1a))
    r1 = jnp.mean(h1, axis=0, keepdims=True)
    h2 = _leaky(gn(a_hat @ (h1 @ w2), g2w, g2b, g2a))
    r2 = jnp.mean(h2, axis=0, keepdims=True)
    return _leaky(jnp.concatenate([r1, r2], axis=1))


if __name__ == "__main__":
    G, N, IN_DIM, HIDDEN, E = 8, 64, 16, 32, 256

    key = jax.random.PRNGKey(0)
    k_x, k_w1, k_w2, k_gn, k_graphs = jax.random.split(key, 5)

    x = jax.random.normal(k_x, (G, N, IN_DIM), jnp.float32)

    a_list = []
    for gk in jax.random.split(k_graphs, G):
        ks, kd, ke = jax.random.split(gk, 3)
        src = jax.random.randint(ks, (E,), 0, N)
        dst = jax.random.randint(kd, (E,), 0, N)
        ew = jax.random.uniform(ke, (E,), jnp.float32, 0.1, 1.0)
        a_list.append(build_normalized_adjacency(src, dst, ew, N))
    a_hat = jnp.stack(a_list, axis=0)

    # GraphConv weights (kaiming uniform, a=0.01); GraphNorm params perturbed
    # away from their defaults (weight=1, bias=0, mean_scale=1) to emulate a
    # trained module and exercise the packed-parameter path.
    w1 = kaiming_uniform(k_w1, (IN_DIM, HIDDEN))
    w2 = kaiming_uniform(k_w2, (HIDDEN, HIDDEN))
    kg = jax.random.split(k_gn, 6)
    g1w = jax.random.uniform(kg[0], (1, HIDDEN), jnp.float32, 0.5, 1.5)
    g1b = jax.random.uniform(kg[1], (1, HIDDEN), jnp.float32, -0.1, 0.1)
    g1a = jax.random.uniform(kg[2], (1, HIDDEN), jnp.float32, 0.8, 1.2)
    g2w = jax.random.uniform(kg[3], (1, HIDDEN), jnp.float32, 0.5, 1.5)
    g2b = jax.random.uniform(kg[4], (1, HIDDEN), jnp.float32, -0.1, 0.1)
    g2a = jax.random.uniform(kg[5], (1, HIDDEN), jnp.float32, 0.8, 1.2)
    params = (w1, w2, g1w, g1b, g1a, g2w, g2b, g2a)

    ref = jnp.stack(
        [reference_forward_single(a_hat[g], x[g], params)[0] for g in range(G)],
        axis=0)

    # Default blocking: whole batch in one step on v5e/v6e, split 2-ways on v7x.
    out = gm_embedder_forward(a_hat, x, params)
    out = jax.block_until_ready(out)
    assert out.shape == (G, 2 * HIDDEN)
    assert jnp.allclose(out, ref, atol=1e-4, rtol=1e-4)

    # Also exercise the multi-step (v7x-style) grid plus the batch-padding path
    # (G=5 -> padded to 6, two grid steps of 3 graphs each).
    out5 = gm_embedder_forward(a_hat[:5], x[:5], params, num_grid_steps=2)
    out5 = jax.block_until_ready(out5)
    assert out5.shape == (5, 2 * HIDDEN)
    assert jnp.allclose(out5, ref[:5], atol=1e-4, rtol=1e-4)

    print("KERNEL_OK")
</pallas_src>

<mosaic_0001>
module attributes {stable_mosaic.version = 11 : i64} {
  func.func @gm_embedder_kernel(%arg0: i32, %arg1: memref<8x64x64xf32, #tpu.memory_space<vmem>>, %arg2: memref<8x64x16xf32, #tpu.memory_space<vmem>>, %arg3: memref<56x32xf32, #tpu.memory_space<vmem>>, %arg4: memref<1x8x64xf32, #tpu.memory_space<vmem>>) attributes {dimension_semantics = [#tpu.dimension_semantics<parallel>], iteration_bounds = array<i64: 1>, scalar_prefetch = 0 : i64, scratch_operands = 0 : i64, tpu.core_type = #tpu.core_type<tc>, window_params = [{transform_indices = @transform_0, window_bounds = array<i64: 8, 64, 64>}, {transform_indices = @transform_1, window_bounds = array<i64: 8, 64, 16>}, {pipeline_mode = #tpu.pipeline_mode<synchronous>, transform_indices = @transform_2, window_bounds = array<i64: 56, 32>}, {transform_indices = @transform_3, window_bounds = array<i64: 1, 8, 64>}]} {
    %c0 = arith.constant 0 : index
    %c0_0 = arith.constant 0 : index
    %0 = vector.load %arg3[%c0, %c0_0] : memref<56x32xf32, #tpu.memory_space<vmem>>, vector<16x32xf32>
    %c16 = arith.constant 16 : index
    %c0_1 = arith.constant 0 : index
    %1 = vector.load %arg3[%c16, %c0_1] : memref<56x32xf32, #tpu.memory_space<vmem>>, vector<32x32xf32>
    %c48 = arith.constant 48 : index
    %c0_2 = arith.constant 0 : index
    %2 = vector.load %arg3[%c48, %c0_2] : memref<56x32xf32, #tpu.memory_space<vmem>>, vector<1x32xf32>
    %c49 = arith.constant 49 : index
    %c0_3 = arith.constant 0 : index
    %3 = vector.load %arg3[%c49, %c0_3] : memref<56x32xf32, #tpu.memory_space<vmem>>, vector<1x32xf32>
    %c50 = arith.constant 50 : index
    %c0_4 = arith.constant 0 : index
    %4 = vector.load %arg3[%c50, %c0_4] : memref<56x32xf32, #tpu.memory_space<vmem>>, vector<1x32xf32>
    %c51 = arith.constant 51 : index
    %c0_5 = arith.constant 0 : index
    %5 = vector.load %arg3[%c51, %c0_5] : memref<56x32xf32, #tpu.memory_space<vmem>>, vector<1x32xf32>
    %c52 = arith.constant 52 : index
    %c0_6 = arith.constant 0 : index
    %6 = vector.load %arg3[%c52, %c0_6] : memref<56x32xf32, #tpu.memory_space<vmem>>, vector<1x32xf32>
    %c53 = arith.constant 53 : index
    %c0_7 = arith.constant 0 : index
    %7 = vector.load %arg3[%c53, %c0_7] : memref<56x32xf32, #tpu.memory_space<vmem>>, vector<1x32xf32>
    %c0_8 = arith.constant 0 : index
    %c0_9 = arith.constant 0 : index
    %c0_10 = arith.constant 0 : index
    %8 = vector.load %arg1[%c0_8, %c0_9, %c0_10] : memref<8x64x64xf32, #tpu.memory_space<vmem>>, vector<8x64x64xf32>
    %c0_11 = arith.constant 0 : index
    %c0_12 = arith.constant 0 : index
    %c0_13 = arith.constant 0 : index
    %9 = vector.load %arg2[%c0_11, %c0_12, %c0_13] : memref<8x64x16xf32, #tpu.memory_space<vmem>>, vector<8x64x16xf32>
    %10 = vector.shape_cast %9 : vector<8x64x16xf32> to vector<512x16xf32>
    %cst = arith.constant dense<0.000000e+00> : vector<512x32xf32>
    %11 = tpu.matmul %10, %0, %cst {dimension_numbers = #tpu.dot_dimension_numbers<[1], [0], [0], [1], [0, 0, 1, 1], [], []>} : vector<512x16xf32>, vector<16x32xf32>, vector<512x32xf32> -> vector<512x32xf32>
    %12 = vector.shape_cast %11 : vector<512x32xf32> to vector<8x64x32xf32>
    "tpu.trace_start"() <{level = 10 : i32, message = "gnm,gmo->gno"}> : () -> ()
    %cst_14 = arith.constant dense<0.000000e+00> : vector<8x64x32xf32>
    %13 = tpu.matmul %8, %12, %cst_14 {dimension_numbers = #tpu.dot_dimension_numbers<[2], [1], [1], [2], [0, 0, 0, 1, 1, 2], [0], [0]>} : vector<8x64x64xf32>, vector<8x64x32xf32>, vector<8x64x32xf32> -> vector<8x64x32xf32>
    "tpu.trace_stop"() : () -> ()
    %cst_15 = arith.constant dense<0.000000e+00> : vector<8x32xf32>
    %14 = vector.multi_reduction <add>, %13, %cst_15 [1] : vector<8x64x32xf32> to vector<8x32xf32>
    %15 = vector.shape_cast %14 : vector<8x32xf32> to vector<8x1x32xf32>
    %cst_16 = arith.constant 6.400000e+01 : f32
    %16 = vector.broadcast %cst_16 : f32 to vector<8x1x32xf32>
    %17 = arith.divf %15, %16 : vector<8x1x32xf32>
    %18 = vector.shape_cast %4 : vector<1x32xf32> to vector<1x1x32xf32>
    %19 = vector.broadcast %18 : vector<1x1x32xf32> to vector<8x1x32xf32>
    %20 = arith.mulf %19, %17 : vector<8x1x32xf32>
    %21 = vector.broadcast %20 : vector<8x1x32xf32> to vector<8x64x32xf32>
    %22 = arith.subf %13, %21 : vector<8x64x32xf32>
    %23 = arith.mulf %22, %22 : vector<8x64x32xf32>
    %cst_17 = arith.constant dense<0.000000e+00> : vector<8x32xf32>
    %24 = vector.multi_reduction <add>, %23, %cst_17 [1] : vector<8x64x32xf32> to vector<8x32xf32>
    %25 = vector.shape_cast %24 : vector<8x32xf32> to vector<8x1x32xf32>
    %cst_18 = arith.constant 6.400000e+01 : f32
    %26 = vector.broadcast %cst_18 : f32 to vector<8x1x32xf32>
    %27 = arith.divf %25, %26 : vector<8x1x32xf32>
    %cst_19 = arith.constant 9.99999974E-6 : f32
    %28 = vector.broadcast %cst_19 : f32 to vector<8x1x32xf32>
    %29 = arith.addf %27, %28 : vector<8x1x32xf32>
    %30 = math.rsqrt %29 : vector<8x1x32xf32>
    %31 = vector.shape_cast %2 : vector<1x32xf32> to vector<1x1x32xf32>
    %32 = vector.broadcast %31 : vector<1x1x32xf32> to vector<8x1x32xf32>
    %33 = arith.mulf %32, %30 : vector<8x1x32xf32>
    %34 = vector.broadcast %33 : vector<8x1x32xf32> to vector<8x64x32xf32>
    %35 = arith.mulf %22, %34 : vector<8x64x32xf32>
    %36 = vector.shape_cast %3 : vector<1x32xf32> to vector<1x1x32xf32>
    %37 = vector.broadcast %36 : vector<1x1x32xf32> to vector<8x64x32xf32>
    %38 = arith.addf %35, %37 : vector<8x64x32xf32>
    %cst_20 = arith.constant 0.000000e+00 : f32
    %39 = vector.broadcast %cst_20 : f32 to vector<8x64x32xf32>
    %40 = arith.cmpf ogt, %38, %39 : vector<8x64x32xf32>
    %cst_21 = arith.constant 0.00999999977 : f32
    %41 = vector.broadcast %cst_21 : f32 to vector<8x64x32xf32>
    %42 = arith.mulf %41, %38 : vector<8x64x32xf32>
    %43 = arith.select %40, %38, %42 : vector<8x64x32xi1>, vector<8x64x32xf32>
    %cst_22 = arith.constant dense<0.000000e+00> : vector<8x32xf32>
    %44 = vector.multi_reduction <add>, %43, %cst_22 [1] : vector<8x64x32xf32> to vector<8x32xf32>
    %cst_23 = arith.constant 6.400000e+01 : f32
    %45 = vector.broadcast %cst_23 : f32 to vector<8x32xf32>
    %46 = arith.divf %44, %45 : vector<8x32xf32>
    %47 = vector.shape_cast %43 : vector<8x64x32xf32> to vector<512x32xf32>
    %cst_24 = arith.constant dense<0.000000e+00> : vector<512x32xf32>
    %48 = tpu.matmul %47, %1, %cst_24 {dimension_numbers = #tpu.dot_dimension_numbers<[1], [0], [0], [1], [0, 0, 1, 1], [], []>} : vector<512x32xf32>, vector<32x32xf32>, vector<512x32xf32> -> vector<512x32xf32>
    %49 = vector.shape_cast %48 : vector<512x32xf32> to vector<8x64x32xf32>
    "tpu.trace_start"() <{level = 10 : i32, message = "gnm,gmo->gno"}> : () -> ()
    %cst_25 = arith.constant dense<0.000000e+00> : vector<8x64x32xf32>
    %50 = tpu.matmul %8, %49, %cst_25 {dimension_numbers = #tpu.dot_dimension_numbers<[2], [1], [1], [2], [0, 0, 0, 1, 1, 2], [0], [0]>} : vector<8x64x64xf32>, vector<8x64x32xf32>, vector<8x64x32xf32> -> vector<8x64x32xf32>
    "tpu.trace_stop"() : () -> ()
    %cst_26 = arith.constant dense<0.000000e+00> : vector<8x32xf32>
    %51 = vector.multi_reduction <add>, %50, %cst_26 [1] : vector<8x64x32xf32> to vector<8x32xf32>
    %52 = vector.shape_cast %51 : vector<8x32xf32> to vector<8x1x32xf32>
    %cst_27 = arith.constant 6.400000e+01 : f32
    %53 = vector.broadcast %cst_27 : f32 to vector<8x1x32xf32>
    %54 = arith.divf %52, %53 : vector<8x1x32xf32>
    %55 = vector.shape_cast %7 : vector<1x32xf32> to vector<1x1x32xf32>
    %56 = vector.broadcast %55 : vector<1x1x32xf32> to vector<8x1x32xf32>
    %57 = arith.mulf %56, %54 : vector<8x1x32xf32>
    %58 = vector.broadcast %57 : vector<8x1x32xf32> to vector<8x64x32xf32>
    %59 = arith.subf %50, %58 : vector<8x64x32xf32>
    %60 = arith.mulf %59, %59 : vector<8x64x32xf32>
    %cst_28 = arith.constant dense<0.000000e+00> : vector<8x32xf32>
    %61 = vector.multi_reduction <add>, %60, %cst_28 [1] : vector<8x64x32xf32> to vector<8x32xf32>
    %62 = vector.shape_cast %61 : vector<8x32xf32> to vector<8x1x32xf32>
    %cst_29 = arith.constant 6.400000e+01 : f32
    %63 = vector.broadcast %cst_29 : f32 to vector<8x1x32xf32>
    %64 = arith.divf %62, %63 : vector<8x1x32xf32>
    %cst_30 = arith.constant 9.99999974E-6 : f32
    %65 = vector.broadcast %cst_30 : f32 to vector<8x1x32xf32>
    %66 = arith.addf %64, %65 : vector<8x1x32xf32>
    %67 = math.rsqrt %66 : vector<8x1x32xf32>
    %68 = vector.shape_cast %5 : vector<1x32xf32> to vector<1x1x32xf32>
    %69 = vector.broadcast %68 : vector<1x1x32xf32> to vector<8x1x32xf32>
    %70 = arith.mulf %69, %67 : vector<8x1x32xf32>
    %71 = vector.broadcast %70 : vector<8x1x32xf32> to vector<8x64x32xf32>
    %72 = arith.mulf %59, %71 : vector<8x64x32xf32>
    %73 = vector.shape_cast %6 : vector<1x32xf32> to vector<1x1x32xf32>
    %74 = vector.broadcast %73 : vector<1x1x32xf32> to vector<8x64x32xf32>
    %75 = arith.addf %72, %74 : vector<8x64x32xf32>
    %cst_31 = arith.constant 0.000000e+00 : f32
    %76 = vector.broadcast %cst_31 : f32 to vector<8x64x32xf32>
    %77 = arith.cmpf ogt, %75, %76 : vector<8x64x32xf32>
    %cst_32 = arith.constant 0.00999999977 : f32
    %78 = vector.broadcast %cst_32 : f32 to vector<8x64x32xf32>
    %79 = arith.mulf %78, %75 : vector<8x64x32xf32>
    %80 = arith.select %77, %75, %79 : vector<8x64x32xi1>, vector<8x64x32xf32>
    %cst_33 = arith.constant dense<0.000000e+00> : vector<8x32xf32>
    %81 = vector.multi_reduction <add>, %80, %cst_33 [1] : vector<8x64x32xf32> to vector<8x32xf32>
    %cst_34 = arith.constant 6.400000e+01 : f32
    %82 = vector.broadcast %cst_34 : f32 to vector<8x32xf32>
    %83 = arith.divf %81, %82 : vector<8x32xf32>
    %84 = tpu.concatenate %46, %83 in 1 : vector<8x32xf32>, vector<8x32xf32> -> vector<8x64xf32>
    %cst_35 = arith.constant 0.000000e+00 : f32
    %85 = vector.broadcast %cst_35 : f32 to vector<8x64xf32>
    %86 = arith.cmpf ogt, %84, %85 : vector<8x64xf32>
    %cst_36 = arith.constant 0.00999999977 : f32
    %87 = vector.broadcast %cst_36 : f32 to vector<8x64xf32>
    %88 = arith.mulf %87, %84 : vector<8x64xf32>
    %89 = arith.select %86, %84, %88 : vector<8x64xi1>, vector<8x64xf32>
    %c0_37 = arith.constant 0 : index
    %c0_38 = arith.constant 0 : index
    %c0_39 = arith.constant 0 : index
    %90 = vector.load %arg4[%c0_37, %c0_38, %c0_39] : memref<1x8x64xf32, #tpu.memory_space<vmem>>, vector<1x8x64xf32>
    %91 = vector.shape_cast %90 : vector<1x8x64xf32> to vector<8x64xf32>
    %92 = vector.shape_cast %89 : vector<8x64xf32> to vector<1x8x64xf32>
    tpu.vector_store %arg4[%c0_37, %c0_38, %c0_39], %92 {strides = array<i32>} : memref<1x8x64xf32, #tpu.memory_space<vmem>>, vector<1x8x64xf32>,
    return
  }
  func.func @transform_0(%arg0: i32) -> (i32, i32, i32) {
    %c0_i32 = arith.constant 0 : i32
    %c0_i32_0 = arith.constant 0 : i32
    %c0_i32_1 = arith.constant 0 : i32
    return %arg0, %c0_i32, %c0_i32_0 : i32, i32, i32
  }
  func.func @transform_1(%arg0: i32) -> (i32, i32, i32) {
    %c0_i32 = arith.constant 0 : i32
    %c0_i32_0 = arith.constant 0 : i32
    %c0_i32_1 = arith.constant 0 : i32
    return %arg0, %c0_i32, %c0_i32_0 : i32, i32, i32
  }
  func.func @transform_2(%arg0: i32) -> (i32, i32) {
    %c0_i32 = arith.constant 0 : i32
    %c0_i32_0 = arith.constant 0 : i32
    %c0_i32_1 = arith.constant 0 : i32
    return %c0_i32, %c0_i32_0 : i32, i32
  }
  func.func @transform_3(%arg0: i32) -> (i32, i32, i32) {
    %c0_i32 = arith.constant 0 : i32
    %c0_i32_0 = arith.constant 0 : i32
    %c0_i32_1 = arith.constant 0 : i32
    return %arg0, %c0_i32, %c0_i32_0 : i32, i32, i32
  }
}

</mosaic_0001>

<bundles_post_ra>
// kernel: tpu_custom_call.1
= control target key start
LH: loop header
LB: loop body
LE: loop exit
PB: predicated region body
PF: predicated region fallthrough
CT: control target
= control target key end

     0   :  { %vm155_vm0 = vcmask 130048   ;;  %s7775_s0 = inlined_call_operand.vmem [shape: f32[8,64,64], index: 0, kind: input, shape index: {}]   ;;  %s7776_s1 = inlined_call_operand.vmem [shape: f32[8,64,16], index: 1, kind: input, shape index: {}]   ;;  %s7777_s2 = inlined_call_operand.vmem [shape: f32[56,32], index: 2, kind: input, shape index: {}]   ;;  %s7778_s3 = inlined_call_operand.hbm [shape: f32[1,8,64], index: 3, kind: output, shape index: {}]  }
   0x1   :  { %v16_v0 = vld [vmem:[%s7777_s2 + $0x8] sm:$0xff]  ;;  %v15_v1 = vld [vmem:[%s7777_s2] sm:$0xff] }
   0x2   :  { %362 = vmatpush.msra.mxu0 %v16_v0  ;;  %v91_v2 = vld [vmem:[%s7776_s1] sm:$0xff] }
   0x4   :  { %363 = vmatpush.msra.mxu0 %v15_v1 }
   0x5   :  { %8 = vsyncpa [#allocation3], 0  ;;  %4071 = vmatmul.msk.f32.vlgmr.msra.gmra.mxu0 %vm155_vm0, %v91_v2  ;;  %v92_v3 = vld [vmem:[%s7776_s1 + $0x8] sm:$0xff]  ;;  %v93_v4 = vld [vmem:[%s7776_s1 + $0x10] sm:$0xff]  ;;  %vm557_vm1 = vcmask 523264   ;;  %vm1078_vm2 = vcmask 261120  }
   0x6   :  { %v94_v5 = vld [vmem:[%s7776_s1 + $0x18] sm:$0xff]  ;;  %v95_v6 = vld [vmem:[%s7776_s1 + $0x20] sm:$0xff]  ;;  %v96_v7 = vld [vmem:[%s7776_s1 + $0x28] sm:$0xff]  ;;  %s4467_s24 = smov [#allocation2]   ;;  %s4062_s28 = sshll.u32 %s7778_s3, 4  ;;  %s4063_s28 = int_to_ptr.hbm [resolvable:$true] %s4062_s28 }
   0x7   :  { %v97_v8 = vld [vmem:[%s7776_s1 + $0x30] sm:$0xff]  ;;  %v98_v9 = vld [vmem:[%s7776_s1 + $0x38] sm:$0xff]  ;;  %v99_v10 = vld [vmem:[%s7776_s1 + $0x40] sm:$0xff]  ;;  %s4060_s25 = sshll.u32 %s4467_s24, 4  ;;  %s4061_s25 = int_to_ptr.vmem [resolvable:$true] %s4060_s25 }
   0x8   :  { %v100_v11 = vld [vmem:[%s7776_s1 + $0x48] sm:$0xff]  ;;  %v101_v12 = vld [vmem:[%s7776_s1 + $0x50] sm:$0xff]  ;;  %v102_v13 = vld [vmem:[%s7776_s1 + $0x58] sm:$0xff] }
   0x9   :  { %v103_v14 = vld [vmem:[%s7776_s1 + $0x60] sm:$0xff]  ;;  %v104_v15 = vld [vmem:[%s7776_s1 + $0x68] sm:$0xff]  ;;  %v105_v16 = vld [vmem:[%s7776_s1 + $0x70] sm:$0xff] }
   0xa   :  { %v106_v17 = vld [vmem:[%s7776_s1 + $0x78] sm:$0xff]  ;;  %v107_v19 = vld [vmem:[%s7776_s1 + $0x80] sm:$0xff]  ;;  %v108_v21 = vld [vmem:[%s7776_s1 + $0x88] sm:$0xff] }
   0xb   :  { %v109_v23 = vld [vmem:[%s7776_s1 + $0x90] sm:$0xff]  ;;  %v110_v25 = vld [vmem:[%s7776_s1 + $0x98] sm:$0xff]  ;;  %v111_v27 = vld [vmem:[%s7776_s1 + $0xa0] sm:$0xff] }
   0xc   :  { %v112_v29 = vld [vmem:[%s7776_s1 + $0xa8] sm:$0xff]  ;;  %v113_v31 = vld [vmem:[%s7776_s1 + $0xb0] sm:$0xff]  ;;  %v114_v33 = vld [vmem:[%s7776_s1 + $0xb8] sm:$0xff] }
   0xd   :  { %4072 = vmatmul.msk.f32.gmra.mxu0 %vm155_vm0, %v92_v3  ;;  %v115_v35 = vld [vmem:[%s7776_s1 + $0xc0] sm:$0xff]  ;;  %v116_v38 = vld [vmem:[%s7776_s1 + $0xc8] sm:$0xff]  ;;  %v117_v41 = vld [vmem:[%s7776_s1 + $0xd0] sm:$0xff] }
   0xe   :  { %v27_v36 = vld [vmem:[%s7775_s0] sm:$0xff]  ;;  %v28_v39 = vld [vmem:[%s7775_s0 + $0x8] sm:$0xff]  ;;  %v29_v42 = vld [vmem:[%s7775_s0 + $0x10] sm:$0xff] }
   0xf   :  { %v118_v44 = vld [vmem:[%s7776_s1 + $0xd8] sm:$0xff]  ;;  %v119_v47 = vld [vmem:[%s7776_s1 + $0xe0] sm:$0xff]  ;;  %v120_v50 = vld [vmem:[%s7776_s1 + $0xe8] sm:$0xff] }
  0x10   :  { %v30_v45 = vld [vmem:[%s7775_s0 + $0x18] sm:$0xff]  ;;  %v31_v48 = vld [vmem:[%s7775_s0 + $0x20] sm:$0xff]  ;;  %v32_v51 = vld [vmem:[%s7775_s0 + $0x28] sm:$0xff] }
  0x11   :  { %v121_v53 = vld [vmem:[%s7776_s1 + $0xf0] sm:$0xff]  ;;  %v122_v56 = vld [vmem:[%s7776_s1 + $0xf8] sm:$0xff]  ;;  %v123_v59 = vld [vmem:[%s7776_s1 + $0x100] sm:$0xff] }
  0x12   :  { %v33_v54 = vld [vmem:[%s7775_s0 + $0x30] sm:$0xff]  ;;  %v34_v57 = vld [vmem:[%s7775_s0 + $0x38] sm:$0xff]  ;;  %v35_v60 = vld [vmem:[%s7775_s0 + $0x40] sm:$0xff] }
  0x13   :  { %v124_v62 = vld [vmem:[%s7776_s1 + $0x108] sm:$0xff]  ;;  %v125_v1 = vld [vmem:[%s7776_s1 + $0x110] sm:$0xff] }
  0x14   :  { %v36_v63 = vld [vmem:[%s7775_s0 + $0x48] sm:$0xff]  ;;  %v37_v2 = vld [vmem:[%s7775_s0 + $0x50] sm:$0xff] }
  0x15   :  { %4073 = vmatmul.msk.f32.gmra.mxu0 %vm155_vm0, %v93_v4  ;;  %v126_v4 = vld [vmem:[%s7776_s1 + $0x118] sm:$0xff] }
  0x1d   :  { %4074 = vmatmul.msk.f32.gmra.mxu0 %vm155_vm0, %v94_v5  ;;  %v38_v5 = vld [vmem:[%s7775_s0 + $0x58] sm:$0xff] }
  0x25   :  { %4075 = vmatmul.msk.f32.gmra.mxu0 %vm155_vm0, %v95_v6 }
  0x2d   :  { %4076 = vmatmul.msk.f32.gmra.mxu0 %vm155_vm0, %v96_v7  ;;  %v127_v7 = vld [vmem:[%s7776_s1 + $0x120] sm:$0xff] }
  0x35   :  { %4077 = vmatmul.msk.f32.gmra.mxu0 %vm155_vm0, %v97_v8  ;;  %v39_v8 = vld [vmem:[%s7775_s0 + $0x60] sm:$0xff] }
  0x3d   :  { %4078 = vmatmul.msk.f32.gmra.mxu0 %vm155_vm0, %v98_v9 }
  0x45   :  { %4079 = vmatmul.msk.f32.gmra.mxu0 %vm155_vm0, %v99_v10  ;;  %v128_v10 = vld [vmem:[%s7776_s1 + $0x128] sm:$0xff] }
  0x4d   :  { %4080 = vmatmul.msk.f32.gmra.mxu0 %vm155_vm0, %v100_v11  ;;  %v40_v11 = vld [vmem:[%s7775_s0 + $0x68] sm:$0xff] }
  0x55   :  { %4081 = vmatmul.msk.f32.gmra.mxu0 %vm155_vm0, %v101_v12 }
  0x5d   :  { %4082 = vmatmul.msk.f32.gmra.mxu0 %vm155_vm0, %v102_v13  ;;  %v129_v13 = vld [vmem:[%s7776_s1 + $0x130] sm:$0xff] }
  0x65   :  { %4083 = vmatmul.msk.f32.gmra.mxu0 %vm155_vm0, %v103_v14  ;;  %v41_v14 = vld [vmem:[%s7775_s0 + $0x70] sm:$0xff] }
  0x6d   :  { %4084 = vmatmul.msk.f32.gmra.mxu0 %vm155_vm0, %v104_v15 }
  0x75   :  { %4085 = vmatmul.msk.f32.gmra.mxu0 %vm155_vm0, %v105_v16  ;;  %v130_v16 = vld [vmem:[%s7776_s1 + $0x138] sm:$0xff] }
  0x7d   :  { %4086 = vmatmul.msk.f32.gmra.mxu0 %vm155_vm0, %v106_v17  ;;  %v42_v17 = vld [vmem:[%s7775_s0 + $0x78] sm:$0xff] }
  0x82   :  { %v365_v18 = vpop.f32.mrf.mxu0 }
  0x85   :  { %4087 = vmatmul.msk.f32.gmra.mxu0 %vm155_vm0, %v107_v19  ;;  %v131_v19 = vld [vmem:[%s7776_s1 + $0x140] sm:$0xff] }
  0x8a   :  { %v368_v20 = vpop.f32.mrf.mxu0 }
  0x8d   :  { %4088 = vmatmul.msk.f32.gmra.mxu0 %vm155_vm0, %v108_v21  ;;  %v43_v21 = vld [vmem:[%s7775_s0 + $0x80] sm:$0xff] }
  0x92   :  { %v371_v22 = vpop.f32.mrf.mxu0 }
  0x95   :  { %4089 = vmatmul.msk.f32.gmra.mxu0 %vm155_vm0, %v109_v23  ;;  %v132_v23 = vld [vmem:[%s7776_s1 + $0x148] sm:$0xff] }
  0x9a   :  { %v374_v24 = vpop.f32.mrf.mxu0 }
  0x9d   :  { %4090 = vmatmul.msk.f32.gmra.mxu0 %vm155_vm0, %v110_v25  ;;  %v44_v25 = vld [vmem:[%s7775_s0 + $0x88] sm:$0xff] }
  0xa2   :  { %v377_v26 = vpop.f32.mrf.mxu0 }
  0xa5   :  { %4091 = vmatmul.msk.f32.gmra.mxu0 %vm155_vm0, %v111_v27  ;;  %v133_v27 = vld [vmem:[%s7776_s1 + $0x150] sm:$0xff] }
  0xaa   :  { %v380_v28 = vpop.f32.mrf.mxu0 }
  0xad   :  { %4092 = vmatmul.msk.f32.gmra.mxu0 %vm155_vm0, %v112_v29  ;;  %v45_v29 = vld [vmem:[%s7775_s0 + $0x90] sm:$0xff] }
  0xb2   :  { %v383_v30 = vpop.f32.mrf.mxu0 }
  0xb5   :  { %4093 = vmatmul.msk.f32.gmra.mxu0 %vm155_vm0, %v113_v31  ;;  %v134_v31 = vld [vmem:[%s7776_s1 + $0x158] sm:$0xff] }
  0xba   :  { %v386_v32 = vpop.f32.mrf.mxu0 }
  0xbb   :  { %590 = vmatpush.msra.mxu1 %v386_v32 }
  0xbd   :  { %4094 = vmatmul.msk.f32.gmra.mxu0 %vm155_vm0, %v114_v33  ;;  %591 = vmatpush.msra.mxu1 %v383_v30  ;;  %v46_v33 = vld [vmem:[%s7775_s0 + $0x98] sm:$0xff] }
  0xbf   :  { %592 = vmatpush.msra.mxu1 %v380_v28 }
  0xc1   :  { %593 = vmatpush.msra.mxu1 %v377_v26 }
  0xc2   :  { %v389_v34 = vpop.f32.mrf.mxu0 }
  0xc3   :  { %594 = vmatpush.msra.mxu1 %v374_v24 }
  0xc5   :  { %4095 = vmatmul.msk.f32.gmra.mxu0 %vm155_vm0, %v115_v35  ;;  %595 = vmatpush.msra.mxu1 %v371_v22  ;;  %v135_v35 = vld [vmem:[%s7776_s1 + $0x160] sm:$0xff] }
  0xc7   :  { %596 = vmatpush.msra.mxu1 %v368_v20 }
  0xc9   :  { %597 = vmatpush.msra.mxu1 %v365_v18 }
  0xca   :  { %v392_v37 = vpop.f32.mrf.mxu0  ;;  %4135 = vmatmul.msk.f32.vlgmr.msra.gmra.mxu1 %vm557_vm1, %v27_v36 }
  0xcd   :  { %4096 = vmatmul.msk.f32.gmra.mxu0 %vm155_vm0, %v116_v38 }
  0xd2   :  { %v395_v40 = vpop.f32.mrf.mxu0  ;;  %4136 = vmatmul.msk.f32.gmra.mxu1 %vm557_vm1, %v28_v39  ;;  %v136_v39 = vld [vmem:[%s7776_s1 + $0x168] sm:$0xff] }
  0xd5   :  { %4097 = vmatmul.msk.f32.gmra.mxu0 %vm155_vm0, %v117_v41  ;;  %v48_v41 = vld [vmem:[%s7775_s0 + $0xa8] sm:$0xff] }
  0xda   :  { %v398_v43 = vpop.f32.mrf.mxu0  ;;  %4137 = vmatmul.msk.f32.gmra.mxu1 %vm557_vm1, %v29_v42 }
  0xdd   :  { %4098 = vmatmul.msk.f32.gmra.mxu0 %vm155_vm0, %v118_v44  ;;  %v137_v44 = vld [vmem:[%s7776_s1 + $0x170] sm:$0xff] }
  0xe2   :  { %v401_v46 = vpop.f32.mrf.mxu0  ;;  %4138 = vmatmul.msk.f32.gmra.mxu1 %vm557_vm1, %v30_v45  ;;  %v4465_v45 = vmov 64.0  }
  0xe3   :  { %4332 = vrcp.f32 %v4465_v45 }
  0xe5   :  { %4099 = vmatmul.msk.f32.gmra.mxu0 %vm155_vm0, %v119_v47 }
  0xea   :  { %v404_v49 = vpop.f32.mrf.mxu0  ;;  %4139 = vmatmul.msk.f32.gmra.mxu1 %vm557_vm1, %v31_v48 }
  0xed   :  { %4100 = vmatmul.msk.f32.gmra.mxu0 %vm155_vm0, %v120_v50 }
  0xf2   :  { %v407_v52 = vpop.f32.mrf.mxu0  ;;  %4140 = vmatmul.msk.f32.gmra.mxu1 %vm557_vm1, %v32_v51 }
  0xf5   :  { %4101 = vmatmul.msk.f32.gmra.mxu0 %vm155_vm0, %v121_v53 }
  0xfa   :  { %v410_v55 = vpop.f32.mrf.mxu0  ;;  %4141 = vmatmul.msk.f32.gmra.mxu1 %vm557_vm1, %v33_v54  ;;  %v4333_v54 = vpop.eup %4332 }
  0xfb   :  { %655 = vmatpush.msra.mxu2 %v410_v55  ;;  %vm1252_vm3 = vweird.f32 %v4333_v54 }
  0xfd   :  { %4102 = vmatmul.msk.f32.gmra.mxu0 %vm155_vm0, %v122_v56  ;;  %656 = vmatpush.msra.mxu2 %v407_v52  ;;  %v49_v52 = vld [vmem:[%s7775_s0 + $0xb0] sm:$0xff] }
  0xff   :  { %657 = vmatpush.msra.mxu2 %v404_v49 }
 0x101   :  { %658 = vmatpush.msra.mxu2 %v401_v46 }
 0x102   :  { %v413_v58 = vpop.f32.mrf.mxu0  ;;  %4142 = vmatmul.msk.f32.gmra.mxu1 %vm557_vm1, %v34_v57 }
 0x103   :  { %659 = vmatpush.msra.mxu2 %v398_v43 }
 0x105   :  { %4103 = vmatmul.msk.f32.gmra.mxu0 %vm155_vm0, %v123_v59  ;;  %660 = vmatpush.msra.mxu2 %v395_v40 }
 0x107   :  { %661 = vmatpush.msra.mxu2 %v392_v37  ;;  %v47_v37 = vld [vmem:[%s7775_s0 + $0xa0] sm:$0xff] }
 0x109   :  { %662 = vmatpush.msra.mxu2 %v389_v34 }
 0x10a   :  { %v416_v61 = vpop.f32.mrf.mxu0  ;;  %4143 = vmatmul.msk.f32.vlgmr.msra.gmra.mxu2 %vm557_vm1, %v35_v60 }
 0x10d   :  { %4104 = vmatmul.msk.f32.gmra.mxu0 %vm155_vm0, %v124_v62 }
 0x112   :  { %v419_v0 = vpop.f32.mrf.mxu0  ;;  %4144 = vmatmul.msk.f32.gmra.mxu2 %vm557_vm1, %v36_v63 }
 0x115   :  { %4105 = vmatmul.msk.f32.gmra.mxu0 %vm155_vm0, %v125_v1  ;;  %v50_v1 = vld [vmem:[%s7775_s0 + $0xb8] sm:$0xff] }
 0x11a   :  { %v422_v3 = vpop.f32.mrf.mxu0  ;;  %4145 = vmatmul.msk.f32.gmra.mxu2 %vm557_vm1, %v37_v2 }
 0x11d   :  { %4106 = vmatmul.msk.f32.gmra.mxu0 %vm155_vm0, %v126_v4 }
 0x122   :  { %v425_v6 = vpop.f32.mrf.mxu0  ;;  %4146 = vmatmul.msk.f32.gmra.mxu2 %vm557_vm1, %v38_v5 }
 0x125   :  { %4107 = vmatmul.msk.f32.gmra.mxu0 %vm155_vm0, %v127_v7 }
 0x12a   :  { %v428_v9 = vpop.f32.mrf.mxu0  ;;  %4147 = vmatmul.msk.f32.gmra.mxu2 %vm557_vm1, %v39_v8 }
 0x12d   :  { %4108 = vmatmul.msk.f32.gmra.mxu0 %vm155_vm0, %v128_v10 }
 0x132   :  { %v431_v12 = vpop.f32.mrf.mxu0  ;;  %4148 = vmatmul.msk.f32.gmra.mxu2 %vm557_vm1, %v40_v11  ;;  %v51_v11 = vld [vmem:[%s7775_s0 + $0xc0] sm:$0xff] }
 0x135   :  { %4109 = vmatmul.msk.f32.gmra.mxu0 %vm155_vm0, %v129_v13 }
 0x13a   :  { %v434_v15 = vpop.f32.mrf.mxu0  ;;  %4149 = vmatmul.msk.f32.gmra.mxu2 %vm557_vm1, %v41_v14 }
 0x13b   :  { %720 = vmatpush.msrb.mxu1 %v434_v15  ;;  %v140_v15 = vld [vmem:[%s7776_s1 + $0x188] sm:$0xff] }
 0x13d   :  { %4110 = vmatmul.msk.f32.gmra.mxu0 %vm155_vm0, %v130_v16  ;;  %721 = vmatpush.msrb.mxu1 %v431_v12 }
 0x13f   :  { %722 = vmatpush.msrb.mxu1 %v428_v9 }
 0x141   :  { %723 = vmatpush.msrb.mxu1 %v425_v6  ;;  %v139_v6 = vld [vmem:[%s7776_s1 + $0x180] sm:$0xff] }
 0x142   :  { %v4717_v18 = vpop.f32.mrf.mxu0  ;;  %4150 = vmatmul.msk.f32.gmra.mxu2 %vm557_vm1, %v42_v17 }
 0x143   :  { %724 = vmatpush.msrb.mxu1 %v422_v3 }
 0x145   :  { %4111 = vmatmul.msk.f32.gmra.mxu0 %vm155_vm0, %v131_v19  ;;  %725 = vmatpush.msrb.mxu1 %v419_v0 }
 0x147   :  { %v4724_v20 = vpop.f32.mrf.mxu1  ;;  %726 = vmatpush.msrb.mxu1 %v416_v61  ;;  %v1248_v61 = vmul.f32 64.0, %v4333_v54 }
 0x148   :  { %v1079_v46 = vsel %vm1078_vm2, %v4724_v20, 0.0 }
 0x149   :  { %727 = vmatpush.msrb.mxu1 %v413_v58  ;;  %v138_v58 = vld [vmem:[%s7776_s1 + $0x178] sm:$0xff]  ;;  %v1249_v3 = vsub.f32 1.0, %v1248_v61  ;;  %v143_v61 = vld [vmem:[%s7776_s1 + $0x1a0] sm:$0xff] }
 0x14a   :  { %v4729_v22 = vpop.f32.mrf.mxu0  ;;  %4151 = vmatmul.msk.f32.vlgmr.msrb.gmra.mxu1 %vm557_vm1, %v43_v21 }
 0x14b   :  { %v1250_v8 = vmul.f32 %v4333_v54, %v1249_v3  ;;  %v55_v3 = vld [vmem:[%s7775_s0 + $0xe0] sm:$0xff] }
 0x14d   :  { %4112 = vmatmul.msk.f32.gmra.mxu0 %vm155_vm0, %v132_v23  ;;  %v1251_v12 = vadd.f32 %v4333_v54, %v1250_v8  ;;  %v52_v23 = vld [vmem:[%s7775_s0 + $0xc8] sm:$0xff] }
 0x14e   :  { %v144_v8 = vld [vmem:[%s7776_s1 + $0x1a8] sm:$0xff] }
 0x14f   :  { %v4736_v24 = vpop.f32.mrf.mxu1  ;;  %v4835_v17 = vsel %vm1252_vm3, %v4333_v54, %v1251_v12  ;;  %v56_v12 = vld [vmem:[%s7775_s0 + $0xe8] sm:$0xff] }
 0x150   :  { %v1080_v42 = vsel %vm1078_vm2, %v4736_v24, 0.0  ;;  %7784 = vst [vmem:[#allocation5_spill] sm:$0xff] %v4835_v17 }
 0x151   :  { %v1081_v48 = vadd.f32 %v1080_v42, %v1079_v46 }
 0x152   :  { %v4741_v26 = vpop.f32.mrf.mxu0  ;;  %4152 = vmatmul.msk.f32.gmra.mxu1 %vm557_vm1, %v44_v25 }
 0x155   :  { %4113 = vmatmul.msk.f32.gmra.mxu0 %vm155_vm0, %v133_v27  ;;  %v141_v27 = vld [vmem:[%s7776_s1 + $0x190] sm:$0xff] }
 0x157   :  { %v4748_v28 = vpop.f32.mrf.mxu1 }
 0x158   :  { %v1082_v47 = vsel %vm1078_vm2, %v4748_v28, 0.0 }
 0x159   :  { %v1083_v50 = vadd.f32 %v1082_v47, %v1081_v48 }
 0x15a   :  { %v446_v30 = vpop.f32.mrf.mxu0  ;;  %4153 = vmatmul.msk.f32.gmra.mxu1 %vm557_vm1, %v45_v29 }
 0x15d   :  { %4114 = vmatmul.msk.f32.gmra.mxu0 %vm155_vm0, %v134_v31 }
 0x15f   :  { %v4758_v32 = vpop.f32.mrf.mxu1 }
 0x160   :  { %v1084_v49 = vsel %vm1078_vm2, %v4758_v32, 0.0 }
 0x161   :  { %v1085_v55 = vadd.f32 %v1084_v49, %v1083_v50 }
 0x162   :  { %v449_v34 = vpop.f32.mrf.mxu0  ;;  %4154 = vmatmul.msk.f32.gmra.mxu1 %vm557_vm1, %v46_v33 }
 0x165   :  { %4115 = vmatmul.msk.f32.gmra.mxu0 %vm155_vm0, %v135_v35 }
 0x167   :  { %v4768_v36 = vpop.f32.mrf.mxu1 }
 0x168   :  { %v1086_v53 = vsel %vm1078_vm2, %v4768_v36, 0.0 }
 0x169   :  { %v1087_v59 = vadd.f32 %v1086_v53, %v1085_v55  ;;  %v54_v55 = vld [vmem:[%s7775_s0 + $0xd8] sm:$0xff] }
 0x16a   :  { %v452_v38 = vpop.f32.mrf.mxu0  ;;  %4155 = vmatmul.msk.f32.gmra.mxu1 %vm557_vm1, %v47_v37 }
 0x16d   :  { %4116 = vmatmul.msk.f32.gmra.mxu0 %vm155_vm0, %v136_v39 }
 0x16f   :  { %v4778_v40 = vpop.f32.mrf.mxu1 }
 0x170   :  { %v1088_v56 = vsel %vm1078_vm2, %v4778_v40, 0.0 }
 0x171   :  { %v1089_v62 = vadd.f32 %v1088_v56, %v1087_v59 }
 0x172   :  { %v455_v43 = vpop.f32.mrf.mxu0  ;;  %4156 = vmatmul.msk.f32.gmra.mxu1 %vm557_vm1, %v48_v41 }
 0x175   :  { %4117 = vmatmul.msk.f32.gmra.mxu0 %vm155_vm0, %v137_v44  ;;  %v142_v44 = vld [vmem:[%s7776_s1 + $0x198] sm:$0xff] }
 0x177   :  { %v4796_v51 = vpop.f32.mrf.mxu1 }
 0x178   :  { %v1090_v60 = vsel %vm1078_vm2, %v4796_v51, 0.0 }
 0x179   :  { %v1091_v63 = vadd.f32 %v1090_v60, %v1089_v62 }
 0x17a   :  { %v458_v57 = vpop.f32.mrf.mxu0  ;;  %4157 = vmatmul.msk.f32.gmra.mxu1 %vm557_vm1, %v49_v52 }
 0x17b   :  { %785 = vmatpush.msra.mxu1 %v458_v57 }
 0x17d   :  { %4118 = vmatmul.msk.f32.gmra.mxu0 %vm155_vm0, %v138_v58  ;;  %786 = vmatpush.msra.mxu1 %v455_v43 }
 0x17f   :  { %v620_v0 = vpop.f32.mrf.mxu1  ;;  %787 = vmatpush.msra.mxu1 %v452_v38 }
 0x180   :  { %v1092_v2 = vsel %vm1078_vm2, %v620_v0, 0.0 }
 0x181   :  { %v1093_v4 = vadd.f32 %v1092_v2, %v1091_v63  ;;  %788 = vmatpush.msra.mxu1 %v449_v34 }
 0x182   :  { %v4816_v5 = vpop.f32.mrf.mxu0  ;;  %4158 = vmatmul.msk.f32.gmra.mxu1 %vm557_vm1, %v50_v1 }
 0x183   :  { %v1094_v7 = vrot.slane %v1093_v4, 4  ;;  %789 = vmatpush.msra.mxu1 %v446_v30 }
 0x185   :  { %v1095_v9 = vadd.f32 %v1094_v7, %v1093_v4  ;;  %4119 = vmatmul.msk.f32.gmra.mxu0 %vm155_vm0, %v139_v6  ;;  %790 = vmatpush.msra.mxu1 %v4741_v26 }
 0x187   :  { %v1096_v10 = vrot.slane %v1095_v9, 2  ;;  %791 = vmatpush.msra.mxu1 %v4729_v22 }
 0x189   :  { %v1097_v13 = vadd.f32 %v1096_v10, %v1095_v9  ;;  %792 = vmatpush.msra.mxu1 %v4717_v18  ;;  %v4843_v18 = vld [vmem:[%s7777_s2 + $0x32] sm:$0x1] }
 0x18a   :  { %v4829_v14 = vpop.f32.mrf.mxu0  ;;  %4159 = vmatmul.msk.f32.vlgmr.msra.gmra.mxu1 %vm557_vm1, %v51_v11 }
 0x18b   :  { %v1098_v16 = vrot.slane %v1097_v13, 1 }
 0x18d   :  { %v1099_v19 = vadd.f32 %v1098_v16, %v1097_v13  ;;  %4120 = vmatmul.msk.f32.gmra.mxu0 %vm155_vm0, %v140_v15  ;;  %v4838_v21 = vpop.f32.mrf.mxu2 }
 0x18f   :  { %v1254_v22 = vmul.f32 %v4835_v17, %v1099_v19  ;;  %v145_v19 = vld [vmem:[%s7776_s1 + $0x1b0] sm:$0xff] }
 0x191   :  { %v1262_v25 = vmul.f32 %v1254_v22, %v4843_v18  ;;  %v20_v22 = vld [vmem:[%s7777_s2 + $0x28] sm:$0xff] }
 0x192   :  { %v4850_v26 = vpop.f32.mrf.mxu0  ;;  %4160 = vmatmul.msk.f32.gmra.mxu1 %vm557_vm1, %v52_v23  ;;  %2387 = vmatpush.msra.mxu3 %v20_v22 }
 0x193   :  { %v1270_v29 = vperm.slane %v1262_v25, 0  ;;  %v19_v25 = vld [vmem:[%s7777_s2 + $0x20] sm:$0xff] }
 0x194   :  { %2388 = vmatpush.msra.mxu3 %v19_v25 }
 0x195   :  { %v4857_v30 = vsub.f32 %v4724_v20, %v1270_v29  ;;  %v4860_v31 = vsub.f32 %v4736_v24, %v1270_v29  ;;  %v4863_v33 = vsub.f32 %v4748_v28, %v1270_v29  ;;  %v4866_v34 = vsub.f32 %v4758_v32, %v1270_v29  ;;  %4121 = vmatmul.msk.f32.gmra.mxu0 %vm155_vm0, %v141_v27  ;;  %v4869_v35 = vpop.f32.mrf.mxu2  ;;  %v53_v32 = vld [vmem:[%s7775_s0 + $0xd0] sm:$0xff] }
 0x196   :  { %v4872_v37 = vsub.f32 %v4768_v36, %v1270_v29  ;;  %v4884_v38 = vsub.f32 %v4778_v40, %v1270_v29  ;;  %v4897_v45 = vsub.f32 %v4796_v51, %v1270_v29  ;;  %v4902_v48 = vsub.f32 %v620_v0, %v1270_v29 }
 0x197   :  { %v1342_v20 = vmul.f32 %v4857_v30, %v4857_v30  ;;  %v1343_v24 = vmul.f32 %v4860_v31, %v4860_v31  ;;  %v1344_v28 = vmul.f32 %v4863_v33, %v4863_v33  ;;  %v1345_v36 = vmul.f32 %v4866_v34, %v4866_v34 }
 0x198   :  { %v1346_v40 = vmul.f32 %v4872_v37, %v4872_v37  ;;  %v1347_v49 = vmul.f32 %v4884_v38, %v4884_v38  ;;  %v1348_v51 = vmul.f32 %v4897_v45, %v4897_v45  ;;  %v1349_v57 = vmul.f32 %v4902_v48, %v4902_v48 }
 0x199   :  { %v1406_v39 = vsel %vm1078_vm2, %v1342_v20, 0.0  ;;  %v1407_v41 = vsel %vm1078_vm2, %v1343_v24, 0.0  ;;  %v1409_v46 = vsel %vm1078_vm2, %v1344_v28, 0.0  ;;  %v1411_v50 = vsel %vm1078_vm2, %v1345_v36, 0.0  ;;  %v18_v20 = vld [vmem:[%s7777_s2 + $0x18] sm:$0xff]  ;;  %v57_v24 = vld [vmem:[%s7775_s0 + $0xf0] sm:$0xff] }
 0x19a   :  { %v1408_v42 = vadd.f32 %v1407_v41, %v1406_v39  ;;  %v4890_v43 = vpop.f32.mrf.mxu0  ;;  %4161 = vmatmul.msk.f32.gmra.mxu1 %vm557_vm1, %v53_v32  ;;  %v1413_v54 = vsel %vm1078_vm2, %v1346_v40, 0.0  ;;  %v1415_v58 = vsel %vm1078_vm2, %v1347_v49, 0.0  ;;  %v1417_v62 = vsel %vm1078_vm2, %v1348_v51, 0.0  ;;  %2389 = vmatpush.msra.mxu3 %v18_v20  ;;  %v17_v32 = vld [vmem:[%s7777_s2 + $0x10] sm:$0xff]  ;;  %v60_v20 = vld [vmem:[%s7775_s0 + $0x108] sm:$0xff] }
 0x19b   :  { %v1419_v0 = vsel %vm1078_vm2, %v1349_v57, 0.0  ;;  %v1101_v28 = vsel %vm1078_vm2, %v4869_v35, 0.0  ;;  %v1100_v36 = vsel %vm1078_vm2, %v4838_v21, 0.0 }
 0x19c   :  { %v1410_v47 = vadd.f32 %v1409_v46, %v1408_v42  ;;  %2390 = vmatpush.msra.mxu3 %v17_v32  ;;  %v146_v42 = vld [vmem:[%s7776_s1 + $0x1b8] sm:$0xff] }
 0x19d   :  { %4122 = vmatmul.msk.f32.gmra.mxu0 %vm155_vm0, %v142_v44  ;;  %v4908_v52 = vpop.f32.mrf.mxu2  ;;  %v1102_v44 = vadd.f32 %v1101_v28, %v1100_v36 }
 0x19e   :  { %v1412_v53 = vadd.f32 %v1411_v50, %v1410_v47  ;;  %v1103_v39 = vsel %vm1078_vm2, %v4908_v52, 0.0 }
 0x19f   :  { %v1104_v46 = vadd.f32 %v1103_v39, %v1102_v44 }
 0x1a0   :  { %v1414_v56 = vadd.f32 %v1413_v54, %v1412_v53  ;;  %v58_v54 = vld [vmem:[%s7775_s0 + $0xf8] sm:$0xff] }
 0x1a2   :  { %v1416_v59 = vadd.f32 %v1415_v58, %v1414_v56  ;;  %v473_v60 = vpop.f32.mrf.mxu0  ;;  %4162 = vmatmul.msk.f32.gmra.mxu1 %vm557_vm1, %v54_v55 }
 0x1a4   :  { %v1418_v63 = vadd.f32 %v1417_v62, %v1416_v59 }
 0x1a5   :  { %4123 = vmatmul.msk.f32.gmra.mxu0 %vm155_vm0, %v143_v61  ;;  %v4926_v1 = vpop.f32.mrf.mxu2  ;;  %v147_v61 = vld [vmem:[%s7776_s1 + $0x1c0] sm:$0xff] }
 0x1a6   :  { %v1420_v2 = vadd.f32 %v1419_v0, %v1418_v63  ;;  %v1105_v40 = vsel %vm1078_vm2, %v4926_v1, 0.0 }
 0x1a7   :  { %v1106_v51 = vadd.f32 %v1105_v40, %v1104_v46 }
 0x1a8   :  { %v1421_v4 = vrot.slane %v1420_v2, 4 }
 0x1aa   :  { %v1422_v6 = vadd.f32 %v1421_v4, %v1420_v2  ;;  %v476_v7 = vpop.f32.mrf.mxu0  ;;  %4163 = vmatmul.msk.f32.gmra.mxu1 %vm557_vm1, %v55_v3  ;;  %v5004_v4 = vld [vmem:[%s7777_s2 + $0x30] sm:$0x1] }
 0x1ac   :  { %v1423_v9 = vrot.slane %v1422_v6, 2 }
 0x1ad   :  { %4124 = vmatmul.msk.f32.gmra.mxu0 %vm155_vm0, %v144_v8  ;;  %v4936_v10 = vpop.f32.mrf.mxu2  ;;  %v59_v8 = vld [vmem:[%s7775_s0 + $0x100] sm:$0xff] }
 0x1ae   :  { %v1424_v11 = vadd.f32 %v1423_v9, %v1422_v6  ;;  %v1107_v50 = vsel %vm1078_vm2, %v4936_v10, 0.0 }
 0x1af   :  { %v1108_v57 = vadd.f32 %v1107_v50, %v1106_v51 }
 0x1b0   :  { %v1425_v13 = vrot.slane %v1424_v11, 1 }
 0x1b2   :  { %v1426_v15 = vadd.f32 %v1425_v13, %v1424_v11  ;;  %v479_v16 = vpop.f32.mrf.mxu0  ;;  %4164 = vmatmul.msk.f32.gmra.mxu1 %vm557_vm1, %v56_v12  ;;  %v148_v13 = vld [vmem:[%s7776_s1 + $0x1c8] sm:$0xff] }
 0x1b4   :  { %v1574_v23 = vmul.f32 %v1426_v15, %v4835_v17 }
 0x1b5   :  { %4125 = vmatmul.msk.f32.gmra.mxu0 %vm155_vm0, %v145_v19  ;;  %v4953_v27 = vpop.f32.mrf.mxu2 }
 0x1b6   :  { %v1582_v29 = vadd.f32 1e-05, %v1574_v23  ;;  %v1109_v55 = vsel %vm1078_vm2, %v4953_v27, 0.0 }
 0x1b7   :  { %v1110_v63 = vadd.f32 %v1109_v55, %v1108_v57 }
 0x1b8   :  { %4334 = vrsqrt.f32 %v1582_v29  ;;  %vm1596_vm5 = vweird.f32 %v1582_v29 }
 0x1ba   :  { %v482_v41 = vpop.f32.mrf.mxu0  ;;  %4165 = vmatmul.msk.f32.gmra.mxu1 %vm557_vm1, %v57_v24 }
 0x1bb   :  { %850 = vmatpush.msrb.mxu2 %v482_v41 }
 0x1bd   :  { %4126 = vmatmul.msk.f32.gmra.mxu0 %vm155_vm0, %v146_v42  ;;  %v4977_v47 = vpop.f32.mrf.mxu2  ;;  %851 = vmatpush.msrb.mxu2 %v479_v16  ;;  %v5023_v16 = vld [vmem:[%s7777_s2 + $0x31] ss:$0 sm:$0xff] }
 0x1be   :  { %v4335_v49 = vpop.eup %4334  ;;  %v1111_v58 = vsel %vm1078_vm2, %v4977_v47, 0.0 }
 0x1bf   :  { %v1591_v53 = vmul.f32 %v4335_v49, %v1582_v29  ;;  %852 = vmatpush.msrb.mxu2 %v476_v7  ;;  %vm1597_vm4 = vweird.f32 %v4335_v49  ;;  %v1112_v2 = vadd.f32 %v1111_v58, %v1110_v63 }
 0x1c0   :  { %vm1598_vm6 = vmor %vm1596_vm5, %vm1597_vm4 }
 0x1c1   :  { %v1592_v56 = vmul.f32 %v4335_v49, %v1591_v53  ;;  %853 = vmatpush.msrb.mxu2 %v473_v60 }
 0x1c2   :  { %v4988_v59 = vpop.f32.mrf.mxu0  ;;  %4166 = vmatmul.msk.f32.gmra.mxu1 %vm557_vm1, %v58_v54 }
 0x1c3   :  { %v1593_v62 = vmul.f32 0.5, %v1592_v56  ;;  %854 = vmatpush.msrb.mxu2 %v4890_v43 }
 0x1c5   :  { %v1594_v0 = vsub.f32 1.5, %v1593_v62  ;;  %4127 = vmatmul.msk.f32.gmra.mxu0 %vm155_vm0, %v147_v61  ;;  %v4996_v60 = vpop.f32.mrf.mxu2  ;;  %855 = vmatpush.msrb.mxu2 %v4850_v26  ;;  %v61_v62 = vld [vmem:[%s7775_s0 + $0x110] sm:$0xff] }
 0x1c6   :  { %v1113_v3 = vsel %vm1078_vm2, %v4996_v60, 0.0 }
 0x1c7   :  { %v1595_v6 = vmul.f32 %v4335_v49, %v1594_v0  ;;  %v1114_v43 = vadd.f32 %v1113_v3, %v1112_v2  ;;  %v5006_v7 = vpop.f32.mrf.mxu1  ;;  %856 = vmatpush.msrb.mxu2 %v4829_v14 }
 0x1c9   :  { %v1599_v26 = vsel %vm1598_vm6, %v4335_v49, %v1595_v6  ;;  %v1115_v9 = vrot.slane %v1114_v43, 4  ;;  %857 = vmatpush.msrb.mxu2 %v4816_v5 }
 0x1ca   :  { %v1670_v11 = vmul.f32 %v1599_v26, %v5004_v4  ;;  %v5014_v12 = vpop.f32.mrf.mxu0  ;;  %4167 = vmatmul.msk.f32.vlgmr.msrb.gmra.mxu2 %vm557_vm1, %v59_v8 }
 0x1cb   :  { %v1116_v14 = vadd.f32 %v1115_v9, %v1114_v43  ;;  %v150_v9 = vld [vmem:[%s7776_s1 + $0x1d8] sm:$0xff] }
 0x1cc   :  { %v1678_v15 = vperm.slane %v1670_v11, 0 }
 0x1cd   :  { %v1117_v19 = vrot.slane %v1116_v14, 2  ;;  %4128 = vmatmul.msk.f32.gmra.mxu0 %vm155_vm0, %v148_v13 }
 0x1ce   :  { %v1686_v5 = vmul.f32 %v1678_v15, %v4857_v30  ;;  %v1687_v22 = vmul.f32 %v1678_v15, %v4860_v31  ;;  %v1688_v23 = vmul.f32 %v1678_v15, %v4863_v33  ;;  %v1689_v24 = vmul.f32 %v1678_v15, %v4866_v34  ;;  %v149_v33 = vld [vmem:[%s7776_s1 + $0x1d0] sm:$0xff] }
 0x1cf   :  { %v1118_v25 = vadd.f32 %v1117_v19, %v1116_v14  ;;  %v5029_v29 = vpop.f32.mrf.mxu1  ;;  %v1690_v30 = vmul.f32 %v1678_v15, %v4872_v37  ;;  %v1691_v41 = vmul.f32 %v1678_v15, %v4884_v38  ;;  %v1693_v0 = vmul.f32 %v1678_v15, %v4902_v48 }
 0x1d0   :  { %v1751_v28 = vadd.f32 %v5023_v16, %v1686_v5  ;;  %v1752_v32 = vadd.f32 %v5023_v16, %v1687_v22  ;;  %v1753_v36 = vadd.f32 %v5023_v16, %v1688_v23  ;;  %v1754_v39 = vadd.f32 %v5023_v16, %v1689_v24 }
 0x1d1   :  { %v1119_v31 = vrot.slane %v1118_v25, 1  ;;  %v1755_v53 = vadd.f32 %v5023_v16, %v1690_v30  ;;  %v1756_v6 = vadd.f32 %v5023_v16, %v1691_v41  ;;  %v1692_v48 = vmul.f32 %v1678_v15, %v4897_v45 }
 0x1d2   :  { %v5044_v42 = vpop.f32.mrf.mxu0  ;;  %4168 = vmatmul.msk.f32.gmra.mxu2 %vm557_vm1, %v60_v20  ;;  %vm1815_vm7 = vcmp.gt.f32.partialorder %v1751_v28, 0.0  ;;  %v1879_v34 = vmul.f32 0.01, %v1751_v28  ;;  %vm1816_vm8 = vcmp.gt.f32.partialorder %v1752_v32, 0.0  ;;  %v1880_v44 = vmul.f32 0.01, %v1752_v32 }
 0x1d3   :  { %v1120_v40 = vadd.f32 %v1119_v31, %v1118_v25  ;;  %vm1817_vm9 = vcmp.gt.f32.partialorder %v1753_v36, 0.0  ;;  %v1881_v37 = vmul.f32 0.01, %v1753_v36  ;;  %vm1818_vm10 = vcmp.gt.f32.partialorder %v1754_v39, 0.0 }
 0x1d4   :  { %v1943_v46 = vsel %vm1815_vm7, %v1751_v28, %v1879_v34  ;;  %v1944_v49 = vsel %vm1816_vm8, %v1752_v32, %v1880_v44  ;;  %v1882_v50 = vmul.f32 0.01, %v1754_v39  ;;  %v1883_v3 = vmul.f32 0.01, %v1755_v53  ;;  %v62_v32 = vld [vmem:[%s7775_s0 + $0x118] sm:$0xff] }
 0x1d5   :  { %v1255_v51 = vmul.f32 %v4835_v17, %v1120_v40  ;;  %4129 = vmatmul.msk.f32.gmra.mxu0 %vm155_vm0, %v149_v33  ;;  %v2007_v38 = vsel %vm1078_vm2, %v1943_v46, 0.0  ;;  %4199 = vmatmul.msk.f32.vlgmr.msra.gmra.mxu3 %vm1078_vm2, %v1943_v46  ;;  %v2008_v54 = vsel %vm1078_vm2, %v1944_v49, 0.0  ;;  %v5053_v55 = vsel %vm1817_vm9, %v1753_v36, %v1881_v37 }
 0x1d6   :  { %v2009_v56 = vadd.f32 %v2008_v54, %v2007_v38  ;;  %v5055_v57 = vsel %vm1818_vm10, %v1754_v39, %v1882_v50  ;;  %v2010_v63 = vsel %vm1078_vm2, %v5053_v55, 0.0  ;;  %vm1819_vm11 = vcmp.gt.f32.partialorder %v1755_v53, 0.0 }
 0x1d7   :  { %v1263_v58 = vmul.f32 %v1255_v51, %v4843_v18  ;;  %v5058_v61 = vpop.f32.mrf.mxu1  ;;  %v2012_v8 = vsel %vm1078_vm2, %v5055_v57, 0.0  ;;  %v5088_v22 = vsel %vm1819_vm11, %v1755_v53, %v1883_v3  ;;  %v1884_v23 = vmul.f32 0.01, %v1756_v6 }
 0x1d8   :  { %v2011_v2 = vadd.f32 %v2010_v63, %v2009_v56  ;;  %v1758_v25 = vadd.f32 %v5023_v16, %v1693_v0  ;;  %vm1820_vm12 = vcmp.gt.f32.partialorder %v1756_v6, 0.0 }
 0x1d9   :  { %v1271_v43 = vperm.slane %v1263_v58, 0  ;;  %v5126_v34 = vsel %vm1820_vm12, %v1756_v6, %v1884_v23  ;;  %v63_v6 = vld [vmem:[%s7775_s0 + $0x120] sm:$0xff]  ;;  %vm4017_vm12 = vcmask 1041409  }
 0x1da   :  { %v5069_v26 = vpop.f32.mrf.mxu0  ;;  %4169 = vmatmul.msk.f32.gmra.mxu2 %vm557_vm1, %v61_v62  ;;  %v2013_v11 = vadd.f32 %v2012_v8, %v2011_v2  ;;  %vm1822_vm13 = vcmp.gt.f32.partialorder %v1758_v25, 0.0  ;;  %v1886_v53 = vmul.f32 0.01, %v1758_v25 }
 0x1db   :  { %v5077_v13 = vsub.f32 %v4838_v21, %v1271_v43  ;;  %v5080_v14 = vsub.f32 %v4869_v35, %v1271_v43  ;;  %v5083_v19 = vsub.f32 %v4908_v52, %v1271_v43  ;;  %v5086_v5 = vsub.f32 %v4926_v1, %v1271_v43 }
 0x1dc   :  { %v5092_v20 = vsub.f32 %v4936_v10, %v1271_v43  ;;  %v5102_v52 = vsub.f32 %v4953_v27, %v1271_v43  ;;  %v1757_v1 = vadd.f32 %v5023_v16, %v1692_v48  ;;  %v2014_v27 = vsel %vm1078_vm2, %v5088_v22, 0.0 }
 0x1dd   :  { %v1350_v21 = vmul.f32 %v5077_v13, %v5077_v13  ;;  %v1351_v35 = vmul.f32 %v5080_v14, %v5080_v14  ;;  %v1352_v45 = vmul.f32 %v5083_v19, %v5083_v19  ;;  %4130 = vmatmul.msk.f32.gmra.mxu0 %vm155_vm0, %v150_v9  ;;  %4200 = vmatmul.msk.f32.gmra.mxu3 %vm1078_vm2, %v1944_v49 }
 0x1de   :  { %v1353_v10 = vmul.f32 %v5086_v5, %v5086_v5  ;;  %v5118_v36 = vsub.f32 %v4977_v47, %v1271_v43  ;;  %v5121_v30 = vsub.f32 %v4996_v60, %v1271_v43  ;;  %v1354_v33 = vmul.f32 %v5092_v20, %v5092_v20  ;;  %v151_v47 = vld [vmem:[%s7776_s1 + $0x1e0] sm:$0xff] }
 0x1df   :  { %v1427_v15 = vsel %vm1078_vm2, %v1350_v21, 0.0  ;;  %v1428_v24 = vsel %vm1078_vm2, %v1351_v35, 0.0  ;;  %v5110_v28 = vpop.f32.mrf.mxu1  ;;  %v1430_v39 = vsel %vm1078_vm2, %v1352_v45, 0.0  ;;  %v2015_v41 = vadd.f32 %v2014_v27, %v2013_v11 }
 0x1e0   :  { %v1429_v31 = vadd.f32 %v1428_v24, %v1427_v15  ;;  %v1355_v44 = vmul.f32 %v5102_v52, %v5102_v52  ;;  %v2016_v60 = vsel %vm1078_vm2, %v5126_v34, 0.0  ;;  %vm1821_vm14 = vcmp.gt.f32.partialorder %v1757_v1, 0.0 }
 0x1e1   :  { %v1432_v46 = vsel %vm1078_vm2, %v1353_v10, 0.0  ;;  %v2017_v49 = vadd.f32 %v2016_v60, %v2015_v41  ;;  %v1885_v50 = vmul.f32 0.01, %v1757_v1  ;;  %v1356_v38 = vmul.f32 %v5118_v36, %v5118_v36  ;;  %v64_v10 = vld [vmem:[%s7775_s0 + $0x128] sm:$0xff] }
 0x1e2   :  { %v1431_v40 = vadd.f32 %v1430_v39, %v1429_v31  ;;  %v5130_v37 = vpop.f32.mrf.mxu0  ;;  %4170 = vmatmul.msk.f32.gmra.mxu2 %vm557_vm1, %v62_v32  ;;  %v1434_v54 = vsel %vm1078_vm2, %v1354_v33, 0.0  ;;  %v5146_v58 = vsel %vm1822_vm13, %v1758_v25, %v1886_v53  ;;  %v1357_v0 = vmul.f32 %v5121_v30, %v5121_v30  ;;  %v152_v25 = vld [vmem:[%s7776_s1 + $0x1e8] sm:$0xff]  ;;  %v153_v31 = vld [vmem:[%s7776_s1 + $0x1f0] sm:$0xff] }
 0x1e3   :  { %v5143_v56 = vsel %vm1821_vm14, %v1757_v1, %v1885_v50  ;;  %v1436_v2 = vsel %vm1078_vm2, %v1355_v44, 0.0  ;;  %v2020_v9 = vsel %vm1078_vm2, %v5146_v58, 0.0  ;;  %v1122_v32 = vsel %vm1078_vm2, %v5029_v29, 0.0 }
 0x1e4   :  { %v1433_v51 = vadd.f32 %v1432_v46, %v1431_v40  ;;  %v2018_v63 = vsel %vm1078_vm2, %v5143_v56, 0.0  ;;  %v1440_v21 = vsel %vm1078_vm2, %v1357_v0, 0.0  ;;  %v1124_v39 = vsel %vm1078_vm2, %v5058_v61, 0.0  ;;  %v65_v46 = vld [vmem:[%s7775_s0 + $0x130] sm:$0xff] }
 0x1e5   :  { %4131 = vmatmul.msk.f32.gmra.mxu0 %vm155_vm0, %v151_v47  ;;  %4201 = vmatmul.msk.f32.gmra.mxu3 %vm1078_vm2, %v5053_v55  ;;  %v2019_v43 = vadd.f32 %v2018_v63, %v2017_v49  ;;  %v1438_v55 = vsel %vm1078_vm2, %v1356_v38, 0.0  ;;  %v1126_v40 = vsel %vm1078_vm2, %v5110_v28, 0.0 }
 0x1e6   :  { %v1435_v62 = vadd.f32 %v1434_v54, %v1433_v51 }
 0x1e7   :  { %v5155_v3 = vpop.f32.mrf.mxu1  ;;  %v5163_v11 = vadd.f32 %v2020_v9, %v2019_v43 }
 0x1e8   :  { %v1437_v8 = vadd.f32 %v1436_v2, %v1435_v62  ;;  %v1128_v50 = vsel %vm1078_vm2, %v5155_v3, 0.0 }
 0x1ea   :  { %v1439_v48 = vadd.f32 %v1438_v55, %v1437_v8  ;;  %v500_v23 = vpop.f32.mrf.mxu0  ;;  %4171 = vmatmul.msk.f32.gmra.mxu2 %vm557_vm1, %v63_v6  ;;  %v66_v8 = vld [vmem:[%s7775_s0 + $0x138] sm:$0xff] }
 0x1ec   :  { %v1441_v35 = vadd.f32 %v1440_v21, %v1439_v48 }
 0x1ed   :  { %4132 = vmatmul.msk.f32.gmra.mxu0 %vm155_vm0, %v152_v25  ;;  %4202 = vmatmul.msk.f32.gmra.mxu3 %vm1078_vm2, %v5055_v57  ;;  %v1121_v57 = vsel %vm1078_vm2, %v5006_v7, 0.0 }
 0x1ee   :  { %v1442_v45 = vrot.slane %v1441_v35, 4  ;;  %v1123_v41 = vadd.f32 %v1122_v32, %v1121_v57 }
 0x1ef   :  { %v5173_v1 = vpop.f32.mrf.mxu1 }
 0x1f0   :  { %v1443_v15 = vadd.f32 %v1442_v45, %v1441_v35  ;;  %v1125_v47 = vadd.f32 %v1124_v39, %v1123_v41  ;;  %v1130_v38 = vsel %vm1078_vm2, %v5173_v1, 0.0 }
 0x1f2   :  { %v1444_v24 = vrot.slane %v1443_v15, 2  ;;  %v503_v27 = vpop.f32.mrf.mxu0  ;;  %4172 = vmatmul.msk.f32.gmra.mxu2 %vm557_vm1, %v64_v10  ;;  %v1127_v53 = vadd.f32 %v1126_v40, %v1125_v47 }
 0x1f4   :  { %v1445_v33 = vadd.f32 %v1444_v24, %v1443_v15  ;;  %v1129_v62 = vadd.f32 %v1128_v50, %v1127_v53 }
 0x1f5   :  { %4133 = vmatmul.msk.f32.gmra.mxu0 %vm155_vm0, %v153_v31  ;;  %4203 = vmatmul.msk.f32.gmra.mxu3 %vm1078_vm2, %v5088_v22  ;;  %v154_v22 = vld [vmem:[%s7776_s1 + $0x1f8] sm:$0xff] }
 0x1f6   :  { %v1446_v44 = vrot.slane %v1445_v33, 1  ;;  %v1131_v2 = vadd.f32 %v1130_v38, %v1129_v62 }
 0x1f7   :  { %v5193_v60 = vpop.f32.mrf.mxu1 }
 0x1f8   :  { %v1447_v49 = vadd.f32 %v1446_v44, %v1445_v33  ;;  %v1132_v0 = vsel %vm1078_vm2, %v5193_v60, 0.0 }
 0x1f9   :  { %v1133_v6 = vadd.f32 %v1132_v0, %v1131_v2  ;;  %v2022_v0 = vrot.slane %v5163_v11, 4 }
 0x1fa   :  { %v1575_v51 = vmul.f32 %v1447_v49, %v4835_v17  ;;  %v506_v54 = vpop.f32.mrf.mxu0  ;;  %4173 = vmatmul.msk.f32.gmra.mxu2 %vm557_vm1, %v65_v46 }
 0x1fb   :  { %915 = vmatpush.msra.mxu2 %v506_v54 }
 0x1fc   :  { %v1583_v63 = vadd.f32 1e-05, %v1575_v51 }
 0x1fd   :  { %4134 = vmatmul.msk.f32.gmra.mxu0 %vm155_vm0, %v154_v22  ;;  %916 = vmatpush.msra.mxu2 %v503_v27 }
 0x1fe   :  { %4336 = vrsqrt.f32 %v1583_v63  ;;  %4204 = vmatmul.msk.f32.gmra.mxu3 %vm1078_vm2, %v5126_v34  ;;  %vm1606_vm0 = vweird.f32 %v1583_v63 }
 0x1ff   :  { %v750_v43 = vpop.f32.mrf.mxu1  ;;  %917 = vmatpush.msra.mxu2 %v500_v23 }
 0x200   :  { %v1134_v9 = vsel %vm1078_vm2, %v750_v43, 0.0 }
 0x201   :  { %v1135_v55 = vadd.f32 %v1134_v9, %v1133_v6  ;;  %918 = vmatpush.msra.mxu2 %v5130_v37  ;;  %v67_v37 = vld [vmem:[%s7775_s0 + $0x140] sm:$0xff] }
 0x202   :  { %v5217_v48 = vpop.f32.mrf.mxu0  ;;  %4174 = vmatmul.msk.f32.gmra.mxu2 %vm557_vm1, %v66_v8 }
 0x203   :  { %v1136_v25 = vrot.slane %v1135_v55, 4  ;;  %919 = vmatpush.msra.mxu2 %v5069_v26 }
 0x204   :  { %v4337_v34 = vpop.eup %4336 }
 0x205   :  { %v1601_v21 = vmul.f32 %v4337_v34, %v1583_v63  ;;  %v1137_v35 = vadd.f32 %v1136_v25, %v1135_v55  ;;  %920 = vmatpush.msra.mxu2 %v5044_v42  ;;  %vm1607_vm15 = vweird.f32 %v4337_v34 }
 0x206   :  { %4205 = vmatmul.msk.f32.gmra.mxu3 %vm1078_vm2, %v5143_v56  ;;  %vm1608_vm3 = vmor %vm1606_vm0, %vm1607_vm15 }
 0x207   :  { %v1602_v23 = vmul.f32 %v4337_v34, %v1601_v21  ;;  %v1138_v45 = vrot.slane %v1137_v35, 2  ;;  %v5224_v10 = vpop.f32.mrf.mxu1  ;;  %921 = vmatpush.msra.mxu2 %v5014_v12 }
 0x209   :  { %v1603_v15 = vmul.f32 0.5, %v1602_v23  ;;  %v1139_v26 = vadd.f32 %v1138_v45, %v1137_v35  ;;  %922 = vmatpush.msra.mxu2 %v4988_v59  ;;  %v68_v59 = vld [vmem:[%s7775_s0 + $0x148] sm:$0xff] }
 0x20a   :  { %v5231_v24 = vpop.f32.mrf.mxu0  ;;  %4175 = vmatmul.msk.f32.vlgmr.msra.gmra.mxu2 %vm557_vm1, %v67_v37 }
 0x20b   :  { %v1604_v42 = vsub.f32 1.5, %v1603_v15  ;;  %v1140_v56 = vrot.slane %v1139_v26, 1 }
 0x20d   :  { %v1605_v32 = vmul.f32 %v4337_v34, %v1604_v42  ;;  %v1141_v27 = vadd.f32 %v1140_v56, %v1139_v26 }
 0x20e   :  { %4206 = vmatmul.msk.f32.gmra.mxu3 %vm1078_vm2, %v5146_v58 }
 0x20f   :  { %v1609_v12 = vsel %vm1608_vm3, %v4337_v34, %v1605_v32  ;;  %v1256_v31 = vmul.f32 %v4835_v17, %v1141_v27  ;;  %v5237_v33 = vpop.f32.mrf.mxu1  ;;  %v70_v27 = vld [vmem:[%s7775_s0 + $0x158] sm:$0xff] }
 0x210   :  { %v1671_v57 = vmul.f32 %v1609_v12, %v5004_v4 }
 0x211   :  { %v1264_v39 = vmul.f32 %v1256_v31, %v4843_v18 }
 0x212   :  { %v5244_v41 = vperm.slane %v1671_v57, 0  ;;  %v5246_v44 = vpop.f32.mrf.mxu0  ;;  %4176 = vmatmul.msk.f32.gmra.mxu2 %vm557_vm1, %v68_v59 }
 0x213   :  { %v1272_v58 = vperm.slane %v1264_v39, 0 }
 0x214   :  { %v1694_v40 = vmul.f32 %v5244_v41, %v5077_v13  ;;  %v1695_v47 = vmul.f32 %v5244_v41, %v5080_v14  ;;  %v1696_v54 = vmul.f32 %v5244_v41, %v5083_v19  ;;  %v1701_v22 = vmul.f32 %v5244_v41, %v5121_v30 }
 0x215   :  { %v5254_v46 = vsub.f32 %v5006_v7, %v1272_v58  ;;  %v5257_v49 = vsub.f32 %v5029_v29, %v1272_v58  ;;  %v5260_v18 = vsub.f32 %v5058_v61, %v1272_v58  ;;  %v5263_v50 = vsub.f32 %v5110_v28, %v1272_v58 }
 0x216   :  { %v5266_v53 = vsub.f32 %v5155_v3, %v1272_v58  ;;  %v5269_v13 = vsub.f32 %v5173_v1, %v1272_v58  ;;  %v5272_v14 = vsub.f32 %v5193_v60, %v1272_v58  ;;  %v5274_v7 = vsub.f32 %v750_v43, %v1272_v58  ;;  %v69_v1 = vld [vmem:[%s7775_s0 + $0x150] sm:$0xff] }
 0x217   :  { %v1358_v29 = vmul.f32 %v5254_v46, %v5254_v46  ;;  %v1359_v61 = vmul.f32 %v5257_v49, %v5257_v49  ;;  %v1360_v28 = vmul.f32 %v5260_v18, %v5260_v18  ;;  %v1361_v3 = vmul.f32 %v5263_v50, %v5263_v50  ;;  %v5284_v51 = vpop.f32.mrf.mxu1 }
 0x218   :  { %v1362_v60 = vmul.f32 %v5266_v53, %v5266_v53  ;;  %v1363_v38 = vmul.f32 %v5269_v13, %v5269_v13  ;;  %v1364_v2 = vmul.f32 %v5272_v14, %v5272_v14  ;;  %v1365_v6 = vmul.f32 %v5274_v7, %v5274_v7 }
 0x219   :  { %v1448_v62 = vsel %vm1078_vm2, %v1358_v29, 0.0  ;;  %v1449_v63 = vsel %vm1078_vm2, %v1359_v61, 0.0  ;;  %v1451_v8 = vsel %vm1078_vm2, %v1360_v28, 0.0  ;;  %v1453_v19 = vsel %vm1078_vm2, %v1361_v3, 0.0 }
 0x21a   :  { %v1450_v43 = vadd.f32 %v1449_v63, %v1448_v62  ;;  %v5305_v9 = vpop.f32.mrf.mxu0  ;;  %4177 = vmatmul.msk.f32.gmra.mxu2 %vm557_vm1, %v69_v1  ;;  %v1455_v30 = vsel %vm1078_vm2, %v1362_v60, 0.0  ;;  %v1759_v55 = vadd.f32 %v5023_v16, %v1694_v40  ;;  %v1760_v25 = vadd.f32 %v5023_v16, %v1695_v47 }
 0x21b   :  { %v1457_v21 = vsel %vm1078_vm2, %v1363_v38, 0.0  ;;  %v1761_v35 = vadd.f32 %v5023_v16, %v1696_v54  ;;  %v1697_v23 = vmul.f32 %v5244_v41, %v5086_v5  ;;  %v1698_v5 = vmul.f32 %v5244_v41, %v5092_v20 }
 0x21c   :  { %v1452_v34 = vadd.f32 %v1451_v8, %v1450_v43  ;;  %vm1823_vm4 = vcmp.gt.f32.partialorder %v1759_v55, 0.0  ;;  %v1887_v45 = vmul.f32 0.01, %v1759_v55  ;;  %vm1824_vm5 = vcmp.gt.f32.partialorder %v1760_v25, 0.0 }
 0x21d   :  { %v1888_v37 = vmul.f32 0.01, %v1760_v25  ;;  %vm1825_vm6 = vcmp.gt.f32.partialorder %v1761_v35, 0.0  ;;  %v1889_v26 = vmul.f32 0.01, %v1761_v35  ;;  %v1762_v42 = vadd.f32 %v5023_v16, %v1697_v23 }
 0x21e   :  { %v1454_v15 = vadd.f32 %v1453_v19, %v1452_v34  ;;  %v1951_v56 = vsel %vm1823_vm4, %v1759_v55, %v1887_v45  ;;  %v1699_v31 = vmul.f32 %v5244_v41, %v5102_v52  ;;  %v1459_v57 = vsel %vm1078_vm2, %v1364_v2, 0.0 }
 0x21f   :  { %v5317_v32 = vpop.f32.mrf.mxu1  ;;  %v1952_v12 = vsel %vm1824_vm5, %v1760_v25, %v1888_v37  ;;  %v2028_v39 = vsel %vm1078_vm2, %v1951_v56, 0.0  ;;  %4207 = vmatmul.msk.f32.gmra.mxu3 %vm1078_vm2, %v1951_v56  ;;  %v1461_v40 = vsel %vm1078_vm2, %v1365_v6, 0.0  ;;  %v1953_v29 = vsel %vm1825_vm6, %v1761_v35, %v1889_v26 }
 0x220   :  { %v1456_v59 = vadd.f32 %v1455_v30, %v1454_v15  ;;  %v2029_v58 = vsel %vm1078_vm2, %v1952_v12, 0.0  ;;  %vm1826_vm7 = vcmp.gt.f32.partialorder %v1762_v42, 0.0  ;;  %v2031_v52 = vsel %vm1078_vm2, %v1953_v29, 0.0 }
 0x221   :  { %v2030_v47 = vadd.f32 %v2029_v58, %v2028_v39  ;;  %v1890_v28 = vmul.f32 0.01, %v1762_v42  ;;  %v1763_v3 = vadd.f32 %v5023_v16, %v1698_v5  ;;  %v1764_v60 = vadd.f32 %v5023_v16, %v1699_v31 }
 0x222   :  { %v1458_v61 = vadd.f32 %v1457_v21, %v1456_v59  ;;  %v5332_v20 = vpop.f32.mrf.mxu0  ;;  %4178 = vmatmul.msk.f32.gmra.mxu2 %vm557_vm1, %v70_v27  ;;  %v1700_v38 = vmul.f32 %v5244_v41, %v5118_v36  ;;  %v1766_v54 = vadd.f32 %v5023_v16, %v1701_v22  ;;  %v2023_v30 = vadd.f32 %v2022_v0, %v5163_v11  ;;  %v71_v36 = vld [vmem:[%s7775_s0 + $0x160] sm:$0xff] }
 0x223   :  { %v2032_v1 = vadd.f32 %v2031_v52, %v2030_v47  ;;  %v1954_v63 = vsel %vm1826_vm7, %v1762_v42, %v1890_v28  ;;  %vm1827_vm8 = vcmp.gt.f32.partialorder %v1763_v3, 0.0  ;;  %v1891_v2 = vmul.f32 0.01, %v1763_v3 }
 0x224   :  { %v1460_v62 = vadd.f32 %v1459_v57, %v1458_v61  ;;  %v2033_v6 = vsel %vm1078_vm2, %v1954_v63, 0.0  ;;  %vm1828_vm9 = vcmp.gt.f32.partialorder %v1764_v60, 0.0  ;;  %v1892_v43 = vmul.f32 0.01, %v1764_v60 }
 0x225   :  { %v1765_v8 = vadd.f32 %v5023_v16, %v1700_v38  ;;  %v2034_v55 = vadd.f32 %v2033_v6, %v2032_v1  ;;  %v5344_v25 = vsel %vm1827_vm8, %v1763_v3, %v1891_v2  ;;  %vm1830_vm11 = vcmp.gt.f32.partialorder %v1766_v54, 0.0 }
 0x226   :  { %v1462_v19 = vadd.f32 %v1461_v40, %v1460_v62  ;;  %v2035_v41 = vsel %vm1078_vm2, %v5344_v25, 0.0  ;;  %v5353_v22 = vsel %vm1828_vm9, %v1764_v60, %v1892_v43  ;;  %v1894_v45 = vmul.f32 0.01, %v1766_v54  ;;  %v72_v40 = vld [vmem:[%s7775_s0 + $0x168] sm:$0xff] }
 0x227   :  { %v5346_v34 = vpop.f32.mrf.mxu1  ;;  %vm1829_vm10 = vcmp.gt.f32.partialorder %v1765_v8, 0.0  ;;  %v1893_v21 = vmul.f32 0.01, %v1765_v8  ;;  %4208 = vmatmul.msk.f32.gmra.mxu3 %vm1078_vm2, %v1952_v12  ;;  %v2036_v11 = vadd.f32 %v2035_v41, %v2034_v55  ;;  %v2037_v0 = vsel %vm1078_vm2, %v5353_v22, 0.0  ;;  %v73_v55 = vld [vmem:[%s7775_s0 + $0x170] sm:$0xff] }
 0x228   :  { %v1463_v35 = vrot.slane %v1462_v19, 4  ;;  %v2024_v42 = vrot.slane %v2023_v30, 2  ;;  %v5363_v27 = vsel %vm1830_vm11, %v1766_v54, %v1894_v45  ;;  %v1143_v28 = vsel %vm1078_vm2, %v5237_v33, 0.0 }
 0x229   :  { %v5358_v23 = vsel %vm1829_vm10, %v1765_v8, %v1893_v21  ;;  %v2038_v26 = vadd.f32 %v2037_v0, %v2036_v11  ;;  %v2041_v31 = vsel %vm1078_vm2, %v5363_v27, 0.0  ;;  %v1142_v54 = vsel %vm1078_vm2, %v5224_v10, 0.0 }
 0x22a   :  { %v1464_v37 = vadd.f32 %v1463_v35, %v1462_v19  ;;  %v524_v15 = vpop.f32.mrf.mxu0  ;;  %4179 = vmatmul.msk.f32.gmra.mxu2 %vm557_vm1, %v71_v36  ;;  %v2039_v56 = vsel %vm1078_vm2, %v5358_v23, 0.0  ;;  %v2025_v39 = vadd.f32 %v2024_v42, %v2023_v30  ;;  %v1145_v62 = vsel %vm1078_vm2, %v5284_v51, 0.0 }
 0x22b   :  { %v2040_v5 = vadd.f32 %v2039_v56, %v2038_v26  ;;  %v1147_v43 = vsel %vm1078_vm2, %v5317_v32, 0.0  ;;  %v1149_v41 = vsel %vm1078_vm2, %v5346_v34, 0.0  ;;  %vm4019_vm10 = vcmask 1042434  }
 0x22c   :  { %v1465_v12 = vrot.slane %v1464_v37, 2  ;;  %v2026_v60 = vrot.slane %v2025_v39, 1 }
 0x22d   :  { %v2042_v57 = vadd.f32 %v2041_v31, %v2040_v5 }
 0x22e   :  { %v1466_v59 = vadd.f32 %v1465_v12, %v1464_v37  ;;  %v2027_v36 = vadd.f32 %v2026_v60, %v2025_v39  ;;  %v74_v39 = vld [vmem:[%s7775_s0 + $0x178] sm:$0xff] }
 0x22f   :  { %v5367_v58 = vpop.f32.mrf.mxu1  ;;  %4209 = vmatmul.msk.f32.gmra.mxu3 %vm1078_vm2, %v1953_v29  ;;  %v2043_v61 = vrot.slane %v2042_v57, 4  ;;  %v1144_v29 = vadd.f32 %v1143_v28, %v1142_v54 }
 0x230   :  { %v1467_v47 = vrot.slane %v1466_v59, 1  ;;  %v1151_v11 = vsel %vm1078_vm2, %v5367_v58, 0.0  ;;  %v2175_v26 = vmul.f32 %v2027_v36, %v4835_v17 }
 0x231   :  { %v2044_v1 = vadd.f32 %v2043_v61, %v2042_v57  ;;  %v1146_v19 = vadd.f32 %v1145_v62, %v1144_v29 }
 0x232   :  { %v1468_v52 = vadd.f32 %v1467_v47, %v1466_v59  ;;  %v527_v3 = vpop.f32.mrf.mxu0  ;;  %4180 = vmatmul.msk.f32.gmra.mxu2 %vm557_vm1, %v72_v40 }
 0x233   :  { %v2045_v2 = vrot.slane %v2044_v1, 2  ;;  %v1148_v35 = vadd.f32 %v1147_v43, %v1146_v19 }
 0x234   :  { %v1576_v38 = vmul.f32 %v1468_v52, %v4835_v17 }
 0x235   :  { %v2046_v8 = vadd.f32 %v2045_v2, %v2044_v1  ;;  %v1150_v37 = vadd.f32 %v1149_v41, %v1148_v35 }
 0x236   :  { %v1584_v6 = vadd.f32 1e-05, %v1576_v38 }
 0x237   :  { %v5383_v30 = vpop.f32.mrf.mxu1  ;;  %4210 = vmatmul.msk.f32.gmra.mxu3 %vm1078_vm2, %v1954_v63  ;;  %v2047_v21 = vrot.slane %v2046_v8, 1  ;;  %v1152_v63 = vadd.f32 %v1151_v11, %v1150_v37 }
 0x238   :  { %4338 = vrsqrt.f32 %v1584_v6  ;;  %v1153_v42 = vsel %vm1078_vm2, %v5383_v30, 0.0  ;;  %vm1616_vm14 = vweird.f32 %v1584_v6 }
 0x239   :  { %v2048_v45 = vadd.f32 %v2047_v21, %v2046_v8  ;;  %v1154_v59 = vadd.f32 %v1153_v42, %v1152_v63 }
 0x23a   :  { %v530_v0 = vpop.f32.mrf.mxu0  ;;  %4181 = vmatmul.msk.f32.gmra.mxu2 %vm557_vm1, %v73_v55 }
 0x23b   :  { %980 = vmatpush.msrb.mxu1 %v530_v0  ;;  %v2176_v56 = vmul.f32 %v2048_v45, %v4835_v17 }
 0x23d   :  { %981 = vmatpush.msrb.mxu1 %v527_v3  ;;  %v5399_v5 = vsel %vm4017_vm12, %v2176_v56, %v2175_v26 }
 0x23e   :  { %v4339_v12 = vpop.eup %4338 }
 0x23f   :  { %v1611_v31 = vmul.f32 %v4339_v12, %v1584_v6  ;;  %v5401_v57 = vpop.f32.mrf.mxu1  ;;  %982 = vmatpush.msrb.mxu1 %v524_v15  ;;  %4211 = vmatmul.msk.f32.gmra.mxu3 %vm1078_vm2, %v5344_v25  ;;  %vm1617_vm13 = vweird.f32 %v4339_v12 }
 0x240   :  { %v1155_v40 = vsel %vm1078_vm2, %v5401_v57, 0.0  ;;  %vm1618_vm15 = vmor %vm1616_vm14, %vm1617_vm13 }
 0x241   :  { %v1612_v47 = vmul.f32 %v4339_v12, %v1611_v31  ;;  %v1156_v61 = vadd.f32 %v1155_v40, %v1154_v59  ;;  %983 = vmatpush.msrb.mxu1 %v5332_v20  ;;  %v75_v20 = vld [vmem:[%s7775_s0 + $0x180] sm:$0xff] }
 0x242   :  { %v5411_v52 = vpop.f32.mrf.mxu0  ;;  %4182 = vmatmul.msk.f32.gmra.mxu2 %vm557_vm1, %v74_v39 }
 0x243   :  { %v1613_v28 = vmul.f32 0.5, %v1612_v47  ;;  %v1157_v15 = vrot.slane %v1156_v61, 4  ;;  %984 = vmatpush.msrb.mxu1 %v5305_v9 }
 0x245   :  { %v1614_v3 = vsub.f32 1.5, %v1613_v28  ;;  %v1158_v1 = vadd.f32 %v1157_v15, %v1156_v61  ;;  %985 = vmatpush.msrb.mxu1 %v5246_v44 }
 0x247   :  { %v1615_v25 = vmul.f32 %v4339_v12, %v1614_v3  ;;  %v1159_v60 = vrot.slane %v1158_v1, 2  ;;  %986 = vmatpush.msrb.mxu1 %v5231_v24  ;;  %4212 = vmatmul.msk.f32.gmra.mxu3 %vm1078_vm2, %v5353_v22 }
 0x249   :  { %v1619_v38 = vsel %vm1618_vm15, %v4339_v12, %v1615_v25  ;;  %v1160_v9 = vadd.f32 %v1159_v60, %v1158_v1  ;;  %987 = vmatpush.msrb.mxu1 %v5217_v48  ;;  %v76_v48 = vld [vmem:[%s7775_s0 + $0x188] sm:$0xff] }
 0x24a   :  { %v1672_v54 = vmul.f32 %v1619_v38, %v5004_v4  ;;  %v5424_v44 = vpop.f32.mrf.mxu0  ;;  %4183 = vmatmul.msk.f32.vlgmr.msrb.gmra.mxu1 %vm557_vm1, %v75_v20 }
 0x24b   :  { %v1161_v62 = vrot.slane %v1160_v9, 1 }
 0x24c   :  { %v1680_v24 = vperm.slane %v1672_v54, 0 }
 0x24d   :  { %v1162_v2 = vadd.f32 %v1161_v62, %v1160_v9  ;;  %v5427_v29 = vpop.f32.mrf.mxu2 }
 0x24e   :  { %v1702_v6 = vmul.f32 %v1680_v24, %v5254_v46  ;;  %v1703_v43 = vmul.f32 %v1680_v24, %v5257_v49  ;;  %v1704_v4 = vmul.f32 %v1680_v24, %v5260_v18  ;;  %v1705_v19 = vmul.f32 %v1680_v24, %v5263_v50  ;;  %v5444_v46 = vld [vmem:[%s7777_s2 + $0x32] sm:$0x1] }
 0x24f   :  { %v1257_v22 = vmul.f32 %v4835_v17, %v1162_v2  ;;  %4213 = vmatmul.msk.f32.gmra.mxu3 %vm1078_vm2, %v5358_v23  ;;  %v1706_v55 = vmul.f32 %v1680_v24, %v5266_v53  ;;  %v1707_v41 = vmul.f32 %v1680_v24, %v5269_v13  ;;  %v5454_v50 = vmul.f32 %v1680_v24, %v5274_v7 }
 0x250   :  { %v1767_v8 = vadd.f32 %v5023_v16, %v1702_v6  ;;  %v1768_v18 = vadd.f32 %v5023_v16, %v1703_v43  ;;  %v1769_v23 = vadd.f32 %v5023_v16, %v1704_v4  ;;  %v1708_v21 = vmul.f32 %v1680_v24, %v5272_v14 }
 0x251   :  { %v1265_v49 = vmul.f32 %v5444_v46, %v1257_v22  ;;  %v1770_v11 = vadd.f32 %v5023_v16, %v1705_v19  ;;  %v1771_v0 = vadd.f32 %v5023_v16, %v1706_v55  ;;  %v1772_v42 = vadd.f32 %v5023_v16, %v1707_v41 }
 0x252   :  { %v5447_v36 = vpop.f32.mrf.mxu0  ;;  %4184 = vmatmul.msk.f32.gmra.mxu1 %vm557_vm1, %v76_v48  ;;  %vm1831_vm0 = vcmp.gt.f32.partialorder %v1767_v8, 0.0  ;;  %v1895_v35 = vmul.f32 0.01, %v1767_v8  ;;  %vm1832_vm3 = vcmp.gt.f32.partialorder %v1768_v18, 0.0  ;;  %v1896_v14 = vmul.f32 0.01, %v1768_v18 }
 0x253   :  { %v1273_v53 = vperm.slane %v1265_v49, 0  ;;  %vm1833_vm4 = vcmp.gt.f32.partialorder %v1769_v23, 0.0  ;;  %v1897_v31 = vmul.f32 0.01, %v1769_v23  ;;  %vm1834_vm5 = vcmp.gt.f32.partialorder %v1770_v11, 0.0  ;;  %v78_v48 = vld [vmem:[%s7775_s0 + $0x198] sm:$0xff] }
 0x254   :  { %v1959_v12 = vsel %vm1831_vm0, %v1767_v8, %v1895_v35  ;;  %v1898_v47 = vmul.f32 0.01, %v1770_v11  ;;  %vm1835_vm6 = vcmp.gt.f32.partialorder %v1771_v0, 0.0  ;;  %v1960_v25 = vsel %vm1832_vm3, %v1768_v18, %v1896_v14 }
 0x255   :  { %v5460_v45 = vsub.f32 %v5224_v10, %v1273_v53  ;;  %v5463_v37 = vsub.f32 %v5237_v33, %v1273_v53  ;;  %v5466_v13 = vsub.f32 %v5284_v51, %v1273_v53  ;;  %v5469_v7 = vsub.f32 %v5317_v32, %v1273_v53  ;;  %v5471_v26 = vpop.f32.mrf.mxu2  ;;  %v77_v32 = vld [vmem:[%s7775_s0 + $0x190] sm:$0xff] }
 0x256   :  { %v5475_v56 = vsub.f32 %v5346_v34, %v1273_v53  ;;  %v5487_v63 = vsub.f32 %v5367_v58, %v1273_v53  ;;  %v5499_v58 = vsub.f32 %v5383_v30, %v1273_v53  ;;  %v5502_v61 = vsub.f32 %v5401_v57, %v1273_v53 }
 0x257   :  { %v1366_v10 = vmul.f32 %v5460_v45, %v5460_v45  ;;  %v1367_v33 = vmul.f32 %v5463_v37, %v5463_v37  ;;  %v1368_v51 = vmul.f32 %v5466_v13, %v5466_v13  ;;  %4214 = vmatmul.msk.f32.gmra.mxu3 %vm1078_vm2, %v5363_v27  ;;  %v1369_v59 = vmul.f32 %v5469_v7, %v5469_v7 }
 0x258   :  { %v5491_v34 = vpop.f32.mrf.mxu3  ;;  %v1370_v15 = vmul.f32 %v5475_v56, %v5475_v56  ;;  %v2049_v1 = vsel %vm1078_vm2, %v1959_v12, 0.0  ;;  %v1371_v30 = vmul.f32 %v5487_v63, %v5487_v63  ;;  %v2050_v60 = vsel %vm1078_vm2, %v1960_v25, 0.0 }
 0x259   :  { %v1469_v39 = vsel %vm1078_vm2, %v1366_v10, 0.0  ;;  %v1470_v40 = vsel %vm1078_vm2, %v1367_v33, 0.0  ;;  %v1472_v3 = vsel %vm1078_vm2, %v1368_v51, 0.0  ;;  %v1961_v20 = vsel %vm1833_vm4, %v1769_v23, %v1897_v31 }
 0x25a   :  { %v1471_v27 = vadd.f32 %v1470_v40, %v1469_v39  ;;  %v5504_v28 = vpop.f32.mrf.mxu0  ;;  %4185 = vmatmul.msk.f32.gmra.mxu1 %vm557_vm1, %v77_v32  ;;  %v1474_v38 = vsel %vm1078_vm2, %v1369_v59, 0.0  ;;  %v2051_v54 = vadd.f32 %v2050_v60, %v2049_v1  ;;  %v5520_v62 = vsel %vm1834_vm5, %v1770_v11, %v1898_v47 }
 0x25b   :  { %v1899_v24 = vmul.f32 0.01, %v1771_v0  ;;  %v1372_v2 = vmul.f32 %v5499_v58, %v5499_v58  ;;  %v2052_v43 = vsel %vm1078_vm2, %v1961_v20, 0.0  ;;  %vm1836_vm7 = vcmp.gt.f32.partialorder %v1772_v42, 0.0 }
 0x25c   :  { %v1473_v57 = vadd.f32 %v1472_v3, %v1471_v27  ;;  %v1476_v22 = vsel %vm1078_vm2, %v1370_v15, 0.0  ;;  %v2053_v4 = vadd.f32 %v2052_v43, %v2051_v54  ;;  %v1900_v19 = vmul.f32 0.01, %v1772_v42  ;;  %v79_v15 = vld [vmem:[%s7775_s0 + $0x1a0] sm:$0xff] }
 0x25d   :  { %v5517_v9 = vpop.f32.mrf.mxu2  ;;  %v5530_v8 = vsel %vm1835_vm6, %v1771_v0, %v1899_v24  ;;  %v2054_v49 = vsel %vm1078_vm2, %v5520_v62, 0.0  ;;  %v1773_v18 = vadd.f32 %v5023_v16, %v1708_v21  ;;  %v1774_v23 = vadd.f32 %v5023_v16, %v5454_v50 }
 0x25e   :  { %v1475_v6 = vadd.f32 %v1474_v38, %v1473_v57  ;;  %v1373_v41 = vmul.f32 %v5502_v61, %v5502_v61  ;;  %v1478_v53 = vsel %vm1078_vm2, %v1371_v30, 0.0  ;;  %v2055_v11 = vadd.f32 %v2054_v49, %v2053_v4 }
 0x25f   :  { %4215 = vmatmul.msk.f32.gmra.mxu3 %vm1078_vm2, %v1959_v12  ;;  %v5543_v0 = vsel %vm1836_vm7, %v1772_v42, %v1900_v19  ;;  %v2056_v21 = vsel %vm1078_vm2, %v5530_v8, 0.0  ;;  %vm1837_vm8 = vcmp.gt.f32.partialorder %v1773_v18, 0.0  ;;  %v1901_v16 = vmul.f32 0.01, %v1773_v18 }
 0x260   :  { %v1477_v55 = vadd.f32 %v1476_v22, %v1475_v6  ;;  %v5541_v35 = vpop.f32.mrf.mxu3  ;;  %v1480_v50 = vsel %vm1078_vm2, %v1372_v2, 0.0  ;;  %v2057_v33 = vadd.f32 %v2056_v21, %v2055_v11  ;;  %vm1838_vm9 = vcmp.gt.f32.partialorder %v1774_v23, 0.0  ;;  %v81_v21 = vld [vmem:[%s7775_s0 + $0x1b0] sm:$0xff] }
 0x261   :  { %v1902_v51 = vmul.f32 0.01, %v1774_v23  ;;  %v2058_v42 = vsel %vm1078_vm2, %v5543_v0, 0.0  ;;  %v5553_v12 = vsel %vm1837_vm8, %v1773_v18, %v1901_v16  ;;  %v1482_v31 = vsel %vm1078_vm2, %v1373_v41, 0.0 }
 0x262   :  { %v1479_v14 = vadd.f32 %v1478_v53, %v1477_v55  ;;  %v5545_v10 = vpop.f32.mrf.mxu0  ;;  %4186 = vmatmul.msk.f32.gmra.mxu1 %vm557_vm1, %v78_v48  ;;  %v2059_v39 = vadd.f32 %v2058_v42, %v2057_v33  ;;  %v2060_v27 = vsel %vm1078_vm2, %v5553_v12, 0.0  ;;  %v1164_v16 = vsel %vm1078_vm2, %v5471_v26, 0.0 }
 0x263   :  { %v5558_v40 = vsel %vm1838_vm9, %v1774_v23, %v1902_v51  ;;  %v1163_v51 = vsel %vm1078_vm2, %v5427_v29, 0.0  ;;  %vm4021_vm9 = vcmask 1043459  }
 0x264   :  { %v1481_v32 = vadd.f32 %v1480_v50, %v1479_v14  ;;  %v2061_v3 = vadd.f32 %v2060_v27, %v2059_v39  ;;  %v2062_v30 = vsel %vm1078_vm2, %v5558_v40, 0.0 }
 0x265   :  { %v5556_v59 = vpop.f32.mrf.mxu2 }
 0x266   :  { %v1483_v47 = vadd.f32 %v1482_v31, %v1481_v32  ;;  %v2063_v60 = vadd.f32 %v2062_v30, %v2061_v3  ;;  %v1166_v32 = vsel %vm1078_vm2, %v5517_v9, 0.0  ;;  %v1165_v31 = vadd.f32 %v1164_v16, %v1163_v51 }
 0x267   :  { %4216 = vmatmul.msk.f32.gmra.mxu3 %vm1078_vm2, %v1960_v25  ;;  %v80_v25 = vld [vmem:[%s7775_s0 + $0x1a8] sm:$0xff] }
 0x268   :  { %v1484_v1 = vrot.slane %v1483_v47, 4  ;;  %v5568_v57 = vpop.f32.mrf.mxu3  ;;  %v2064_v24 = vrot.slane %v2063_v60, 4  ;;  %v1167_v39 = vadd.f32 %v1166_v32, %v1165_v31  ;;  %v5655_v32 = vld [vmem:[%s7777_s2 + $0x31] ss:$0 sm:$0xff] }
 0x26a   :  { %v1485_v38 = vadd.f32 %v1484_v1, %v1483_v47  ;;  %v548_v54 = vpop.f32.mrf.mxu0  ;;  %4187 = vmatmul.msk.f32.gmra.mxu1 %vm557_vm1, %v79_v15  ;;  %v2065_v43 = vadd.f32 %v2064_v24, %v2063_v60  ;;  %v82_v1 = vld [vmem:[%s7775_s0 + $0x1b8] sm:$0xff] }
 0x26c   :  { %v1486_v2 = vrot.slane %v1485_v38, 2  ;;  %v2066_v48 = vrot.slane %v2065_v43, 2 }
 0x26d   :  { %v5571_v6 = vpop.f32.mrf.mxu2 }
 0x26e   :  { %v1487_v22 = vadd.f32 %v1486_v2, %v1485_v38  ;;  %v2067_v55 = vadd.f32 %v2066_v48, %v2065_v43  ;;  %v1170_v27 = vsel %vm1078_vm2, %v5571_v6, 0.0 }
 0x26f   :  { %4217 = vmatmul.msk.f32.gmra.mxu3 %vm1078_vm2, %v1961_v20 }
 0x270   :  { %v1488_v4 = vrot.slane %v1487_v22, 1  ;;  %v5577_v19 = vpop.f32.mrf.mxu3  ;;  %v2068_v23 = vrot.slane %v2067_v55, 1 }
 0x272   :  { %v1489_v49 = vadd.f32 %v1488_v4, %v1487_v22  ;;  %v551_v18 = vpop.f32.mrf.mxu0  ;;  %4188 = vmatmul.msk.f32.gmra.mxu1 %vm557_vm1, %v80_v25  ;;  %v2069_v11 = vadd.f32 %v2068_v23, %v2067_v55  ;;  %v83_v55 = vld [vmem:[%s7775_s0 + $0x1c0] sm:$0xff] }
 0x274   :  { %v1577_v41 = vmul.f32 %v1489_v49, %v4835_v17  ;;  %v2177_v20 = vmul.f32 %v2069_v11, %v4835_v17 }
 0x275   :  { %v5581_v53 = vpop.f32.mrf.mxu2 }
 0x276   :  { %v1585_v14 = vadd.f32 1e-05, %v1577_v41  ;;  %v5595_v33 = vsel %vm4019_vm10, %v2177_v20, %v5399_v5  ;;  %v1172_v30 = vsel %vm1078_vm2, %v5581_v53, 0.0 }
 0x277   :  { %4218 = vmatmul.msk.f32.gmra.mxu3 %vm1078_vm2, %v5520_v62  ;;  %v1168_v62 = vsel %vm1078_vm2, %v5556_v59, 0.0 }
 0x278   :  { %4340 = vrsqrt.f32 %v1585_v14  ;;  %v5591_v50 = vpop.f32.mrf.mxu3  ;;  %v1169_v3 = vadd.f32 %v1168_v62, %v1167_v39  ;;  %vm1626_vm13 = vweird.f32 %v1585_v14 }
 0x27a   :  { %v554_v42 = vpop.f32.mrf.mxu0  ;;  %4189 = vmatmul.msk.f32.gmra.mxu1 %vm557_vm1, %v81_v21  ;;  %v1171_v38 = vadd.f32 %v1170_v27, %v1169_v3 }
 0x27b   :  { %1045 = vmatpush.msrb.mxu2 %v554_v42 }
 0x27c   :  { %v1173_v43 = vadd.f32 %v1172_v30, %v1171_v38 }
 0x27d   :  { %v5604_v47 = vpop.f32.mrf.mxu2  ;;  %1046 = vmatpush.msrb.mxu2 %v551_v18 }
 0x27e   :  { %v4341_v5 = vpop.eup %4340  ;;  %v1174_v2 = vsel %vm1078_vm2, %v5604_v47, 0.0 }
 0x27f   :  { %v1621_v15 = vmul.f32 %v4341_v5, %v1585_v14  ;;  %1047 = vmatpush.msrb.mxu2 %v548_v54  ;;  %4219 = vmatmul.msk.f32.gmra.mxu3 %vm1078_vm2, %v5530_v8  ;;  %vm1627_vm11 = vweird.f32 %v4341_v5  ;;  %v1175_v25 = vadd.f32 %v1174_v2, %v1173_v43 }
 0x280   :  { %vm1628_vm14 = vmor %vm1626_vm13, %vm1627_vm11 }
 0x281   :  { %v1622_v60 = vmul.f32 %v4341_v5, %v1621_v15  ;;  %v5615_v24 = vpop.f32.mrf.mxu3  ;;  %1048 = vmatpush.msrb.mxu2 %v5545_v10 }
 0x282   :  { %4190 = vmatmul.msk.f32.gmra.mxu1 %vm557_vm1, %v82_v1 }
 0x283   :  { %v1623_v54 = vmul.f32 0.5, %v1622_v60  ;;  %1049 = vmatpush.msrb.mxu2 %v5504_v28 }
 0x285   :  { %v1624_v22 = vsub.f32 1.5, %v1623_v54  ;;  %v5622_v48 = vpop.f32.mrf.mxu2  ;;  %1050 = vmatpush.msrb.mxu2 %v5447_v36  ;;  %v5637_v36 = vld [vmem:[%s7777_s2 + $0x30] sm:$0x1] }
 0x286   :  { %v1176_v8 = vsel %vm1078_vm2, %v5622_v48, 0.0 }
 0x287   :  { %v1625_v10 = vmul.f32 %v4341_v5, %v1624_v22  ;;  %v1177_v4 = vadd.f32 %v1176_v8, %v1175_v25  ;;  %1051 = vmatpush.msrb.mxu2 %v5424_v44  ;;  %4220 = vmatmul.msk.f32.gmra.mxu3 %vm1078_vm2, %v5543_v0  ;;  %v85_v22 = vld [vmem:[%s7775_s0 + $0x1d0] sm:$0xff] }
 0x289   :  { %v1629_v28 = vsel %vm1628_vm14, %v4341_v5, %v1625_v10  ;;  %v1178_v49 = vrot.slane %v1177_v4, 4  ;;  %v2410_v18 = vpop.f32.mrf.mxu3  ;;  %1052 = vmatpush.msrb.mxu2 %v5411_v52  ;;  %v84_v52 = vld [vmem:[%s7775_s0 + $0x1c8] sm:$0xff] }
 0x28a   :  { %v1673_v44 = vmul.f32 %v5637_v36, %v1629_v28  ;;  %4191 = vmatmul.msk.f32.vlgmr.msrb.gmra.mxu2 %vm557_vm1, %v83_v55 }
 0x28b   :  { %v1179_v23 = vadd.f32 %v1178_v49, %v1177_v4 }
 0x28c   :  { %v1681_v41 = vperm.slane %v1673_v44, 0 }
 0x28d   :  { %v1180_v11 = vrot.slane %v1179_v23, 2  ;;  %v5641_v14 = vpop.f32.mrf.mxu2 }
 0x28e   :  { %v1710_v0 = vmul.f32 %v1681_v41, %v5460_v45  ;;  %v1711_v21 = vmul.f32 %v1681_v41, %v5463_v37  ;;  %v1712_v16 = vmul.f32 %v1681_v41, %v5466_v13  ;;  %v1713_v51 = vmul.f32 %v1681_v41, %v5469_v7 }
 0x28f   :  { %v1181_v20 = vadd.f32 %v1180_v11, %v1179_v23  ;;  %4221 = vmatmul.msk.f32.gmra.mxu3 %vm1078_vm2, %v5553_v12  ;;  %v1714_v13 = vmul.f32 %v1681_v41, %v5475_v56  ;;  %v1715_v3 = vmul.f32 %v1681_v41, %v5487_v63  ;;  %v1717_v8 = vmul.f32 %v1681_v41, %v5502_v61 }
 0x290   :  { %v1775_v45 = vadd.f32 %v5655_v32, %v1710_v0  ;;  %v1776_v37 = vadd.f32 %v5655_v32, %v1711_v21  ;;  %v1777_v62 = vadd.f32 %v5655_v32, %v1712_v16  ;;  %v1778_v12 = vadd.f32 %v5655_v32, %v1713_v51 }
 0x291   :  { %v1182_v42 = vrot.slane %v1181_v20, 1  ;;  %v2413_v31 = vpop.f32.mrf.mxu3  ;;  %v1779_v43 = vadd.f32 %v5655_v32, %v1714_v13  ;;  %v1780_v10 = vadd.f32 %v5655_v32, %v1715_v3  ;;  %v1716_v49 = vmul.f32 %v1681_v41, %v5499_v58 }
 0x292   :  { %2592 = vmatpush.msra.mxu1 %v2413_v31  ;;  %4192 = vmatmul.msk.f32.gmra.mxu2 %vm557_vm1, %v84_v52  ;;  %vm1839_vm15 = vcmp.gt.f32.partialorder %v1775_v45, 0.0  ;;  %v1903_v7 = vmul.f32 0.01, %v1775_v45  ;;  %vm1840_vm0 = vcmp.gt.f32.partialorder %v1776_v37, 0.0  ;;  %v1904_v5 = vmul.f32 0.01, %v1776_v37 }
 0x293   :  { %v1183_v39 = vadd.f32 %v1182_v42, %v1181_v20  ;;  %vm1841_vm3 = vcmp.gt.f32.partialorder %v1777_v62, 0.0  ;;  %v1905_v27 = vmul.f32 0.01, %v1777_v62  ;;  %v1906_v54 = vmul.f32 0.01, %v1778_v12 }
 0x294   :  { %2593 = vmatpush.msra.mxu1 %v2410_v18  ;;  %v1967_v15 = vsel %vm1839_vm15, %v1775_v45, %v1903_v7  ;;  %v5668_v60 = vsel %vm1840_vm0, %v1776_v37, %v1904_v5  ;;  %vm1842_vm4 = vcmp.gt.f32.partialorder %v1778_v12, 0.0  ;;  %vm1843_vm5 = vcmp.gt.f32.partialorder %v1779_v43, 0.0 }
 0x295   :  { %v1258_v1 = vmul.f32 %v4835_v17, %v1183_v39  ;;  %v5665_v30 = vpop.f32.mrf.mxu2  ;;  %v2070_v56 = vsel %vm1078_vm2, %v1967_v15, 0.0  ;;  %v5670_v38 = vsel %vm1841_vm3, %v1777_v62, %v1905_v27  ;;  %v2071_v2 = vsel %vm1078_vm2, %v5668_v60, 0.0 }
 0x296   :  { %2594 = vmatpush.msra.mxu1 %v5615_v24  ;;  %v2072_v25 = vadd.f32 %v2071_v2, %v2070_v56  ;;  %v2073_v24 = vsel %vm1078_vm2, %v5670_v38, 0.0  ;;  %v5689_v28 = vsel %vm1842_vm4, %v1778_v12, %v1906_v54  ;;  %v1907_v61 = vmul.f32 0.01, %v1779_v43 }
 0x297   :  { %v1266_v63 = vmul.f32 %v5444_v46, %v1258_v1  ;;  %4222 = vmatmul.msk.f32.gmra.mxu3 %vm1078_vm2, %v5558_v40  ;;  %v1908_v23 = vmul.f32 0.01, %v1780_v10  ;;  %vm1844_vm6 = vcmp.gt.f32.partialorder %v1780_v10, 0.0 }
 0x298   :  { %2595 = vmatpush.msra.mxu1 %v5591_v50  ;;  %v2074_v55 = vadd.f32 %v2073_v24, %v2072_v25 }
 0x299   :  { %v1274_v4 = vperm.slane %v1266_v63, 0  ;;  %v5743_v42 = vsel %vm1844_vm6, %v1780_v10, %v1908_v23 }
 0x29a   :  { %2596 = vmatpush.msra.mxu1 %v5577_v19  ;;  %4193 = vmatmul.msk.f32.gmra.mxu2 %vm557_vm1, %v85_v22  ;;  %v1782_v19 = vadd.f32 %v5655_v32, %v1717_v8  ;;  %v87_v8 = vld [vmem:[%s7775_s0 + $0x1e0] sm:$0xff] }
 0x29b   :  { %v5693_v40 = vsub.f32 %v5427_v29, %v1274_v4  ;;  %v5696_v50 = vsub.f32 %v5471_v26, %v1274_v4  ;;  %v5699_v18 = vsub.f32 %v5517_v9, %v1274_v4  ;;  %v5702_v44 = vsub.f32 %v5556_v59, %v1274_v4 }
 0x29c   :  { %2597 = vmatpush.msra.mxu1 %v5568_v57  ;;  %v5707_v11 = vsub.f32 %v5571_v6, %v1274_v4  ;;  %v2075_v59 = vsel %vm1078_vm2, %v5689_v28, 0.0  ;;  %v5721_v57 = vsel %vm1843_vm5, %v1779_v43, %v1907_v61  ;;  %v1781_v6 = vadd.f32 %v5655_v32, %v1716_v49  ;;  %v4370_v49 = vld [vmem:[%s7775_s0 + $0x8] sm:$0xff] }
 0x29d   :  { %v1374_v29 = vmul.f32 %v5693_v40, %v5693_v40  ;;  %v1375_v26 = vmul.f32 %v5696_v50, %v5696_v50  ;;  %v1376_v58 = vmul.f32 %v5699_v18, %v5699_v18  ;;  %v5715_v9 = vpop.f32.mrf.mxu2  ;;  %v5725_v41 = vsub.f32 %v5581_v53, %v1274_v4 }
 0x29e   :  { %2598 = vmatpush.msra.mxu1 %v5541_v35  ;;  %v1377_v0 = vmul.f32 %v5702_v44, %v5702_v44  ;;  %v86_v35 = vld [vmem:[%s7775_s0 + $0x1d8] sm:$0xff]  ;;  %v5735_v52 = vsub.f32 %v5604_v47, %v1274_v4  ;;  %vm1846_vm7 = vcmp.gt.f32.partialorder %v1782_v19, 0.0  ;;  %v1910_v53 = vmul.f32 0.01, %v1782_v19  ;;  %v4369_v47 = vld [vmem:[%s7775_s0] sm:$0xff] }
 0x29f   :  { %v1490_v21 = vsel %vm1078_vm2, %v1374_v29, 0.0  ;;  %v1491_v20 = vsel %vm1078_vm2, %v1375_v26, 0.0  ;;  %4223 = vmatmul.msk.f32.gmra.mxu3 %vm1078_vm2, %v1967_v15  ;;  %v1378_v51 = vmul.f32 %v5707_v11, %v5707_v11  ;;  %v1493_v45 = vsel %vm1078_vm2, %v1376_v58, 0.0 }
 0x2a0   :  { %v1492_v16 = vadd.f32 %v1491_v20, %v1490_v21  ;;  %2599 = vmatpush.msra.mxu1 %v5491_v34  ;;  %v2076_v37 = vadd.f32 %v2075_v59, %v2074_v55  ;;  %v5750_v31 = vsub.f32 %v5622_v48, %v1274_v4  ;;  %v2077_v62 = vsel %vm1078_vm2, %v5721_v57, 0.0 }
 0x2a1   :  { %4263 = vmatmul.msk.f32.vlgmr.msra.gmra.mxu1 %vm557_vm1, %v4369_v47  ;;  %vm1845_vm8 = vcmp.gt.f32.partialorder %v1781_v6, 0.0  ;;  %v1379_v13 = vmul.f32 %v5725_v41, %v5725_v41  ;;  %v1495_v7 = vsel %vm1078_vm2, %v1377_v0, 0.0  ;;  %v1909_v5 = vmul.f32 0.01, %v1781_v6  ;;  %v88_v0 = vld [vmem:[%s7775_s0 + $0x1e8] sm:$0xff] }
 0x2a2   :  { %v1494_v34 = vadd.f32 %v1493_v45, %v1492_v16  ;;  %4194 = vmatmul.msk.f32.gmra.mxu2 %vm557_vm1, %v86_v35  ;;  %v5758_v12 = vpop.f32.mrf.mxu3  ;;  %v2078_v39 = vadd.f32 %v2077_v62, %v2076_v37  ;;  %v1380_v48 = vmul.f32 %v5735_v52, %v5735_v52  ;;  %v2079_v15 = vsel %vm1078_vm2, %v5743_v42, 0.0  ;;  %v4371_v16 = vld [vmem:[%s7775_s0 + $0x10] sm:$0xff] }
 0x2a3   :  { %v1497_v3 = vsel %vm1078_vm2, %v1378_v51, 0.0  ;;  %v5767_v2 = vsel %vm1845_vm8, %v1781_v6, %v1909_v5  ;;  %v5770_v54 = vsel %vm1846_vm7, %v1782_v19, %v1910_v53  ;;  %v1381_v22 = vmul.f32 %v5750_v31, %v5750_v31  ;;  %v4372_v5 = vld [vmem:[%s7775_s0 + $0x18] sm:$0xff] }
 0x2a4   :  { %v1496_v27 = vadd.f32 %v1495_v7, %v1494_v34  ;;  %v2080_v56 = vadd.f32 %v2079_v15, %v2078_v39  ;;  %v2081_v63 = vsel %vm1078_vm2, %v5767_v2, 0.0  ;;  %v1499_v25 = vsel %vm1078_vm2, %v1379_v13, 0.0 }
 0x2a5   :  { %v5765_v1 = vpop.f32.mrf.mxu2  ;;  %v2083_v4 = vsel %vm1078_vm2, %v5770_v54, 0.0  ;;  %v1501_v55 = vsel %vm1078_vm2, %v1380_v48, 0.0  ;;  %v1503_v23 = vsel %vm1078_vm2, %v1381_v22, 0.0  ;;  %v1185_v39 = vsel %vm1078_vm2, %v5665_v30, 0.0 }
 0x2a6   :  { %v1498_v43 = vadd.f32 %v1497_v3, %v1496_v27  ;;  %v2082_v24 = vadd.f32 %v2081_v63, %v2080_v56  ;;  %v1184_v15 = vsel %vm1078_vm2, %v5641_v14, 0.0  ;;  %v1187_v3 = vsel %vm1078_vm2, %v5715_v9, 0.0 }
 0x2a7   :  { %4224 = vmatmul.msk.f32.gmra.mxu3 %vm1078_vm2, %v5668_v60  ;;  %v1189_v63 = vsel %vm1078_vm2, %v5765_v1, 0.0 }
 0x2a8   :  { %v1500_v10 = vadd.f32 %v1499_v25, %v1498_v43  ;;  %v2084_v61 = vadd.f32 %v2083_v4, %v2082_v24  ;;  %v90_v24 = vld [vmem:[%s7775_s0 + $0x1f8] sm:$0xff] }
 0x2a9   :  { %4264 = vmatmul.msk.f32.gmra.mxu1 %vm557_vm1, %v4370_v49 }
 0x2aa   :  { %v1502_v19 = vadd.f32 %v1501_v55, %v1500_v10  ;;  %4195 = vmatmul.msk.f32.gmra.mxu2 %vm557_vm1, %v87_v8  ;;  %v5791_v29 = vpop.f32.mrf.mxu3  ;;  %v2085_v60 = vrot.slane %v2084_v61, 4  ;;  %v4373_v55 = vld [vmem:[%s7775_s0 + $0x20] sm:$0xff] }
 0x2ac   :  { %v1504_v26 = vadd.f32 %v1503_v23, %v1502_v19  ;;  %v2086_v59 = vadd.f32 %v2085_v60, %v2084_v61 }
 0x2ad   :  { %v5793_v58 = vpop.f32.mrf.mxu2 }
 0x2ae   :  { %v1505_v6 = vrot.slane %v1504_v26, 4  ;;  %v2087_v21 = vrot.slane %v2086_v59, 2  ;;  %v1191_v25 = vsel %vm1078_vm2, %v5793_v58, 0.0 }
 0x2af   :  { %4225 = vmatmul.msk.f32.gmra.mxu3 %vm1078_vm2, %v5670_v38  ;;  %v89_v38 = vld [vmem:[%s7775_s0 + $0x1f0] sm:$0xff] }
 0x2b0   :  { %v1506_v20 = vadd.f32 %v1505_v6, %v1504_v26  ;;  %v2088_v35 = vadd.f32 %v2087_v21, %v2086_v59 }
 0x2b1   :  { %4265 = vmatmul.msk.f32.gmra.mxu1 %vm557_vm1, %v4371_v16  ;;  %v4374_v16 = vld [vmem:[%s7775_s0 + $0x28] sm:$0xff] }
 0x2b2   :  { %v1507_v53 = vrot.slane %v1506_v20, 2  ;;  %4196 = vmatmul.msk.f32.gmra.mxu2 %vm557_vm1, %v88_v0  ;;  %v5805_v51 = vpop.f32.mrf.mxu3  ;;  %v2089_v45 = vrot.slane %v2088_v35, 1 }
 0x2b4   :  { %v1508_v37 = vadd.f32 %v1507_v53, %v1506_v20  ;;  %v2090_v34 = vadd.f32 %v2089_v45, %v2088_v35 }
 0x2b5   :  { %v5807_v47 = vpop.f32.mrf.mxu2 }
 0x2b6   :  { %v1509_v62 = vrot.slane %v1508_v37, 1  ;;  %v2178_v13 = vmul.f32 %v2090_v34, %v4835_v17  ;;  %v1193_v10 = vsel %vm1078_vm2, %v5807_v47, 0.0 }
 0x2b7   :  { %4226 = vmatmul.msk.f32.gmra.mxu3 %vm1078_vm2, %v5689_v28  ;;  %v1186_v28 = vadd.f32 %v1185_v39, %v1184_v15 }
 0x2b8   :  { %v1510_v7 = vadd.f32 %v1509_v62, %v1508_v37  ;;  %v5823_v48 = vsel %vm4021_vm9, %v2178_v13, %v5595_v33 }
 0x2b9   :  { %4266 = vmatmul.msk.f32.gmra.mxu1 %vm557_vm1, %v4372_v5  ;;  %v1188_v22 = vadd.f32 %v1187_v3, %v1186_v28  ;;  %v4375_v5 = vld [vmem:[%s7775_s0 + $0x30] sm:$0xff] }
 0x2ba   :  { %v1578_v27 = vmul.f32 %v1510_v7, %v4835_v17  ;;  %4197 = vmatmul.msk.f32.gmra.mxu2 %vm557_vm1, %v89_v38  ;;  %v5831_v56 = vpop.f32.mrf.mxu3 }
 0x2bb   :  { %v1190_v8 = vadd.f32 %v1189_v63, %v1188_v22 }
 0x2bc   :  { %v1586_v43 = vadd.f32 1e-05, %v1578_v27 }
 0x2bd   :  { %v5835_v33 = vpop.f32.mrf.mxu2  ;;  %v1192_v4 = vadd.f32 %v1191_v25, %v1190_v8 }
 0x2be   :  { %4342 = vrsqrt.f32 %v1586_v43  ;;  %v1195_v61 = vsel %vm1078_vm2, %v5835_v33, 0.0  ;;  %vm1636_vm13 = vweird.f32 %v1586_v43 }
 0x2bf   :  { %4227 = vmatmul.msk.f32.gmra.mxu3 %vm1078_vm2, %v5721_v57  ;;  %v1194_v49 = vadd.f32 %v1193_v10, %v1192_v4 }
 0x2c1   :  { %4267 = vmatmul.msk.f32.gmra.mxu1 %vm557_vm1, %v4373_v55  ;;  %v1196_v26 = vadd.f32 %v1195_v61, %v1194_v49 }
 0x2c2   :  { %4198 = vmatmul.msk.f32.gmra.mxu2 %vm557_vm1, %v90_v24  ;;  %v5853_v19 = vpop.f32.mrf.mxu3 }
 0x2c4   :  { %v4343_v23 = vpop.eup %4342 }
 0x2c5   :  { %v1631_v60 = vmul.f32 %v4343_v23, %v1586_v43  ;;  %v5855_v59 = vpop.f32.mrf.mxu2  ;;  %vm1637_vm11 = vweird.f32 %v4343_v23 }
 0x2c6   :  { %v1197_v57 = vsel %vm1078_vm2, %v5855_v59, 0.0  ;;  %vm1638_vm14 = vmor %vm1636_vm13, %vm1637_vm11  ;;  %vm4023_vm11 = vcmask 1044484  }
 0x2c7   :  { %v1632_v6 = vmul.f32 %v4343_v23, %v1631_v60  ;;  %v1198_v0 = vadd.f32 %v1197_v57, %v1196_v26  ;;  %v5859_v21 = vpop.f32.mrf.mxu1  ;;  %4228 = vmatmul.msk.f32.gmra.mxu3 %vm1078_vm2, %v5743_v42 }
 0x2c9   :  { %v1633_v20 = vmul.f32 0.5, %v1632_v6  ;;  %v1199_v35 = vrot.slane %v1198_v0, 4  ;;  %4268 = vmatmul.msk.f32.gmra.mxu1 %vm557_vm1, %v4374_v16 }
 0x2ca   :  { %v5867_v37 = vpop.f32.mrf.mxu3 }
 0x2cb   :  { %v1634_v53 = vsub.f32 1.5, %v1633_v20  ;;  %v1200_v45 = vadd.f32 %v1199_v35, %v1198_v0 }
 0x2cd   :  { %v1635_v34 = vmul.f32 %v4343_v23, %v1634_v53  ;;  %v1201_v62 = vrot.slane %v1200_v45, 2 }
 0x2cf   :  { %v1639_v38 = vsel %vm1638_vm14, %v4343_v23, %v1635_v34  ;;  %v1202_v13 = vadd.f32 %v1201_v62, %v1200_v45  ;;  %v5869_v42 = vpop.f32.mrf.mxu1  ;;  %4229 = vmatmul.msk.f32.gmra.mxu3 %vm1078_vm2, %v5767_v2 }
 0x2d0   :  { %v1674_v7 = vmul.f32 %v5637_v36, %v1639_v38 }
 0x2d1   :  { %v1203_v39 = vrot.slane %v1202_v13, 1  ;;  %4269 = vmatmul.msk.f32.gmra.mxu1 %vm557_vm1, %v4375_v5 }
 0x2d2   :  { %v5878_v27 = vperm.slane %v1674_v7, 0  ;;  %v2434_v3 = vpop.f32.mrf.mxu3 }
 0x2d3   :  { %v1204_v15 = vadd.f32 %v1203_v39, %v1202_v13 }
 0x2d4   :  { %v1718_v28 = vmul.f32 %v5878_v27, %v5693_v40  ;;  %v1719_v43 = vmul.f32 %v5878_v27, %v5696_v50  ;;  %v1725_v2 = vmul.f32 %v5878_v27, %v5750_v31  ;;  %v1720_v22 = vmul.f32 %v5878_v27, %v5699_v18 }
 0x2d5   :  { %v1259_v63 = vmul.f32 %v4835_v17, %v1204_v15  ;;  %v1721_v8 = vmul.f32 %v5878_v27, %v5702_v44  ;;  %v1722_v24 = vmul.f32 %v5878_v27, %v5707_v11  ;;  %v1723_v40 = vmul.f32 %v5878_v27, %v5725_v41  ;;  %v4376_v11 = vld [vmem:[%s7775_s0 + $0x38] sm:$0xff] }
 0x2d6   :  { %v1783_v25 = vadd.f32 %v5655_v32, %v1718_v28  ;;  %v1784_v18 = vadd.f32 %v5655_v32, %v1719_v43  ;;  %v5903_v4 = vadd.f32 %v5655_v32, %v1725_v2 }
 0x2d7   :  { %v1267_v50 = vmul.f32 %v5444_v46, %v1259_v63  ;;  %v5897_v10 = vpop.f32.mrf.mxu1  ;;  %4230 = vmatmul.msk.f32.gmra.mxu3 %vm1078_vm2, %v5770_v54  ;;  %v1785_v46 = vadd.f32 %v5655_v32, %v1720_v22  ;;  %v1786_v41 = vadd.f32 %v5655_v32, %v1721_v8  ;;  %v1787_v54 = vadd.f32 %v5655_v32, %v1722_v24 }
 0x2d8   :  { %v1911_v31 = vmul.f32 0.01, %v1783_v25  ;;  %vm1847_vm15 = vcmp.gt.f32.partialorder %v1783_v25, 0.0  ;;  %v1788_v55 = vadd.f32 %v5655_v32, %v1723_v40  ;;  %vm1848_vm0 = vcmp.gt.f32.partialorder %v1784_v18, 0.0 }
 0x2d9   :  { %v1275_v44 = vperm.slane %v1267_v50, 0  ;;  %4270 = vmatmul.msk.f32.gmra.mxu1 %vm557_vm1, %v4376_v11  ;;  %vm1849_vm3 = vcmp.gt.f32.partialorder %v1785_v46, 0.0  ;;  %v1914_v45 = vmul.f32 0.01, %v1786_v41  ;;  %vm1850_vm4 = vcmp.gt.f32.partialorder %v1786_v41, 0.0 }
 0x2da   :  { %v2437_v26 = vpop.f32.mrf.mxu3  ;;  %v1975_v0 = vsel %vm1847_vm15, %v1783_v25, %v1911_v31  ;;  %vm1851_vm5 = vcmp.gt.f32.partialorder %v1787_v54, 0.0  ;;  %v1915_v8 = vmul.f32 0.01, %v1787_v54  ;;  %vm1852_vm6 = vcmp.gt.f32.partialorder %v1788_v55, 0.0 }
 0x2db   :  { %v5914_v61 = vsub.f32 %v5641_v14, %v1275_v44  ;;  %v5917_v49 = vsub.f32 %v5665_v30, %v1275_v44  ;;  %v5920_v23 = vsub.f32 %v5715_v9, %v1275_v44  ;;  %v5923_v60 = vsub.f32 %v5765_v1, %v1275_v44  ;;  %2633 = vmatpush.msra.mxu2 %v2437_v26 }
 0x2dc   :  { %v5926_v57 = vsub.f32 %v5793_v58, %v1275_v44  ;;  %v5929_v6 = vsub.f32 %v5807_v47, %v1275_v44  ;;  %v1912_v14 = vmul.f32 0.01, %v1784_v18  ;;  %v5932_v20 = vsub.f32 %v5835_v33, %v1275_v44 }
 0x2dd   :  { %v1382_v30 = vmul.f32 %v5914_v61, %v5914_v61  ;;  %v1383_v9 = vmul.f32 %v5917_v49, %v5917_v49  ;;  %v1384_v1 = vmul.f32 %v5920_v23, %v5920_v23  ;;  %v5941_v58 = vsub.f32 %v5855_v59, %v1275_v44  ;;  %2634 = vmatpush.msra.mxu2 %v2434_v3 }
 0x2de   :  { %v1913_v47 = vmul.f32 0.01, %v1785_v46  ;;  %v1385_v33 = vmul.f32 %v5923_v60, %v5923_v60  ;;  %v1386_v34 = vmul.f32 %v5926_v57, %v5926_v57  ;;  %v1387_v59 = vmul.f32 %v5929_v6, %v5929_v6 }
 0x2df   :  { %v1511_v35 = vsel %vm1078_vm2, %v1382_v30, 0.0  ;;  %v1512_v16 = vsel %vm1078_vm2, %v1383_v9, 0.0  ;;  %v5947_v53 = vpop.f32.mrf.mxu1  ;;  %4231 = vmatmul.msk.f32.gmra.mxu3 %vm1078_vm2, %v1975_v0  ;;  %2635 = vmatpush.msra.mxu2 %v5867_v37  ;;  %v1388_v38 = vmul.f32 %v5932_v20, %v5932_v20  ;;  %v1514_v13 = vsel %vm1078_vm2, %v1384_v1, 0.0 }
 0x2e0   :  { %v1513_v62 = vadd.f32 %v1512_v16, %v1511_v35  ;;  %v2091_v7 = vsel %vm1078_vm2, %v1975_v0, 0.0  ;;  %v1976_v39 = vsel %vm1848_vm0, %v1784_v18, %v1912_v14  ;;  %v1389_v5 = vmul.f32 %v5941_v58, %v5941_v58  ;;  %v4377_v35 = vld [vmem:[%s7775_s0 + $0x40] sm:$0xff] }
 0x2e1   :  { %2636 = vmatpush.msra.mxu2 %v5853_v19  ;;  %v2092_v3 = vsel %vm1078_vm2, %v1976_v39, 0.0  ;;  %v1977_v37 = vsel %vm1849_vm3, %v1785_v46, %v1913_v47  ;;  %v1516_v28 = vsel %vm1078_vm2, %v1385_v33, 0.0  ;;  %v5968_v63 = vsel %vm1850_vm4, %v1786_v41, %v1914_v45 }
 0x2e2   :  { %v1515_v15 = vadd.f32 %v1514_v13, %v1513_v62  ;;  %v5966_v43 = vpop.f32.mrf.mxu3  ;;  %v2093_v2 = vadd.f32 %v2092_v3, %v2091_v7  ;;  %v2094_v25 = vsel %vm1078_vm2, %v1977_v37, 0.0  ;;  %v1518_v19 = vsel %vm1078_vm2, %v1386_v34, 0.0  ;;  %v4378_v3 = vld [vmem:[%s7775_s0 + $0x48] sm:$0xff] }
 0x2e3   :  { %2637 = vmatpush.msra.mxu2 %v5831_v56  ;;  %v1916_v40 = vmul.f32 0.01, %v1788_v55  ;;  %v1724_v50 = vmul.f32 %v5878_v27, %v5735_v52  ;;  %v1520_v18 = vsel %vm1078_vm2, %v1387_v59, 0.0  ;;  %v2096_v44 = vsel %vm1078_vm2, %v5968_v63, 0.0 }
 0x2e4   :  { %v1517_v22 = vadd.f32 %v1516_v28, %v1515_v15  ;;  %v2095_v24 = vadd.f32 %v2094_v25, %v2093_v2  ;;  %v5979_v56 = vsel %vm1851_vm5, %v1787_v54, %v1915_v8  ;;  %v1918_v0 = vmul.f32 0.01, %v5903_v4 }
 0x2e5   :  { %2638 = vmatpush.msra.mxu2 %v5805_v51  ;;  %v5983_v41 = vsel %vm1852_vm6, %v1788_v55, %v1916_v40  ;;  %v1789_v26 = vadd.f32 %v5655_v32, %v1724_v50  ;;  %v2098_v51 = vsel %vm1078_vm2, %v5979_v56, 0.0  ;;  %vm1854_vm7 = vcmp.gt.f32.partialorder %v5903_v4, 0.0 }
 0x2e6   :  { %v1519_v31 = vadd.f32 %v1518_v19, %v1517_v22  ;;  %v2097_v46 = vadd.f32 %v2096_v44, %v2095_v24  ;;  %v1522_v27 = vsel %vm1078_vm2, %v1388_v38, 0.0  ;;  %v2100_v30 = vsel %vm1078_vm2, %v5983_v41, 0.0 }
 0x2e7   :  { %v5981_v11 = vpop.f32.mrf.mxu1  ;;  %4232 = vmatmul.msk.f32.gmra.mxu3 %vm1078_vm2, %v1976_v39  ;;  %2639 = vmatpush.msra.mxu2 %v5791_v29  ;;  %vm1853_vm8 = vcmp.gt.f32.partialorder %v1789_v26, 0.0  ;;  %v1917_v55 = vmul.f32 0.01, %v1789_v26  ;;  %v1524_v9 = vsel %vm1078_vm2, %v1389_v5, 0.0  ;;  %v6002_v33 = vsel %vm1854_vm7, %v5903_v4, %v1918_v0 }
 0x2e8   :  { %v1521_v52 = vadd.f32 %v1520_v18, %v1519_v31  ;;  %v2099_v54 = vadd.f32 %v2098_v51, %v2097_v46  ;;  %v2104_v59 = vsel %vm1078_vm2, %v6002_v33, 0.0  ;;  %v1206_v39 = vsel %vm1078_vm2, %v5869_v42, 0.0 }
 0x2e9   :  { %2640 = vmatpush.msra.mxu2 %v5758_v12  ;;  %v5999_v47 = vsel %vm1853_vm8, %v1789_v26, %v1917_v55  ;;  %v1205_v2 = vsel %vm1078_vm2, %v5859_v21, 0.0  ;;  %v1210_v19 = vsel %vm1078_vm2, %v5947_v53, 0.0  ;;  %v1212_v18 = vsel %vm1078_vm2, %v5981_v11, 0.0 }
 0x2ea   :  { %v1523_v14 = vadd.f32 %v1522_v27, %v1521_v52  ;;  %v5997_v1 = vpop.f32.mrf.mxu3  ;;  %v2101_v29 = vadd.f32 %v2100_v30, %v2099_v54  ;;  %4271 = vmatmul.msk.f32.vlgmr.msra.gmra.mxu2 %vm557_vm1, %v4377_v35  ;;  %v2102_v16 = vsel %vm1078_vm2, %v5999_v47, 0.0  ;;  %v1207_v22 = vadd.f32 %v1206_v39, %v1205_v2  ;;  %v4379_v54 = vld [vmem:[%s7775_s0 + $0x50] sm:$0xff]  ;;  %v4381_v2 = vld [vmem:[%s7775_s0 + $0x60] sm:$0xff] }
 0x2ec   :  { %v1525_v12 = vadd.f32 %v1524_v9, %v1523_v14  ;;  %v2103_v45 = vadd.f32 %v2102_v16, %v2101_v29 }
 0x2ee   :  { %v1526_v34 = vrot.slane %v1525_v12, 4  ;;  %v2105_v38 = vadd.f32 %v2104_v59, %v2103_v45  ;;  %v4380_v59 = vld [vmem:[%s7775_s0 + $0x58] sm:$0xff] }
 0x2ef   :  { %v6012_v62 = vpop.f32.mrf.mxu1  ;;  %4233 = vmatmul.msk.f32.gmra.mxu3 %vm1078_vm2, %v1977_v37  ;;  %v1208_v37 = vsel %vm1078_vm2, %v5897_v10, 0.0 }
 0x2f0   :  { %v1527_v4 = vadd.f32 %v1526_v34, %v1525_v12  ;;  %v2106_v13 = vrot.slane %v2105_v38, 4  ;;  %v1209_v24 = vadd.f32 %v1208_v37, %v1207_v22  ;;  %v1214_v0 = vsel %vm1078_vm2, %v6012_v62, 0.0 }
 0x2f2   :  { %v1528_v7 = vrot.slane %v1527_v4, 2  ;;  %v6017_v5 = vpop.f32.mrf.mxu3  ;;  %v2107_v15 = vadd.f32 %v2106_v13, %v2105_v38  ;;  %4272 = vmatmul.msk.f32.gmra.mxu2 %vm557_vm1, %v4378_v3  ;;  %v1211_v44 = vadd.f32 %v1210_v19, %v1209_v24  ;;  %v6077_v24 = vld [vmem:[%s7777_s2 + $0x32] sm:$0x1] }
 0x2f4   :  { %v1529_v28 = vadd.f32 %v1528_v7, %v1527_v4  ;;  %v2108_v25 = vrot.slane %v2107_v15, 2  ;;  %v1213_v52 = vadd.f32 %v1212_v18, %v1211_v44 }
 0x2f6   :  { %v1530_v8 = vrot.slane %v1529_v28, 1  ;;  %v2109_v50 = vadd.f32 %v2108_v25, %v2107_v15  ;;  %v1215_v14 = vadd.f32 %v1214_v0, %v1213_v52 }
 0x2f7   :  { %v6029_v40 = vpop.f32.mrf.mxu1  ;;  %4234 = vmatmul.msk.f32.gmra.mxu3 %vm1078_vm2, %v5968_v63 }
 0x2f8   :  { %v1531_v31 = vadd.f32 %v1530_v8, %v1529_v28  ;;  %v2110_v46 = vrot.slane %v2109_v50, 1  ;;  %v1216_v63 = vsel %vm1078_vm2, %v6029_v40, 0.0 }
 0x2f9   :  { %v1217_v9 = vadd.f32 %v1216_v63, %v1215_v14 }
 0x2fa   :  { %v1579_v26 = vmul.f32 %v1531_v31, %v4835_v17  ;;  %v6038_v51 = vpop.f32.mrf.mxu3  ;;  %v2111_v27 = vadd.f32 %v2110_v46, %v2109_v50  ;;  %4273 = vmatmul.msk.f32.gmra.mxu2 %vm557_vm1, %v4379_v54  ;;  %v4383_v46 = vld [vmem:[%s7775_s0 + $0x68] sm:$0xff] }
 0x2fc   :  { %v1587_v55 = vadd.f32 1e-05, %v1579_v26  ;;  %v2179_v30 = vmul.f32 %v2111_v27, %v4835_v17 }
 0x2fe   :  { %4344 = vrsqrt.f32 %v1587_v55  ;;  %v6049_v35 = vsel %vm4023_vm11, %v2179_v30, %v5823_v48  ;;  %vm1646_vm14 = vweird.f32 %v1587_v55 }
 0x2ff   :  { %v1010_v29 = vpop.f32.mrf.mxu1  ;;  %4235 = vmatmul.msk.f32.gmra.mxu3 %vm1078_vm2, %v5979_v56 }
 0x300   :  { %v1218_v12 = vsel %vm1078_vm2, %v1010_v29, 0.0 }
 0x301   :  { %v1219_v16 = vadd.f32 %v1218_v12, %v1217_v9 }
 0x302   :  { %v6054_v45 = vpop.f32.mrf.mxu3  ;;  %4274 = vmatmul.msk.f32.gmra.mxu2 %vm557_vm1, %v4380_v59 }
 0x303   :  { %v1220_v34 = vrot.slane %v1219_v16, 4 }
 0x304   :  { %v4345_v38 = vpop.eup %4344 }
 0x305   :  { %v1641_v4 = vmul.f32 %v4345_v38, %v1587_v55  ;;  %v1221_v13 = vadd.f32 %v1220_v34, %v1219_v16  ;;  %vm1647_vm13 = vweird.f32 %v4345_v38 }
 0x306   :  { %vm1648_vm15 = vmor %vm1646_vm14, %vm1647_vm13  ;;  %vm4025_vm14 = vcmask 1045509  }
 0x307   :  { %v1642_v48 = vmul.f32 %v4345_v38, %v1641_v4  ;;  %v1222_v7 = vrot.slane %v1221_v13, 2  ;;  %4236 = vmatmul.msk.f32.gmra.mxu3 %vm1078_vm2, %v5983_v41 }
 0x309   :  { %v1643_v56 = vmul.f32 0.5, %v1642_v48  ;;  %v1223_v39 = vadd.f32 %v1222_v7, %v1221_v13 }
 0x30a   :  { %v6062_v28 = vpop.f32.mrf.mxu3  ;;  %4275 = vmatmul.msk.f32.gmra.mxu2 %vm557_vm1, %v4381_v2 }
 0x30b   :  { %v1644_v15 = vsub.f32 1.5, %v1643_v56  ;;  %v1224_v3 = vrot.slane %v1223_v39, 1 }
 0x30d   :  { %v1645_v37 = vmul.f32 %v4345_v38, %v1644_v15  ;;  %v1225_v22 = vadd.f32 %v1224_v3, %v1223_v39  ;;  %v6068_v25 = vpop.f32.mrf.mxu2 }
 0x30f   :  { %v1649_v41 = vsel %vm1648_vm15, %v4345_v38, %v1645_v37  ;;  %v1260_v8 = vmul.f32 %v4835_v17, %v1225_v22  ;;  %4237 = vmatmul.msk.f32.gmra.mxu3 %vm1078_vm2, %v5999_v47  ;;  %v4384_v38 = vld [vmem:[%s7775_s0 + $0x70] sm:$0xff] }
 0x310   :  { %v1675_v19 = vmul.f32 %v5637_v36, %v1649_v41 }
 0x311   :  { %v1268_v50 = vmul.f32 %v6077_v24, %v1260_v8 }
 0x312   :  { %v6080_v31 = vperm.slane %v1675_v19, 0  ;;  %v2458_v44 = vpop.f32.mrf.mxu3  ;;  %4276 = vmatmul.msk.f32.gmra.mxu2 %vm557_vm1, %v4383_v46 }
 0x313   :  { %v1276_v18 = vperm.slane %v1268_v50, 0 }
 0x314   :  { %v1733_v36 = vmul.f32 %v6080_v31, %v5941_v58  ;;  %v1728_v63 = vmul.f32 %v6080_v31, %v5920_v23  ;;  %v1729_v15 = vmul.f32 %v6080_v31, %v5923_v60  ;;  %v1730_v3 = vmul.f32 %v6080_v31, %v5926_v57 }
 0x315   :  { %v6089_v47 = vsub.f32 %v5859_v21, %v1276_v18  ;;  %v6092_v26 = vsub.f32 %v5869_v42, %v1276_v18  ;;  %v6095_v0 = vsub.f32 %v5897_v10, %v1276_v18  ;;  %v6098_v52 = vsub.f32 %v5947_v53, %v1276_v18  ;;  %v6100_v27 = vpop.f32.mrf.mxu2 }
 0x316   :  { %v6103_v54 = vsub.f32 %v5981_v11, %v1276_v18  ;;  %v6106_v55 = vsub.f32 %v6012_v62, %v1276_v18  ;;  %v6109_v21 = vsub.f32 %v6029_v40, %v1276_v18  ;;  %v1726_v42 = vmul.f32 %v6080_v31, %v5914_v61 }
 0x317   :  { %v6113_v58 = vsub.f32 %v1010_v29, %v1276_v18  ;;  %v1390_v10 = vmul.f32 %v6089_v47, %v6089_v47  ;;  %v1391_v53 = vmul.f32 %v6092_v26, %v6092_v26  ;;  %v1392_v11 = vmul.f32 %v6095_v0, %v6095_v0  ;;  %4238 = vmatmul.msk.f32.gmra.mxu3 %vm1078_vm2, %v6002_v33 }
 0x318   :  { %v1393_v62 = vmul.f32 %v6098_v52, %v6098_v52  ;;  %v1394_v40 = vmul.f32 %v6103_v54, %v6103_v54  ;;  %v1727_v61 = vmul.f32 %v6080_v31, %v5917_v49  ;;  %v6134_v9 = vadd.f32 %v5655_v32, %v1733_v36 }
 0x319   :  { %v1532_v14 = vsel %vm1078_vm2, %v1390_v10, 0.0  ;;  %v1533_v30 = vsel %vm1078_vm2, %v1391_v53, 0.0  ;;  %v1395_v29 = vmul.f32 %v6106_v55, %v6106_v55  ;;  %v1396_v12 = vmul.f32 %v6109_v21, %v6109_v21 }
 0x31a   :  { %v1534_v33 = vadd.f32 %v1533_v30, %v1532_v14  ;;  %v1397_v49 = vmul.f32 %v6113_v58, %v6113_v58  ;;  %v1535_v16 = vsel %vm1078_vm2, %v1392_v11, 0.0  ;;  %v1537_v23 = vsel %vm1078_vm2, %v1393_v62, 0.0  ;;  %v2461_v34 = vpop.f32.mrf.mxu3  ;;  %4277 = vmatmul.msk.f32.gmra.mxu2 %vm557_vm1, %v4384_v38 }
 0x31b   :  { %v1791_v59 = vadd.f32 %v5655_v32, %v1726_v42  ;;  %v1539_v13 = vsel %vm1078_vm2, %v1394_v40, 0.0  ;;  %2674 = vmatpush.msrb.mxu1 %v2461_v34  ;;  %v1792_v48 = vadd.f32 %v5655_v32, %v1727_v61  ;;  %v1793_v7 = vadd.f32 %v5655_v32, %v1728_v63  ;;  %v4385_v63 = vld [vmem:[%s7775_s0 + $0x78] sm:$0xff] }
 0x31c   :  { %v1536_v4 = vadd.f32 %v1535_v16, %v1534_v33  ;;  %v1541_v37 = vsel %vm1078_vm2, %v1395_v29, 0.0  ;;  %v1543_v41 = vsel %vm1078_vm2, %v1396_v12, 0.0  ;;  %v1794_v57 = vadd.f32 %v5655_v32, %v1729_v15 }
 0x31d   :  { %vm1855_vm0 = vcmp.gt.f32.partialorder %v1791_v59, 0.0  ;;  %v1919_v56 = vmul.f32 0.01, %v1791_v59  ;;  %v6152_v39 = vpop.f32.mrf.mxu2  ;;  %2675 = vmatpush.msrb.mxu1 %v2458_v44  ;;  %vm1856_vm3 = vcmp.gt.f32.partialorder %v1792_v48, 0.0  ;;  %v1920_v22 = vmul.f32 0.01, %v1792_v48 }
 0x31e   :  { %v1538_v2 = vadd.f32 %v1537_v23, %v1536_v4  ;;  %vm1857_vm4 = vcmp.gt.f32.partialorder %v1793_v7, 0.0  ;;  %v1921_v19 = vmul.f32 0.01, %v1793_v7  ;;  %v1795_v36 = vadd.f32 %v5655_v32, %v1730_v3 }
 0x31f   :  { %v1983_v8 = vsel %vm1855_vm0, %v1791_v59, %v1919_v56  ;;  %2676 = vmatpush.msrb.mxu1 %v6062_v28  ;;  %v1984_v60 = vsel %vm1856_vm3, %v1792_v48, %v1920_v22  ;;  %v1731_v42 = vmul.f32 %v6080_v31, %v5929_v6  ;;  %vm1858_vm5 = vcmp.gt.f32.partialorder %v1794_v57, 0.0  ;;  %v4386_v56 = vld [vmem:[%s7775_s0 + $0x80] sm:$0xff] }
 0x320   :  { %v1540_v50 = vadd.f32 %v1539_v13, %v1538_v2  ;;  %v2112_v18 = vsel %vm1078_vm2, %v1983_v8, 0.0  ;;  %4239 = vmatmul.msk.f32.gmra.mxu3 %vm1078_vm2, %v1983_v8  ;;  %v2113_v46 = vsel %vm1078_vm2, %v1984_v60, 0.0  ;;  %v1985_v44 = vsel %vm1857_vm4, %v1793_v7, %v1921_v19 }
 0x321   :  { %2677 = vmatpush.msrb.mxu1 %v6054_v45  ;;  %v2114_v53 = vadd.f32 %v2113_v46, %v2112_v18  ;;  %v2115_v11 = vsel %vm1078_vm2, %v1985_v44, 0.0  ;;  %v1922_v28 = vmul.f32 0.01, %v1794_v57  ;;  %vm1859_vm6 = vcmp.gt.f32.partialorder %v1795_v36, 0.0 }
 0x322   :  { %v1542_v10 = vadd.f32 %v1541_v37, %v1540_v50  ;;  %v6170_v62 = vpop.f32.mrf.mxu3  ;;  %v1923_v40 = vmul.f32 0.01, %v1795_v36  ;;  %v1796_v61 = vadd.f32 %v5655_v32, %v1731_v42  ;;  %4278 = vmatmul.msk.f32.gmra.mxu2 %vm557_vm1, %v4385_v63  ;;  %v1545_v45 = vsel %vm1078_vm2, %v1397_v49, 0.0 }
 0x323   :  { %2678 = vmatpush.msrb.mxu1 %v6038_v51  ;;  %v2116_v14 = vadd.f32 %v2115_v11, %v2114_v53  ;;  %v1732_v30 = vmul.f32 %v6080_v31, %v5932_v20  ;;  %v1986_v12 = vsel %vm1858_vm5, %v1794_v57, %v1922_v28  ;;  %vm1862_vm8 = vcmp.gt.f32.partialorder %v6134_v9, 0.0  ;;  %v4387_v57 = vld [vmem:[%s7775_s0 + $0x88] sm:$0xff] }
 0x324   :  { %v1544_v6 = vadd.f32 %v1543_v41, %v1542_v10  ;;  %v6183_v33 = vsel %vm1859_vm6, %v1795_v36, %v1923_v40  ;;  %vm1860_vm7 = vcmp.gt.f32.partialorder %v1796_v61, 0.0  ;;  %v1924_v16 = vmul.f32 0.01, %v1796_v61 }
 0x325   :  { %v6181_v29 = vpop.f32.mrf.mxu2  ;;  %2679 = vmatpush.msrb.mxu1 %v6017_v5  ;;  %v2117_v34 = vsel %vm1078_vm2, %v1986_v12, 0.0  ;;  %v1797_v51 = vadd.f32 %v5655_v32, %v1732_v30  ;;  %v2119_v20 = vsel %vm1078_vm2, %v6183_v33, 0.0  ;;  %v1926_v31 = vmul.f32 0.01, %v6134_v9 }
 0x326   :  { %v1546_v23 = vadd.f32 %v1545_v45, %v1544_v6  ;;  %v2118_v59 = vadd.f32 %v2117_v34, %v2116_v14  ;;  %v6187_v49 = vsel %vm1860_vm7, %v1796_v61, %v1924_v16  ;;  %v1226_v28 = vsel %vm1078_vm2, %v6068_v25, 0.0  ;;  %v4388_v45 = vld [vmem:[%s7775_s0 + $0x90] sm:$0xff] }
 0x327   :  { %2680 = vmatpush.msrb.mxu1 %v5997_v1  ;;  %vm1861_vm13 = vcmp.gt.f32.partialorder %v1797_v51, 0.0  ;;  %v1925_v4 = vmul.f32 0.01, %v1797_v51  ;;  %v2121_v32 = vsel %vm1078_vm2, %v6187_v49, 0.0  ;;  %v6208_v15 = vsel %vm1862_vm8, %v6134_v9, %v1926_v31 }
 0x328   :  { %v1547_v38 = vrot.slane %v1546_v23, 4  ;;  %4240 = vmatmul.msk.f32.gmra.mxu3 %vm1078_vm2, %v1984_v60  ;;  %v2120_v5 = vadd.f32 %v2119_v20, %v2118_v59  ;;  %v2125_v41 = vsel %vm1078_vm2, %v6208_v15, 0.0  ;;  %v1229_v40 = vsel %vm1078_vm2, %v6152_v39, 0.0 }
 0x329   :  { %2681 = vmatpush.msrb.mxu1 %v5966_v43  ;;  %v6201_v1 = vsel %vm1861_vm13, %v1797_v51, %v1925_v4  ;;  %v1231_v14 = vsel %vm1078_vm2, %v6181_v29, 0.0 }
 0x32a   :  { %v1548_v13 = vadd.f32 %v1547_v38, %v1546_v23  ;;  %v6199_v48 = vpop.f32.mrf.mxu3  ;;  %v2122_v7 = vadd.f32 %v2121_v32, %v2120_v5  ;;  %4279 = vmatmul.msk.f32.vlgmr.msrb.gmra.mxu1 %vm557_vm1, %v4386_v56  ;;  %v2123_v43 = vsel %vm1078_vm2, %v6201_v1, 0.0 }
 0x32c   :  { %v1549_v3 = vrot.slane %v1548_v13, 2  ;;  %v2124_v37 = vadd.f32 %v2123_v43, %v2122_v7 }
 0x32d   :  { %v6212_v2 = vpop.f32.mrf.mxu2 }
 0x32e   :  { %v1550_v22 = vadd.f32 %v1549_v3, %v1548_v13  ;;  %v2126_v8 = vadd.f32 %v2125_v41, %v2124_v37  ;;  %v1233_v34 = vsel %vm1078_vm2, %v6212_v2, 0.0 }
 0x330   :  { %v1551_v19 = vrot.slane %v1550_v22, 1  ;;  %4241 = vmatmul.msk.f32.gmra.mxu3 %vm1078_vm2, %v1985_v44  ;;  %v2127_v50 = vrot.slane %v2126_v8, 4  ;;  %v1227_v44 = vsel %vm1078_vm2, %v6100_v27, 0.0 }
 0x331   :  { %v1228_v61 = vadd.f32 %v1227_v44, %v1226_v28  ;;  %v6289_v28 = vld [vmem:[%s7777_s2 + $0x31] ss:$0 sm:$0xff] }
 0x332   :  { %v1552_v18 = vadd.f32 %v1551_v19, %v1550_v22  ;;  %v6217_v60 = vpop.f32.mrf.mxu3  ;;  %v2128_v9 = vadd.f32 %v2127_v50, %v2126_v8  ;;  %4280 = vmatmul.msk.f32.gmra.mxu1 %vm557_vm1, %v4387_v57  ;;  %v6271_v19 = vld [vmem:[%s7777_s2 + $0x30] sm:$0x1]  ;;  %v4391_v57 = vld [vmem:[%s7775_s0 + $0xa0] sm:$0xff] }
 0x333   :  { %v1230_v30 = vadd.f32 %v1229_v40, %v1228_v61 }
 0x334   :  { %v1580_v46 = vmul.f32 %v1552_v18, %v4835_v17  ;;  %v2129_v42 = vrot.slane %v2128_v9, 2 }
 0x335   :  { %v6224_v36 = vpop.f32.mrf.mxu2  ;;  %v1232_v51 = vadd.f32 %v1231_v14, %v1230_v30 }
 0x336   :  { %v1588_v10 = vadd.f32 1e-05, %v1580_v46  ;;  %v2130_v53 = vadd.f32 %v2129_v42, %v2128_v9  ;;  %v1235_v20 = vsel %vm1078_vm2, %v6224_v36, 0.0 }
 0x337   :  { %v1234_v5 = vadd.f32 %v1233_v34, %v1232_v51 }
 0x338   :  { %4346 = vrsqrt.f32 %v1588_v10  ;;  %4242 = vmatmul.msk.f32.gmra.mxu3 %vm1078_vm2, %v1986_v12  ;;  %v2131_v11 = vrot.slane %v2130_v53, 1  ;;  %vm1656_vm0 = vweird.f32 %v1588_v10 }
 0x339   :  { %v1236_v32 = vadd.f32 %v1235_v20, %v1234_v5 }
 0x33a   :  { %v6233_v63 = vpop.f32.mrf.mxu3  ;;  %v2132_v6 = vadd.f32 %v2131_v11, %v2130_v53  ;;  %4281 = vmatmul.msk.f32.gmra.mxu1 %vm557_vm1, %v4388_v45 }
 0x33c   :  { %v2180_v16 = vmul.f32 %v2132_v6, %v4835_v17 }
 0x33d   :  { %v6241_v12 = vpop.f32.mrf.mxu2 }
 0x33e   :  { %v4347_v23 = vpop.eup %4346  ;;  %v6248_v38 = vsel %vm4025_vm14, %v2180_v16, %v6049_v35  ;;  %v1237_v4 = vsel %vm1078_vm2, %v6241_v12, 0.0  ;;  %v4389_v35 = vld [vmem:[%s7775_s0 + $0x98] sm:$0xff] }
 0x33f   :  { %v1651_v59 = vmul.f32 %v4347_v23, %v1588_v10  ;;  %vm1657_vm15 = vweird.f32 %v4347_v23  ;;  %v1238_v3 = vadd.f32 %v1237_v4, %v1236_v32 }
 0x340   :  { %4243 = vmatmul.msk.f32.gmra.mxu3 %vm1078_vm2, %v6183_v33  ;;  %vm1658_vm3 = vmor %vm1656_vm0, %vm1657_vm15 }
 0x341   :  { %v1652_v31 = vmul.f32 %v4347_v23, %v1651_v59 }
 0x342   :  { %v6256_v7 = vpop.f32.mrf.mxu3  ;;  %4282 = vmatmul.msk.f32.gmra.mxu1 %vm557_vm1, %v4389_v35 }
 0x343   :  { %v1653_v13 = vmul.f32 0.5, %v1652_v31 }
 0x345   :  { %v1654_v56 = vsub.f32 1.5, %v1653_v13  ;;  %v6262_v43 = vpop.f32.mrf.mxu2 }
 0x346   :  { %v1239_v33 = vsel %vm1078_vm2, %v6262_v43, 0.0 }
 0x347   :  { %v1655_v37 = vmul.f32 %v4347_v23, %v1654_v56  ;;  %v1240_v22 = vadd.f32 %v1239_v33, %v1238_v3 }
 0x348   :  { %4244 = vmatmul.msk.f32.gmra.mxu3 %vm1078_vm2, %v6187_v49 }
 0x349   :  { %v1659_v41 = vsel %vm1658_vm3, %v4347_v23, %v1655_v37  ;;  %v1241_v8 = vrot.slane %v1240_v22, 4  ;;  %v4393_v23 = vld [vmem:[%s7775_s0 + $0xa8] sm:$0xff]  ;;  %vm4027_vm3 = vcmask 1046534  }
 0x34a   :  { %v1676_v50 = vmul.f32 %v6271_v19, %v1659_v41  ;;  %v6274_v9 = vpop.f32.mrf.mxu3  ;;  %4283 = vmatmul.msk.f32.gmra.mxu1 %vm557_vm1, %v4391_v57 }
 0x34b   :  { %v1242_v18 = vadd.f32 %v1241_v8, %v1240_v22  ;;  %v6319_v22 = vpop.f32.mrf.mxu1 }
 0x34c   :  { %v1684_v46 = vperm.slane %v1676_v50, 0 }
 0x34d   :  { %v1243_v49 = vrot.slane %v1242_v18, 2 }
 0x34e   :  { %v1734_v42 = vmul.f32 %v1684_v46, %v6089_v47  ;;  %v1735_v10 = vmul.f32 %v1684_v46, %v6092_v26  ;;  %v1736_v53 = vmul.f32 %v1684_v46, %v6095_v0  ;;  %v1737_v11 = vmul.f32 %v1684_v46, %v6098_v52 }
 0x34f   :  { %v1244_v44 = vadd.f32 %v1243_v49, %v1242_v18  ;;  %v1738_v26 = vmul.f32 %v1684_v46, %v6103_v54  ;;  %v1739_v52 = vmul.f32 %v1684_v46, %v6106_v55  ;;  %v1741_v4 = vmul.f32 %v1684_v46, %v6113_v58 }
 0x350   :  { %4245 = vmatmul.msk.f32.gmra.mxu3 %vm1078_vm2, %v6201_v1  ;;  %v1799_v40 = vadd.f32 %v6289_v28, %v1734_v42  ;;  %v1800_v61 = vadd.f32 %v6289_v28, %v1735_v10  ;;  %v1801_v47 = vadd.f32 %v6289_v28, %v1736_v53  ;;  %v1802_v6 = vadd.f32 %v6289_v28, %v1737_v11 }
 0x351   :  { %v1245_v0 = vrot.slane %v1244_v44, 1  ;;  %v1803_v55 = vadd.f32 %v6289_v28, %v1738_v26  ;;  %v1804_v35 = vadd.f32 %v6289_v28, %v1739_v52  ;;  %v1740_v8 = vmul.f32 %v1684_v46, %v6109_v21  ;;  %v4394_v21 = vld [vmem:[%s7775_s0 + $0xb0] sm:$0xff] }
 0x352   :  { %vm1863_vm4 = vcmp.gt.f32.partialorder %v1799_v40, 0.0  ;;  %v1927_v1 = vmul.f32 0.01, %v1799_v40  ;;  %vm1864_vm5 = vcmp.gt.f32.partialorder %v1800_v61, 0.0  ;;  %v1928_v45 = vmul.f32 0.01, %v1800_v61  ;;  %v2482_v30 = vpop.f32.mrf.mxu3  ;;  %4284 = vmatmul.msk.f32.gmra.mxu1 %vm557_vm1, %v4393_v23 }
 0x353   :  { %v1246_v14 = vadd.f32 %v1245_v0, %v1244_v44  ;;  %vm1865_vm6 = vcmp.gt.f32.partialorder %v1801_v47, 0.0  ;;  %v1929_v16 = vmul.f32 0.01, %v1801_v47  ;;  %vm1866_vm7 = vcmp.gt.f32.partialorder %v1802_v6, 0.0 }
 0x354   :  { %v1991_v54 = vsel %vm1863_vm4, %v1799_v40, %v1927_v1  ;;  %v6301_v34 = vsel %vm1864_vm5, %v1800_v61, %v1928_v45  ;;  %v1930_v59 = vmul.f32 0.01, %v1802_v6  ;;  %v1931_v37 = vmul.f32 0.01, %v1803_v55 }
 0x355   :  { %v1261_v51 = vmul.f32 %v4835_v17, %v1246_v14  ;;  %v2133_v20 = vsel %vm1078_vm2, %v1991_v54, 0.0  ;;  %v2134_v31 = vsel %vm1078_vm2, %v6301_v34, 0.0  ;;  %v6308_v5 = vsel %vm1865_vm6, %v1801_v47, %v1929_v16  ;;  %v6381_v16 = vpop.f32.mrf.mxu1 }
 0x356   :  { %v2135_v13 = vadd.f32 %v2134_v31, %v2133_v20  ;;  %v6311_v32 = vsel %vm1866_vm7, %v1802_v6, %v1930_v59  ;;  %v2136_v3 = vsel %vm1078_vm2, %v6308_v5, 0.0  ;;  %vm1867_vm8 = vcmp.gt.f32.partialorder %v1803_v55, 0.0 }
 0x357   :  { %v1269_v56 = vmul.f32 %v6077_v24, %v1261_v51  ;;  %v2138_v58 = vsel %vm1078_vm2, %v6311_v32, 0.0  ;;  %v1806_v50 = vadd.f32 %v6289_v28, %v1741_v4  ;;  %vm1868_vm13 = vcmp.gt.f32.partialorder %v1804_v35, 0.0 }
 0x358   :  { %4246 = vmatmul.msk.f32.gmra.mxu3 %vm1078_vm2, %v6208_v15  ;;  %v2137_v33 = vadd.f32 %v2136_v3, %v2135_v13  ;;  %v1932_v18 = vmul.f32 0.01, %v1804_v35  ;;  %v1805_v53 = vadd.f32 %v6289_v28, %v1740_v8 }
 0x359   :  { %v1277_v41 = vperm.slane %v1269_v56, 0  ;;  %vm1870_vm15 = vcmp.gt.f32.partialorder %v1806_v50, 0.0  ;;  %v1934_v47 = vmul.f32 0.01, %v1806_v50 }
 0x35a   :  { %v2139_v24 = vadd.f32 %v2138_v58, %v2137_v33  ;;  %v2485_v10 = vpop.f32.mrf.mxu3  ;;  %4285 = vmatmul.msk.f32.gmra.mxu1 %vm557_vm1, %v4394_v21  ;;  %vm1869_vm0 = vcmp.gt.f32.partialorder %v1805_v53, 0.0  ;;  %v1933_v45 = vmul.f32 0.01, %v1805_v53 }
 0x35b   :  { %v6326_v57 = vsub.f32 %v6068_v25, %v1277_v41  ;;  %v6329_v15 = vsub.f32 %v6100_v27, %v1277_v41  ;;  %v6332_v49 = vsub.f32 %v6152_v39, %v1277_v41  ;;  %v6335_v42 = vsub.f32 %v6181_v29, %v1277_v41  ;;  %2715 = vmatpush.msrb.mxu2 %v2485_v10 }
 0x35c   :  { %v6342_v46 = vsub.f32 %v6212_v2, %v1277_v41  ;;  %v6344_v25 = vsel %vm1867_vm8, %v1803_v55, %v1931_v37  ;;  %v6354_v44 = vsub.f32 %v6224_v36, %v1277_v41  ;;  %v6357_v2 = vsel %vm1868_vm13, %v1804_v35, %v1932_v18 }
 0x35d   :  { %v1398_v27 = vmul.f32 %v6326_v57, %v6326_v57  ;;  %v1399_v39 = vmul.f32 %v6329_v15, %v6329_v15  ;;  %v1400_v29 = vmul.f32 %v6332_v49, %v6332_v49  ;;  %2716 = vmatpush.msrb.mxu2 %v2482_v30  ;;  %v1401_v11 = vmul.f32 %v6335_v42, %v6335_v42  ;;  %v6419_v10 = vpop.f32.mrf.mxu1 }
 0x35e   :  { %v6364_v26 = vsub.f32 %v6241_v12, %v1277_v41  ;;  %v1402_v36 = vmul.f32 %v6342_v46, %v6342_v46  ;;  %v2140_v6 = vsel %vm1078_vm2, %v6344_v25, 0.0  ;;  %v6374_v14 = vsub.f32 %v6262_v43, %v1277_v41  ;;  %v4395_v43 = vld [vmem:[%s7775_s0 + $0xb8] sm:$0xff] }
 0x35f   :  { %v1553_v40 = vsel %vm1078_vm2, %v1398_v27, 0.0  ;;  %v1554_v61 = vsel %vm1078_vm2, %v1399_v39, 0.0  ;;  %2717 = vmatpush.msrb.mxu2 %v6274_v9  ;;  %v1556_v52 = vsel %vm1078_vm2, %v1400_v29, 0.0  ;;  %v2141_v1 = vadd.f32 %v2140_v6, %v2139_v24  ;;  %v4396_v24 = vld [vmem:[%s7775_s0 + $0xc0] sm:$0xff] }
 0x360   :  { %v1555_v0 = vadd.f32 %v1554_v61, %v1553_v40  ;;  %4247 = vmatmul.msk.f32.gmra.mxu3 %vm1078_vm2, %v1991_v54  ;;  %v1403_v12 = vmul.f32 %v6354_v44, %v6354_v44  ;;  %v2142_v9 = vsel %vm1078_vm2, %v6357_v2, 0.0  ;;  %v1558_v23 = vsel %vm1078_vm2, %v1401_v11, 0.0  ;;  %v4397_v11 = vld [vmem:[%s7775_s0 + $0xc8] sm:$0xff] }
 0x361   :  { %2718 = vmatpush.msrb.mxu2 %v6256_v7  ;;  %v2143_v59 = vadd.f32 %v2142_v9, %v2141_v1  ;;  %v6390_v55 = vsel %vm1869_vm0, %v1805_v53, %v1933_v45  ;;  %v6393_v7 = vsel %vm1870_vm15, %v1806_v50, %v1934_v47  ;;  %v1404_v31 = vmul.f32 %v6364_v26, %v6364_v26  ;;  %v4398_v45 = vld [vmem:[%s7775_s0 + $0xd0] sm:$0xff] }
 0x362   :  { %v1557_v30 = vadd.f32 %v1556_v52, %v1555_v0  ;;  %v6384_v54 = vpop.f32.mrf.mxu3  ;;  %4286 = vmatmul.msk.f32.gmra.mxu1 %vm557_vm1, %v4395_v43  ;;  %v2144_v20 = vsel %vm1078_vm2, %v6390_v55, 0.0  ;;  %v1560_v4 = vsel %vm1078_vm2, %v1402_v36, 0.0  ;;  %v2146_v56 = vsel %vm1078_vm2, %v6393_v7, 0.0 }
 0x363   :  { %2719 = vmatpush.msrb.mxu2 %v6233_v63  ;;  %v2145_v13 = vadd.f32 %v2144_v20, %v2143_v59  ;;  %v1405_v3 = vmul.f32 %v6374_v14, %v6374_v14  ;;  %v1562_v63 = vsel %vm1078_vm2, %v1403_v12, 0.0  ;;  %v1564_v41 = vsel %vm1078_vm2, %v1404_v31, 0.0  ;;  %v4400_v31 = vld [vmem:[%s7775_s0 + $0xe0] sm:$0xff] }
 0x364   :  { %v1559_v51 = vadd.f32 %v1558_v23, %v1557_v30 }
 0x365   :  { %2720 = vmatpush.msrb.mxu2 %v6217_v60  ;;  %v2147_v33 = vadd.f32 %v2146_v56, %v2145_v13  ;;  %v1566_v60 = vsel %vm1078_vm2, %v1405_v3, 0.0  ;;  %v6430_v0 = vpop.f32.mrf.mxu1 }
 0x366   :  { %v1561_v35 = vadd.f32 %v1560_v4, %v1559_v51 }
 0x367   :  { %2721 = vmatpush.msrb.mxu2 %v6199_v48  ;;  %v2148_v58 = vrot.slane %v2147_v33, 4 }
 0x368   :  { %v1563_v37 = vadd.f32 %v1562_v63, %v1561_v35  ;;  %4248 = vmatmul.msk.f32.gmra.mxu3 %vm1078_vm2, %v6301_v34  ;;  %v2912_v63 = vsel %vm1078_vm2, %v6319_v22, 0.0 }
 0x369   :  { %2722 = vmatpush.msrb.mxu2 %v6170_v62  ;;  %v2149_v18 = vadd.f32 %v2148_v58, %v2147_v33  ;;  %v4401_v33 = vld [vmem:[%s7775_s0 + $0xe8] sm:$0xff] }
 0x36a   :  { %v1565_v8 = vadd.f32 %v1564_v41, %v1563_v37  ;;  %v6413_v50 = vpop.f32.mrf.mxu3  ;;  %4287 = vmatmul.msk.f32.vlgmr.msrb.gmra.mxu2 %vm557_vm1, %v4396_v24  ;;  %v2913_v37 = vsel %vm1078_vm2, %v6381_v16, 0.0 }
 0x36b   :  { %v2150_v48 = vrot.slane %v2149_v18, 2 }
 0x36c   :  { %v1567_v34 = vadd.f32 %v1566_v60, %v1565_v8 }
 0x36d   :  { %v2151_v27 = vadd.f32 %v2150_v48, %v2149_v18  ;;  %v6465_v4 = vpop.f32.mrf.mxu2  ;;  %v2914_v18 = vadd.f32 %v2913_v37, %v2912_v63 }
 0x36e   :  { %v1568_v21 = vrot.slane %v1567_v34, 4 }
 0x36f   :  { %v2152_v62 = vrot.slane %v2151_v27, 1 }
 0x370   :  { %v1569_v39 = vadd.f32 %v1568_v21, %v1567_v34  ;;  %4249 = vmatmul.msk.f32.gmra.mxu3 %vm1078_vm2, %v6308_v5 }
 0x371   :  { %v2153_v40 = vadd.f32 %v2152_v62, %v2151_v27 }
 0x372   :  { %v1570_v29 = vrot.slane %v1569_v39, 2  ;;  %v6423_v53 = vpop.f32.mrf.mxu3  ;;  %4288 = vmatmul.msk.f32.gmra.mxu2 %vm557_vm1, %v4397_v11 }
 0x373   :  { %v2181_v47 = vmul.f32 %v2153_v40, %v4835_v17 }
 0x374   :  { %v1571_v61 = vadd.f32 %v1570_v29, %v1569_v39 }
 0x375   :  { %v6434_v5 = vsel %vm4027_vm3, %v2181_v47, %v6248_v38  ;;  %v6447_v38 = vpop.f32.mrf.mxu1  ;;  %v6478_v41 = vpop.f32.mrf.mxu2 }
 0x376   :  { %v1572_v36 = vrot.slane %v1571_v61, 1 }
 0x378   :  { %v1573_v6 = vadd.f32 %v1572_v36, %v1571_v61  ;;  %4250 = vmatmul.msk.f32.gmra.mxu3 %vm1078_vm2, %v6311_v32  ;;  %v4399_v32 = vld [vmem:[%s7775_s0 + $0xd8] sm:$0xff] }
 0x37a   :  { %v1581_v52 = vmul.f32 %v1573_v6, %v4835_v17  ;;  %v6439_v1 = vpop.f32.mrf.mxu3  ;;  %4289 = vmatmul.msk.f32.gmra.mxu2 %vm557_vm1, %v4398_v45 }
 0x37c   :  { %v1589_v12 = vadd.f32 1e-05, %v1581_v52 }
 0x37d   :  { %v6457_v51 = vpop.f32.mrf.mxu1  ;;  %v6506_v6 = vpop.f32.mrf.mxu2 }
 0x37e   :  { %4348 = vrsqrt.f32 %v1589_v12  ;;  %vm1666_vm5 = vweird.f32 %v1589_v12 }
 0x380   :  { %4251 = vmatmul.msk.f32.gmra.mxu3 %vm1078_vm2, %v6344_v25 }
 0x382   :  { %v6449_v30 = vpop.f32.mrf.mxu3  ;;  %4290 = vmatmul.msk.f32.gmra.mxu2 %vm557_vm1, %v4399_v32 }
 0x384   :  { %v4349_v9 = vpop.eup %4348 }
 0x385   :  { %v1661_v23 = vmul.f32 %v4349_v9, %v1589_v12  ;;  %vm1667_vm4 = vweird.f32 %v4349_v9  ;;  %v6483_v8 = vpop.f32.mrf.mxu1 }
 0x386   :  { %vm1668_vm6 = vmor %vm1666_vm5, %vm1667_vm4 }
 0x387   :  { %v1662_v59 = vmul.f32 %v4349_v9, %v1661_v23 }
 0x388   :  { %4252 = vmatmul.msk.f32.gmra.mxu3 %vm1078_vm2, %v6357_v2 }
 0x389   :  { %v1663_v43 = vmul.f32 0.5, %v1662_v59  ;;  %v2917_v59 = vsel %vm1078_vm2, %v6430_v0, 0.0 }
 0x38a   :  { %v6459_v20 = vpop.f32.mrf.mxu3  ;;  %4291 = vmatmul.msk.f32.gmra.mxu2 %vm557_vm1, %v4400_v31 }
 0x38b   :  { %v1664_v25 = vsub.f32 1.5, %v1663_v43 }
 0x38d   :  { %v1665_v13 = vmul.f32 %v4349_v9, %v1664_v25  ;;  %v6519_v31 = vpop.f32.mrf.mxu1 }
 0x38f   :  { %v1669_v35 = vsel %vm1668_vm6, %v4349_v9, %v1665_v13 }
 0x390   :  { %v1677_v2 = vmul.f32 %v6271_v19, %v1669_v35  ;;  %4253 = vmatmul.msk.f32.gmra.mxu3 %vm1078_vm2, %v6390_v55 }
 0x392   :  { %v1685_v56 = vperm.slane %v1677_v2, 0  ;;  %v2506_v3 = vpop.f32.mrf.mxu3  ;;  %4292 = vmatmul.msk.f32.gmra.mxu2 %vm557_vm1, %v4401_v33 }
 0x394   :  { %v1742_v19 = vmul.f32 %v1685_v56, %v6326_v57  ;;  %v1743_v55 = vmul.f32 %v1685_v56, %v6329_v15  ;;  %v1744_v58 = vmul.f32 %v1685_v56, %v6332_v49  ;;  %v1745_v60 = vmul.f32 %v1685_v56, %v6335_v42 }
 0x395   :  { %v1746_v24 = vmul.f32 %v1685_v56, %v6342_v46  ;;  %v1749_v27 = vmul.f32 %v1685_v56, %v6374_v14  ;;  %v1747_v49 = vmul.f32 %v1685_v56, %v6354_v44  ;;  %v2915_v14 = vsel %vm1078_vm2, %v6419_v10, 0.0  ;;  %v4402_v44 = vld [vmem:[%s7775_s0 + $0xf0] sm:$0xff] }
 0x396   :  { %v1807_v34 = vadd.f32 %v6289_v28, %v1742_v19  ;;  %v1808_v48 = vadd.f32 %v6289_v28, %v1743_v55  ;;  %v1809_v21 = vadd.f32 %v6289_v28, %v1744_v58  ;;  %v1810_v57 = vadd.f32 %v6289_v28, %v1745_v60  ;;  %v6540_v60 = vpop.f32.mrf.mxu2 }
 0x397   :  { %v1811_v15 = vadd.f32 %v6289_v28, %v1746_v24  ;;  %v1814_v52 = vadd.f32 %v6289_v28, %v1749_v27  ;;  %v2916_v32 = vadd.f32 %v2915_v14, %v2914_v18  ;;  %v1812_v23 = vadd.f32 %v6289_v28, %v1747_v49 }
 0x398   :  { %4254 = vmatmul.msk.f32.gmra.mxu3 %vm1078_vm2, %v6393_v7  ;;  %vm1871_vm7 = vcmp.gt.f32.partialorder %v1807_v34, 0.0  ;;  %v1935_v42 = vmul.f32 0.01, %v1807_v34  ;;  %vm1872_vm8 = vcmp.gt.f32.partialorder %v1808_v48, 0.0  ;;  %v1936_v46 = vmul.f32 0.01, %v1808_v48 }
 0x399   :  { %vm1873_vm13 = vcmp.gt.f32.partialorder %v1809_v21, 0.0  ;;  %v1937_v39 = vmul.f32 0.01, %v1809_v21  ;;  %vm1874_vm15 = vcmp.gt.f32.partialorder %v1810_v57, 0.0  ;;  %v1938_v62 = vmul.f32 0.01, %v1810_v57 }
 0x39a   :  { %v1999_v29 = vsel %vm1871_vm7, %v1807_v34, %v1935_v42  ;;  %v2000_v11 = vsel %vm1872_vm8, %v1808_v48, %v1936_v46  ;;  %v1939_v40 = vmul.f32 0.01, %v1811_v15  ;;  %v2509_v61 = vpop.f32.mrf.mxu3  ;;  %4293 = vmatmul.msk.f32.gmra.mxu2 %vm557_vm1, %v4402_v44  ;;  %vm1875_vm0 = vcmp.gt.f32.partialorder %v1811_v15, 0.0 }
 0x39b   :  { %v2154_v7 = vsel %vm1078_vm2, %v1999_v29, 0.0  ;;  %v2155_v47 = vsel %vm1078_vm2, %v2000_v11, 0.0  ;;  %v6504_v36 = vsel %vm1873_vm13, %v1809_v21, %v1937_v39  ;;  %2756 = vmatpush.msra.mxu1 %v2509_v61  ;;  %v6510_v12 = vsel %vm1874_vm15, %v1810_v57, %v1938_v62  ;;  %v4404_v62 = vld [vmem:[%s7775_s0 + $0x100] sm:$0xff] }
 0x39c   :  { %v2156_v45 = vadd.f32 %v2155_v47, %v2154_v7  ;;  %v2157_v9 = vsel %vm1078_vm2, %v6504_v36, 0.0  ;;  %v6517_v25 = vsel %vm1875_vm0, %v1811_v15, %v1939_v40  ;;  %v1748_v13 = vmul.f32 %v1685_v56, %v6364_v26  ;;  %v4405_v47 = vld [vmem:[%s7775_s0 + $0x108] sm:$0xff] }
 0x39d   :  { %2757 = vmatpush.msra.mxu1 %v2506_v3  ;;  %v2159_v35 = vsel %vm1078_vm2, %v6510_v12, 0.0  ;;  %vm1876_vm4 = vcmp.gt.f32.partialorder %v1812_v23, 0.0  ;;  %v1940_v2 = vmul.f32 0.01, %v1812_v23  ;;  %v1942_v33 = vmul.f32 0.01, %v1814_v52 }
 0x39e   :  { %v2158_v43 = vadd.f32 %v2157_v9, %v2156_v45  ;;  %v1813_v63 = vadd.f32 %v6289_v28, %v1748_v13  ;;  %v2918_v37 = vadd.f32 %v2917_v59, %v2916_v32  ;;  %v2161_v19 = vsel %vm1078_vm2, %v6517_v25, 0.0  ;;  %v4403_v28 = vld [vmem:[%s7775_s0 + $0xf8] sm:$0xff]  ;;  %v6569_v14 = vpop.f32.mrf.mxu2 }
 0x39f   :  { %2758 = vmatpush.msra.mxu1 %v6459_v20  ;;  %v6529_v55 = vsel %vm1876_vm4, %v1812_v23, %v1940_v2  ;;  %vm1878_vm5 = vcmp.gt.f32.partialorder %v1814_v52, 0.0  ;;  %v2919_v26 = vsel %vm1078_vm2, %v6447_v38, 0.0  ;;  %v2921_v27 = vsel %vm1078_vm2, %v6457_v51, 0.0 }
 0x3a0   :  { %4255 = vmatmul.msk.f32.gmra.mxu3 %vm1078_vm2, %v1999_v29  ;;  %v2160_v3 = vadd.f32 %v2159_v35, %v2158_v43  ;;  %vm1877_vm6 = vcmp.gt.f32.partialorder %v1813_v63, 0.0  ;;  %v1941_v58 = vmul.f32 0.01, %v1813_v63  ;;  %v2163_v24 = vsel %vm1078_vm2, %v6529_v55, 0.0 }
 0x3a1   :  { %2759 = vmatpush.msra.mxu1 %v6449_v30  ;;  %v6547_v34 = vsel %vm1878_vm5, %v1814_v52, %v1942_v33  ;;  %v2920_v48 = vadd.f32 %v2919_v26, %v2918_v37  ;;  %v2933_v9 = vsel %vm1078_vm2, %v6465_v4, 0.0  ;;  %vm7783_vm7 = vcmask 1047559  }
 0x3a2   :  { %v2162_v56 = vadd.f32 %v2161_v19, %v2160_v3  ;;  %4294 = vmatmul.msk.f32.gmra.mxu2 %vm557_vm1, %v4403_v28  ;;  %v6545_v18 = vsel %vm1877_vm6, %v1813_v63, %v1941_v58  ;;  %v2167_v15 = vsel %vm1078_vm2, %v6547_v34, 0.0  ;;  %v4406_v3 = vld [vmem:[%s7775_s0 + $0x110] sm:$0xff]  ;;  %v2936_v63 = vsel %vm1078_vm2, %v6506_v6, 0.0 }
 0x3a3   :  { %v6534_v20 = vpop.f32.mrf.mxu3  ;;  %2760 = vmatpush.msra.mxu1 %v6439_v1  ;;  %v2165_v21 = vsel %vm1078_vm2, %v6545_v18, 0.0  ;;  %v2922_v42 = vadd.f32 %v2921_v27, %v2920_v48  ;;  %v2938_v26 = vsel %vm1078_vm2, %v6540_v60, 0.0  ;;  %v2940_v48 = vsel %vm1078_vm2, %v6569_v14, 0.0 }
 0x3a4   :  { %v2164_v30 = vadd.f32 %v2163_v24, %v2162_v56 }
 0x3a5   :  { %2761 = vmatpush.msra.mxu1 %v6423_v53  ;;  %v2923_v53 = vsel %vm1078_vm2, %v6483_v8, 0.0 }
 0x3a6   :  { %v2166_v57 = vadd.f32 %v2165_v21, %v2164_v30  ;;  %v6583_v32 = vpop.f32.mrf.mxu2 }
 0x3a7   :  { %2762 = vmatpush.msra.mxu1 %v6413_v50  ;;  %v6558_v1 = vpop.f32.mrf.mxu1  ;;  %v2924_v50 = vadd.f32 %v2923_v53, %v2922_v42  ;;  %v2942_v21 = vsel %vm1078_vm2, %v6583_v32, 0.0 }
 0x3a8   :  { %4256 = vmatmul.msk.f32.gmra.mxu3 %vm1078_vm2, %v2000_v11  ;;  %v2168_v49 = vadd.f32 %v2167_v15, %v2166_v57  ;;  %v2925_v11 = vsel %vm1078_vm2, %v6519_v31, 0.0 }
 0x3a9   :  { %2763 = vmatpush.msra.mxu1 %v6384_v54  ;;  %v2926_v44 = vadd.f32 %v2925_v11, %v2924_v50 }
 0x3aa   :  { %v2169_v46 = vrot.slane %v2168_v49, 4  ;;  %4295 = vmatmul.msk.f32.vlgmr.msra.gmra.mxu1 %vm557_vm1, %v4404_v62 }
 0x3ab   :  { %v6563_v39 = vpop.f32.mrf.mxu3  ;;  %v2927_v45 = vrot.slane %v2926_v44, 4 }
 0x3ac   :  { %v2170_v29 = vadd.f32 %v2169_v46, %v2168_v49 }
 0x3ad   :  { %v2928_v43 = vadd.f32 %v2927_v45, %v2926_v44 }
 0x3ae   :  { %v2171_v54 = vrot.slane %v2170_v29, 2  ;;  %v6606_v37 = vpop.f32.mrf.mxu2 }
 0x3af   :  { %v6575_v61 = vpop.f32.mrf.mxu1  ;;  %v2929_v33 = vrot.slane %v2928_v43, 2  ;;  %v2944_v42 = vsel %vm1078_vm2, %v6606_v37, 0.0 }
 0x3b0   :  { %4257 = vmatmul.msk.f32.gmra.mxu3 %vm1078_vm2, %v6504_v36  ;;  %v2172_v40 = vadd.f32 %v2171_v54, %v2170_v29  ;;  %v2934_v36 = vsel %vm1078_vm2, %v6478_v41, 0.0  ;;  %v2955_v57 = vsel %vm1078_vm2, %v6575_v61, 0.0 }
 0x3b1   :  { %v2935_v35 = vadd.f32 %v2934_v36, %v2933_v9  ;;  %v2930_v58 = vadd.f32 %v2929_v33, %v2928_v43  ;;  %v6652_v36 = vld [vmem:[%s7777_s2 + $0x35] sm:$0x1] }
 0x3b2   :  { %4296 = vmatmul.msk.f32.gmra.mxu1 %vm557_vm1, %v4405_v47  ;;  %v2173_v52 = vrot.slane %v2172_v40, 1  ;;  %7786 = vst [vmem:[#allocation7_spill] sm:$0xff] %v6652_v36 }
 0x3b3   :  { %v6577_v7 = vpop.f32.mrf.mxu3  ;;  %v2937_v19 = vadd.f32 %v2936_v63, %v2935_v35  ;;  %v2931_v30 = vrot.slane %v2930_v58, 1 }
 0x3b4   :  { %v2174_v59 = vadd.f32 %v2173_v52, %v2172_v40 }
 0x3b5   :  { %v2939_v24 = vadd.f32 %v2938_v26, %v2937_v19  ;;  %v2932_v62 = vadd.f32 %v2931_v30, %v2930_v58  ;;  %v4409_v26 = vld [vmem:[%s7775_s0 + $0x128] sm:$0xff] }
 0x3b6   :  { %v2182_v13 = vmul.f32 %v2174_v59, %v4835_v17  ;;  %v6628_v15 = vpop.f32.mrf.mxu2 }
 0x3b7   :  { %v6591_v23 = vpop.f32.mrf.mxu1  ;;  %v2941_v27 = vadd.f32 %v2940_v48, %v2939_v24  ;;  %v2946_v54 = vsel %vm1078_vm2, %v6628_v15, 0.0  ;;  %v3080_v45 = vmul.f32 %v2932_v62, %v4835_v17 }
 0x3b8   :  { %4258 = vmatmul.msk.f32.gmra.mxu3 %vm1078_vm2, %v6510_v12  ;;  %v6604_v12 = vsel %vm7783_vm7, %v2182_v13, %v6434_v5  ;;  %v4407_v5 = vld [vmem:[%s7775_s0 + $0x118] sm:$0xff]  ;;  %v2957_v53 = vsel %vm1078_vm2, %v6591_v23, 0.0 }
 0x3b9   :  { %7785 = vst [vmem:[#allocation6_spill] sm:$0xff] %v6604_v12  ;;  %v2943_v29 = vadd.f32 %v2942_v21, %v2941_v27  ;;  %v3088_v35 = vmul.f32 %v3080_v45, %v6652_v36 }
 0x3ba   :  { %4297 = vmatmul.msk.f32.gmra.mxu1 %vm557_vm1, %v4406_v3 }
 0x3bb   :  { %v6594_v2 = vpop.f32.mrf.mxu3  ;;  %v2945_v44 = vadd.f32 %v2944_v42, %v2943_v29  ;;  %v4410_v42 = vld [vmem:[%s7775_s0 + $0x130] sm:$0xff] }
 0x3bd   :  { %v2947_v9 = vadd.f32 %v2946_v54, %v2945_v44 }
 0x3bf   :  { %v6612_v56 = vpop.f32.mrf.mxu1  ;;  %v2948_v43 = vrot.slane %v2947_v9, 4 }
 0x3c0   :  { %4259 = vmatmul.msk.f32.gmra.mxu3 %vm1078_vm2, %v6517_v25  ;;  %v2954_v25 = vsel %vm1078_vm2, %v6558_v1, 0.0  ;;  %v2959_v50 = vsel %vm1078_vm2, %v6612_v56, 0.0 }
 0x3c1   :  { %v2956_v49 = vadd.f32 %v2955_v57, %v2954_v25  ;;  %v2949_v3 = vadd.f32 %v2948_v43, %v2947_v9 }
 0x3c2   :  { %4298 = vmatmul.msk.f32.gmra.mxu1 %vm557_vm1, %v4407_v5  ;;  %v3096_v5 = vperm.slane %v3088_v35, 0 }
 0x3c3   :  { %v6614_v28 = vpop.f32.mrf.mxu3  ;;  %v2958_v11 = vadd.f32 %v2957_v53, %v2956_v49  ;;  %v2950_v58 = vrot.slane %v2949_v3, 2 }
 0x3c4   :  { %v6670_v48 = vsub.f32 %v6319_v22, %v3096_v5  ;;  %v6673_v25 = vsub.f32 %v6381_v16, %v3096_v5  ;;  %v6690_v62 = vsub.f32 %v6430_v0, %v3096_v5  ;;  %v4411_v0 = vld [vmem:[%s7775_s0 + $0x138] sm:$0xff] }
 0x3c5   :  { %v2960_v52 = vadd.f32 %v2959_v50, %v2958_v11  ;;  %v2951_v24 = vadd.f32 %v2950_v58, %v2949_v3 }
 0x3c6   :  { %v3168_v22 = vmul.f32 %v6670_v48, %v6670_v48  ;;  %v3169_v16 = vmul.f32 %v6673_v25, %v6673_v25 }
 0x3c7   :  { %v6636_v46 = vpop.f32.mrf.mxu1 }
 0x3c8   :  { %4260 = vmatmul.msk.f32.gmra.mxu3 %vm1078_vm2, %v6529_v55  ;;  %v4408_v55 = vld [vmem:[%s7775_s0 + $0x120] sm:$0xff]  ;;  %v2961_v47 = vsel %vm1078_vm2, %v6636_v46, 0.0  ;;  %v3233_v11 = vsel %vm1078_vm2, %v3169_v16, 0.0 }
 0x3c9   :  { %v2962_v59 = vadd.f32 %v2961_v47, %v2960_v52 }
 0x3ca   :  { %4299 = vmatmul.msk.f32.gmra.mxu1 %vm557_vm1, %v4408_v55 }
 0x3cb   :  { %v2527_v40 = vpop.f32.mrf.mxu3 }
 0x3cf   :  { %v6656_v13 = vpop.f32.mrf.mxu1 }
 0x3d0   :  { %4261 = vmatmul.msk.f32.gmra.mxu3 %vm1078_vm2, %v6545_v18  ;;  %v2963_v63 = vsel %vm1078_vm2, %v6656_v13, 0.0  ;;  %v2952_v18 = vrot.slane %v2951_v24, 1 }
 0x3d1   :  { %v2964_v33 = vadd.f32 %v2963_v63, %v2962_v59  ;;  %v6719_v59 = vsub.f32 %v6457_v51, %v3096_v5 }
 0x3d2   :  { %4300 = vmatmul.msk.f32.gmra.mxu1 %vm557_vm1, %v4409_v26  ;;  %v2953_v21 = vadd.f32 %v2952_v18, %v2951_v24 }
 0x3d3   :  { %v2530_v19 = vpop.f32.mrf.mxu3 }
 0x3d4   :  { %v3081_v53 = vmul.f32 %v2953_v21, %v4835_v17  ;;  %v6757_v21 = vsub.f32 %v6519_v31, %v3096_v5 }
 0x3d6   :  { %v3089_v54 = vmul.f32 %v3081_v53, %v6652_v36 }
 0x3d7   :  { %v6667_v30 = vpop.f32.mrf.mxu1 }
 0x3d8   :  { %4262 = vmatmul.msk.f32.gmra.mxu3 %vm1078_vm2, %v6547_v34  ;;  %v2965_v27 = vsel %vm1078_vm2, %v6667_v30, 0.0  ;;  %v6682_v34 = vsub.f32 %v6419_v10, %v3096_v5  ;;  %v3232_v10 = vsel %vm1078_vm2, %v3168_v22, 0.0  ;;  %v6715_v45 = vperm.slane %v3089_v54, 0 }
 0x3d9   :  { %v2966_v57 = vadd.f32 %v2965_v27, %v2964_v33  ;;  %v3234_v47 = vadd.f32 %v3233_v11, %v3232_v10  ;;  %v6741_v33 = vsub.f32 %v6483_v8, %v3096_v5 }
 0x3da   :  { %4301 = vmatmul.msk.f32.gmra.mxu1 %vm557_vm1, %v4410_v42  ;;  %v3170_v50 = vmul.f32 %v6682_v34, %v6682_v34  ;;  %v6727_v3 = vsub.f32 %v6465_v4, %v6715_v45  ;;  %v6731_v63 = vsub.f32 %v6478_v41, %v6715_v45  ;;  %v3173_v4 = vmul.f32 %v6719_v59, %v6719_v59 }
 0x3db   :  { %v2533_v49 = vpop.f32.mrf.mxu3  ;;  %v3174_v27 = vmul.f32 %v6741_v33, %v6741_v33  ;;  %v6781_v54 = vsub.f32 %v6569_v14, %v6715_v45 }
 0x3dc   :  { %2797 = vmatpush.msra.mxu2 %v2533_v49  ;;  %v3235_v52 = vsel %vm1078_vm2, %v3170_v50, 0.0  ;;  %v3176_v58 = vmul.f32 %v6727_v3, %v6727_v3  ;;  %v3177_v24 = vmul.f32 %v6731_v63, %v6731_v63  ;;  %v3241_v49 = vsel %vm1078_vm2, %v3173_v4, 0.0 }
 0x3dd   :  { %v3236_v43 = vadd.f32 %v3235_v52, %v3234_v47  ;;  %v3243_v10 = vsel %vm1078_vm2, %v3174_v27, 0.0  ;;  %v3180_v14 = vmul.f32 %v6781_v54, %v6781_v54 }
 0x3de   :  { %2798 = vmatpush.msra.mxu2 %v2530_v19  ;;  %v3253_v22 = vsel %vm1078_vm2, %v3176_v58, 0.0  ;;  %v3254_v16 = vsel %vm1078_vm2, %v3177_v24, 0.0 }
 0x3df   :  { %v6692_v29 = vpop.f32.mrf.mxu1  ;;  %v3255_v11 = vadd.f32 %v3254_v16, %v3253_v22  ;;  %v4415_v16 = vld [vmem:[%s7775_s0 + $0x158] sm:$0xff] }
 0x3e0   :  { %2799 = vmatpush.msra.mxu2 %v2527_v40  ;;  %v2967_v55 = vsel %vm1078_vm2, %v6692_v29, 0.0  ;;  %v6709_v40 = vsub.f32 %v6447_v38, %v3096_v5  ;;  %v4413_v5 = vld [vmem:[%s7775_s0 + $0x148] sm:$0xff] }
 0x3e1   :  { %v2968_v9 = vadd.f32 %v2967_v55, %v2966_v57 }
 0x3e2   :  { %2800 = vmatpush.msra.mxu2 %v6614_v28  ;;  %4302 = vmatmul.msk.f32.gmra.mxu1 %vm557_vm1, %v4411_v0  ;;  %v3171_v28 = vmul.f32 %v6690_v62, %v6690_v62 }
 0x3e3   :  { %v6702_v44 = vpop.f32.mrf.mxu3  ;;  %v2969_v38 = vrot.slane %v2968_v9, 4 }
 0x3e4   :  { %2801 = vmatpush.msra.mxu2 %v6594_v2  ;;  %v3172_v2 = vmul.f32 %v6709_v40, %v6709_v40  ;;  %v3237_v35 = vsel %vm1078_vm2, %v3171_v28, 0.0 }
 0x3e5   :  { %v2970_v51 = vadd.f32 %v2969_v38, %v2968_v9  ;;  %v3238_v19 = vadd.f32 %v3237_v35, %v3236_v43  ;;  %v6791_v38 = vsub.f32 %v6583_v32, %v6715_v45  ;;  %v6805_v32 = vsub.f32 %v6606_v37, %v6715_v45 }
 0x3e6   :  { %2802 = vmatpush.msra.mxu2 %v6577_v7  ;;  %v3239_v26 = vsel %vm1078_vm2, %v3172_v2, 0.0 }
 0x3e7   :  { %v2971_v41 = vrot.slane %v2970_v51, 2  ;;  %v3240_v57 = vadd.f32 %v3239_v26, %v3238_v19  ;;  %v3260_v26 = vsel %vm1078_vm2, %v3180_v14, 0.0 }
 0x3e8   :  { %2803 = vmatpush.msra.mxu2 %v6563_v39  ;;  %v4412_v39 = vld [vmem:[%s7775_s0 + $0x140] sm:$0xff] }
 0x3e9   :  { %v2972_v8 = vadd.f32 %v2971_v41, %v2970_v51  ;;  %v3242_v50 = vadd.f32 %v3241_v49, %v3240_v57  ;;  %v3181_v41 = vmul.f32 %v6791_v38, %v6791_v38  ;;  %v6815_v57 = vsub.f32 %v6628_v15, %v6715_v45 }
 0x3ea   :  { %2804 = vmatpush.msra.mxu2 %v6534_v20  ;;  %v6748_v20 = vsub.f32 %v6506_v6, %v6715_v45  ;;  %v6764_v6 = vsub.f32 %v6540_v60, %v6715_v45  ;;  %v3175_v60 = vmul.f32 %v6757_v21, %v6757_v21  ;;  %v3182_v49 = vmul.f32 %v6805_v32, %v6805_v32 }
 0x3eb   :  { %v6734_v7 = vpop.f32.mrf.mxu3  ;;  %4303 = vmatmul.msk.f32.vlgmr.msra.gmra.mxu2 %vm557_vm1, %v4412_v39  ;;  %v2973_v53 = vrot.slane %v2972_v8, 1  ;;  %v3244_v52 = vadd.f32 %v3243_v10, %v3242_v50  ;;  %v4414_v39 = vld [vmem:[%s7775_s0 + $0x150] sm:$0xff]  ;;  %7787 = vst [vmem:[#allocation8_spill] sm:$0xff] %v6815_v57  ;;  %v3262_v37 = vsel %vm1078_vm2, %v3181_v41, 0.0  ;;  %v3183_v15 = vmul.f32 %v6815_v57, %v6815_v57 }
 0x3ec   :  { %v3178_v42 = vmul.f32 %v6748_v20, %v6748_v20  ;;  %v3179_v55 = vmul.f32 %v6764_v6, %v6764_v6  ;;  %v3245_v9 = vsel %vm1078_vm2, %v3175_v60, 0.0  ;;  %v3264_v45 = vsel %vm1078_vm2, %v3182_v49, 0.0 }
 0x3ed   :  { %v6754_v18 = vpop.f32.mrf.mxu2  ;;  %v2974_v47 = vadd.f32 %v2973_v53, %v2972_v8  ;;  %v3246_v4 = vadd.f32 %v3245_v9, %v3244_v52 }
 0x3ee   :  { %v3256_v0 = vsel %vm1078_vm2, %v3178_v42, 0.0  ;;  %v3258_v2 = vsel %vm1078_vm2, %v3179_v55, 0.0 }
 0x3ef   :  { %v3257_v43 = vadd.f32 %v3256_v0, %v3255_v11  ;;  %v3082_v35 = vmul.f32 %v2974_v47, %v4835_v17  ;;  %v3247_v8 = vrot.slane %v3246_v4, 4 }
 0x3f1   :  { %v3259_v19 = vadd.f32 %v3258_v2, %v3257_v43  ;;  %v3090_v58 = vmul.f32 %v3082_v35, %v6652_v36  ;;  %v3248_v53 = vadd.f32 %v3247_v8, %v3246_v4 }
 0x3f3   :  { %v6770_v31 = vpop.f32.mrf.mxu3  ;;  %4304 = vmatmul.msk.f32.gmra.mxu2 %vm557_vm1, %v4413_v5  ;;  %v3261_v27 = vadd.f32 %v3260_v26, %v3259_v19  ;;  %v3098_v42 = vperm.slane %v3090_v58, 0  ;;  %v3249_v52 = vrot.slane %v3248_v53, 2 }
 0x3f5   :  { %v6786_v28 = vpop.f32.mrf.mxu2  ;;  %v3263_v5 = vadd.f32 %v3262_v37, %v3261_v27  ;;  %v6830_v60 = vsub.f32 %v6558_v1, %v3098_v42  ;;  %v6833_v50 = vsub.f32 %v6575_v61, %v3098_v42  ;;  %v6838_v11 = vsub.f32 %v6591_v23, %v3098_v42 }
 0x3f6   :  { %v6841_v55 = vsub.f32 %v6612_v56, %v3098_v42  ;;  %v6844_v0 = vsub.f32 %v6636_v46, %v3098_v42  ;;  %v6847_v47 = vsub.f32 %v6656_v13, %v3098_v42  ;;  %v6850_v9 = vsub.f32 %v6667_v30, %v3098_v42  ;;  %v4416_v30 = vld [vmem:[%s7775_s0 + $0x160] sm:$0xff] }
 0x3f7   :  { %v3265_v1 = vadd.f32 %v3264_v45, %v3263_v5  ;;  %v3266_v61 = vsel %vm1078_vm2, %v3183_v15, 0.0  ;;  %v3184_v23 = vmul.f32 %v6830_v60, %v6830_v60  ;;  %v3185_v56 = vmul.f32 %v6833_v50, %v6833_v50 }
 0x3f8   :  { %v3186_v46 = vmul.f32 %v6838_v11, %v6838_v11  ;;  %v3187_v13 = vmul.f32 %v6841_v55, %v6841_v55  ;;  %v3250_v14 = vadd.f32 %v3249_v52, %v3248_v53  ;;  %v3188_v35 = vmul.f32 %v6844_v0, %v6844_v0 }
 0x3f9   :  { %v3267_v2 = vadd.f32 %v3266_v61, %v3265_v1  ;;  %v3275_v4 = vsel %vm1078_vm2, %v3185_v56, 0.0  ;;  %v6871_v26 = vsub.f32 %v6692_v29, %v3098_v42  ;;  %v3189_v58 = vmul.f32 %v6847_v47, %v6847_v47  ;;  %v4417_v61 = vld [vmem:[%s7775_s0 + $0x168] sm:$0xff] }
 0x3fa   :  { %v3277_v19 = vsel %vm1078_vm2, %v3186_v46, 0.0  ;;  %v3279_v8 = vsel %vm1078_vm2, %v3187_v13, 0.0  ;;  %v3251_v49 = vrot.slane %v3250_v14, 1  ;;  %v3190_v53 = vmul.f32 %v6850_v9, %v6850_v9 }
 0x3fb   :  { %v6797_v51 = vpop.f32.mrf.mxu3  ;;  %4305 = vmatmul.msk.f32.gmra.mxu2 %vm557_vm1, %v4414_v39  ;;  %v3274_v39 = vsel %vm1078_vm2, %v3184_v23, 0.0  ;;  %v3281_v5 = vsel %vm1078_vm2, %v3188_v35, 0.0  ;;  %v2975_v15 = vsel %vm1078_vm2, %v6754_v18, 0.0  ;;  %v2976_v29 = vsel %vm1078_vm2, %v6786_v28, 0.0 }
 0x3fc   :  { %v3276_v41 = vadd.f32 %v3275_v4, %v3274_v39  ;;  %v3191_v45 = vmul.f32 %v6871_v26, %v6871_v26  ;;  %v3283_v52 = vsel %vm1078_vm2, %v3189_v58, 0.0  ;;  %v3252_v23 = vadd.f32 %v3251_v49, %v3250_v14 }
 0x3fd   :  { %v6811_v24 = vpop.f32.mrf.mxu2  ;;  %v2977_v13 = vadd.f32 %v2976_v29, %v2975_v15 }
 0x3fe   :  { %v3278_v37 = vadd.f32 %v3277_v19, %v3276_v41  ;;  %v2978_v35 = vsel %vm1078_vm2, %v6811_v24, 0.0  ;;  %v3287_v4 = vsel %vm1078_vm2, %v3191_v45, 0.0  ;;  %v3400_v19 = vmul.f32 %v3252_v23, %v4835_v17 }
 0x400   :  { %v3280_v42 = vadd.f32 %v3279_v8, %v3278_v37  ;;  %v2979_v8 = vadd.f32 %v2978_v35, %v2977_v13 }
 0x402   :  { %v3282_v56 = vadd.f32 %v3281_v5, %v3280_v42 }
 0x403   :  { %v6820_v22 = vpop.f32.mrf.mxu3  ;;  %4306 = vmatmul.msk.f32.gmra.mxu2 %vm557_vm1, %v4415_v16  ;;  %v3268_v16 = vrot.slane %v3267_v2, 4 }
 0x404   :  { %v3284_v39 = vadd.f32 %v3283_v52, %v3282_v56 }
 0x405   :  { %v6835_v10 = vpop.f32.mrf.mxu2  ;;  %v3269_v46 = vadd.f32 %v3268_v16, %v3267_v2  ;;  %v4418_v16 = vld [vmem:[%s7775_s0 + $0x170] sm:$0xff] }
 0x406   :  { %v2980_v14 = vsel %vm1078_vm2, %v6835_v10, 0.0 }
 0x407   :  { %v3270_v58 = vrot.slane %v3269_v46, 2  ;;  %v2981_v29 = vadd.f32 %v2980_v14, %v2979_v8 }
 0x409   :  { %v3271_v15 = vadd.f32 %v3270_v58, %v3269_v46 }
 0x40b   :  { %v2551_v43 = vpop.f32.mrf.mxu3  ;;  %4307 = vmatmul.msk.f32.gmra.mxu2 %vm557_vm1, %v4416_v30  ;;  %v3285_v30 = vsel %vm1078_vm2, %v3190_v53, 0.0  ;;  %v3408_v53 = vadd.f32 1e-05, %v3400_v19 }
 0x40c   :  { %v3286_v41 = vadd.f32 %v3285_v30, %v3284_v39 }
 0x40d   :  { %v6876_v27 = vpop.f32.mrf.mxu2  ;;  %4350 = vrsqrt.f32 %v3408_v53  ;;  %vm3422_vm8 = vweird.f32 %v3408_v53 }
 0x40e   :  { %v3288_v2 = vadd.f32 %v3287_v4, %v3286_v41  ;;  %v2982_v52 = vsel %vm1078_vm2, %v6876_v27, 0.0 }
 0x40f   :  { %v2983_v23 = vadd.f32 %v2982_v52, %v2981_v29 }
 0x410   :  { %v3289_v5 = vrot.slane %v3288_v2, 4 }
 0x412   :  { %v3290_v42 = vadd.f32 %v3289_v5, %v3288_v2 }
 0x413   :  { %v2554_v1 = vpop.f32.mrf.mxu3  ;;  %4308 = vmatmul.msk.f32.gmra.mxu2 %vm557_vm1, %v4417_v61  ;;  %v3272_v61 = vrot.slane %v3271_v15, 1 }
 0x414   :  { %v3291_v45 = vrot.slane %v3290_v42, 2 }
 0x415   :  { %v6897_v37 = vpop.f32.mrf.mxu2  ;;  %v3273_v39 = vadd.f32 %v3272_v61, %v3271_v15 }
 0x416   :  { %v2984_v56 = vsel %vm1078_vm2, %v6897_v37, 0.0  ;;  %v3292_v13 = vadd.f32 %v3291_v45, %v3290_v42  ;;  %v4421_v42 = vld [vmem:[%s7775_s0 + $0x188] sm:$0xff] }
 0x417   :  { %v2985_v30 = vadd.f32 %v2984_v56, %v2983_v23  ;;  %v3401_v8 = vmul.f32 %v3273_v39, %v4835_v17 }
 0x418   :  { %v3293_v19 = vrot.slane %v3292_v13, 1 }
 0x41a   :  { %v3294_v14 = vadd.f32 %v3293_v19, %v3292_v13 }
 0x41b   :  { %v2557_v49 = vpop.f32.mrf.mxu3  ;;  %4309 = vmatmul.msk.f32.gmra.mxu2 %vm557_vm1, %v4418_v16 }
 0x41c   :  { %2838 = vmatpush.msrb.mxu1 %v2557_v49  ;;  %v6933_v49 = vadd.f32 1e-05, %v3401_v8  ;;  %v3402_v16 = vmul.f32 %v3294_v14, %v4835_v17  ;;  %v6964_v8 = vld [vmem:[%s7777_s2 + $0x33] sm:$0x1] }
 0x41d   :  { %v6910_v35 = vpop.f32.mrf.mxu2 }
 0x41e   :  { %2839 = vmatpush.msrb.mxu1 %v2554_v1  ;;  %v4419_v1 = vld [vmem:[%s7775_s0 + $0x178] sm:$0xff]  ;;  %4352 = vrsqrt.f32 %v6933_v49  ;;  %v3410_v15 = vadd.f32 1e-05, %v3402_v16  ;;  %vm3432_vm6 = vweird.f32 %v6933_v49 }
 0x420   :  { %2840 = vmatpush.msrb.mxu1 %v2551_v43  ;;  %v2986_v43 = vsel %vm1078_vm2, %v6910_v35, 0.0  ;;  %4354 = vrsqrt.f32 %v3410_v15  ;;  %vm3442_vm0 = vweird.f32 %v3410_v15 }
 0x421   :  { %v2987_v4 = vadd.f32 %v2986_v43, %v2985_v30 }
 0x422   :  { %2841 = vmatpush.msrb.mxu1 %v6820_v22  ;;  %v4351_v22 = vpop.eup %4350 }
 0x423   :  { %v6912_v46 = vpop.f32.mrf.mxu3  ;;  %4310 = vmatmul.msk.f32.gmra.mxu2 %vm557_vm1, %v4419_v1  ;;  %v3417_v58 = vmul.f32 %v4351_v22, %v3408_v53  ;;  %vm3423_vm13 = vweird.f32 %v4351_v22 }
 0x424   :  { %2842 = vmatpush.msrb.mxu1 %v6797_v51  ;;  %v4420_v51 = vld [vmem:[%s7775_s0 + $0x180] sm:$0xff]  ;;  %v6949_v23 = vpop.eup %4352  ;;  %vm3424_vm15 = vmor %vm3422_vm8, %vm3423_vm13 }
 0x425   :  { %v3427_v43 = vmul.f32 %v6949_v23, %v6933_v49  ;;  %vm3433_vm8 = vweird.f32 %v6949_v23 }
 0x426   :  { %2843 = vmatpush.msrb.mxu1 %v6770_v31  ;;  %v3418_v31 = vmul.f32 %v4351_v22, %v3417_v58  ;;  %v4355_v39 = vpop.eup %4354  ;;  %vm7018_vm13 = vmor %vm3432_vm6, %vm3433_vm8 }
 0x427   :  { %v6922_v41 = vpop.f32.mrf.mxu1  ;;  %v3437_v53 = vmul.f32 %v4355_v39, %v3410_v15  ;;  %vm3443_vm4 = vweird.f32 %v4355_v39 }
 0x428   :  { %2844 = vmatpush.msrb.mxu1 %v6734_v7  ;;  %v3419_v5 = vmul.f32 0.5, %v3418_v31  ;;  %v3428_v31 = vmul.f32 %v6949_v23, %v3427_v43  ;;  %vm3444_vm5 = vmor %vm3442_vm0, %vm3443_vm4 }
 0x429   :  { %v3438_v16 = vmul.f32 %v4355_v39, %v3437_v53 }
 0x42a   :  { %2845 = vmatpush.msrb.mxu1 %v6702_v44  ;;  %v6939_v44 = vpop.f32.mrf.mxu2  ;;  %v3420_v52 = vsub.f32 1.5, %v3419_v5 }
 0x42b   :  { %v6927_v2 = vpop.f32.mrf.mxu3  ;;  %4311 = vmatmul.msk.f32.vlgmr.msrb.gmra.mxu1 %vm557_vm1, %v4420_v51  ;;  %v2988_v45 = vsel %vm1078_vm2, %v6939_v44, 0.0 }
 0x42c   :  { %v2989_v61 = vadd.f32 %v2988_v45, %v2987_v4  ;;  %v3421_v30 = vmul.f32 %v4351_v22, %v3420_v52  ;;  %v4422_v4 = vld [vmem:[%s7775_s0 + $0x190] sm:$0xff]  ;;  %v3439_v45 = vmul.f32 0.5, %v3438_v16 }
 0x42e   :  { %v2990_v56 = vrot.slane %v2989_v61, 4  ;;  %v3425_v14 = vsel %vm3424_vm15, %v4351_v22, %v3421_v30  ;;  %v4423_v22 = vld [vmem:[%s7775_s0 + $0x198] sm:$0xff] }
 0x42f   :  { %v6936_v7 = vpop.f32.mrf.mxu1 }
 0x430   :  { %v2991_v1 = vadd.f32 %v2990_v56, %v2989_v61  ;;  %v3429_v56 = vmul.f32 0.5, %v3428_v31 }
 0x432   :  { %v2992_v19 = vrot.slane %v2991_v1, 2  ;;  %v3430_v43 = vsub.f32 1.5, %v3429_v56 }
 0x433   :  { %v6941_v29 = vpop.f32.mrf.mxu3  ;;  %4312 = vmatmul.msk.f32.gmra.mxu1 %vm557_vm1, %v4421_v42  ;;  %v3496_v42 = vmul.f32 %v3425_v14, %v6964_v8 }
 0x434   :  { %v2993_v51 = vadd.f32 %v2992_v19, %v2991_v1  ;;  %v7002_v49 = vmul.f32 %v6949_v23, %v3430_v43 }
 0x435   :  { %v6977_v30 = vperm.slane %v3496_v42, 0 }
 0x436   :  { %v2994_v5 = vrot.slane %v2993_v51, 1 }
 0x437   :  { %v6951_v13 = vpop.f32.mrf.mxu1  ;;  %v6983_v14 = vmul.f32 %v6977_v30, %v6670_v48  ;;  %v6991_v16 = vmul.f32 %v6977_v30, %v6673_v25  ;;  %v7042_v43 = vmul.f32 %v6977_v30, %v6709_v40 }
 0x438   :  { %v2995_v61 = vadd.f32 %v2994_v5, %v2993_v51 }
 0x43a   :  { %v3083_v12 = vmul.f32 %v2995_v61, %v4835_v17 }
 0x43b   :  { %v6955_v58 = vpop.f32.mrf.mxu3  ;;  %4313 = vmatmul.msk.f32.gmra.mxu1 %vm557_vm1, %v4422_v4  ;;  %v3440_v4 = vsub.f32 1.5, %v3439_v45 }
 0x43c   :  { %v3091_v1 = vmul.f32 %v3083_v12, %v6652_v36  ;;  %v6995_v12 = vmul.f32 %v6977_v30, %v6682_v34  ;;  %v7016_v34 = vld [vmem:[%s7777_s2 + $0x34] ss:$0 sm:$0xff] }
 0x43d   :  { %v3441_v15 = vmul.f32 %v4355_v39, %v3440_v4 }
 0x43e   :  { %v3099_v51 = vperm.slane %v3091_v1, 0 }
 0x43f   :  { %v6968_v52 = vpop.f32.mrf.mxu1  ;;  %v3445_v19 = vsel %vm3444_vm5, %v4355_v39, %v3441_v15  ;;  %v6999_v39 = vmul.f32 %v6977_v30, %v6690_v62 }
 0x440   :  { %v3498_v53 = vmul.f32 %v3445_v19, %v6964_v8  ;;  %v7005_v5 = vsub.f32 %v6835_v10, %v3099_v51  ;;  %v7008_v42 = vsub.f32 %v6876_v27, %v3099_v51  ;;  %v7011_v25 = vsub.f32 %v6897_v37, %v3099_v51  ;;  %v4424_v37 = vld [vmem:[%s7775_s0 + $0x1a0] sm:$0xff] }
 0x441   :  { %v7059_v40 = vsub.f32 %v6786_v28, %v3099_v51  ;;  %v7064_v62 = vsub.f32 %v6910_v35, %v3099_v51 }
 0x442   :  { %v3506_v48 = vperm.slane %v3498_v53, 0  ;;  %v7056_v53 = vsub.f32 %v6754_v18, %v3099_v51 }
 0x443   :  { %v6971_v57 = vpop.f32.mrf.mxu3  ;;  %4314 = vmatmul.msk.f32.gmra.mxu1 %vm557_vm1, %v4423_v22 }
 0x444   :  { %v3528_v45 = vmul.f32 %v3506_v48, %v6830_v60  ;;  %v3529_v10 = vmul.f32 %v3506_v48, %v6833_v50  ;;  %v3530_v61 = vmul.f32 %v3506_v48, %v6838_v11  ;;  %v3531_v27 = vmul.f32 %v3506_v48, %v6841_v55 }
 0x445   :  { %v3532_v4 = vmul.f32 %v3506_v48, %v6844_v0  ;;  %v3533_v22 = vmul.f32 %v3506_v48, %v6847_v47  ;;  %v3534_v60 = vmul.f32 %v3506_v48, %v6850_v9  ;;  %v3535_v50 = vmul.f32 %v3506_v48, %v6871_v26 }
 0x446   :  { %v3593_v11 = vadd.f32 %v7016_v34, %v3528_v45  ;;  %v3594_v55 = vadd.f32 %v7016_v34, %v3529_v10  ;;  %v3595_v15 = vadd.f32 %v7016_v34, %v3530_v61  ;;  %v3596_v1 = vadd.f32 %v7016_v34, %v3531_v27 }
 0x447   :  { %v6987_v31 = vpop.f32.mrf.mxu1  ;;  %v7046_v0 = vmul.f32 %v6977_v30, %v6719_v59  ;;  %v3435_v47 = vsel %vm7018_vm13, %v6949_v23, %v7002_v49  ;;  %v3597_v9 = vadd.f32 %v7016_v34, %v3532_v4  ;;  %v3598_v26 = vadd.f32 %v7016_v34, %v3533_v22  ;;  %v4425_v22 = vld [vmem:[%s7775_s0 + $0x1a8] sm:$0xff] }
 0x448   :  { %v3599_v19 = vadd.f32 %v7016_v34, %v3534_v60  ;;  %vm3657_vm15 = vcmp.gt.f32.partialorder %v3593_v11, 0.0  ;;  %vm3658_vm0 = vcmp.gt.f32.partialorder %v3594_v55, 0.0  ;;  %vm3659_vm4 = vcmp.gt.f32.partialorder %v3595_v15, 0.0 }
 0x449   :  { %vm3660_vm5 = vcmp.gt.f32.partialorder %v3596_v1, 0.0  ;;  %v3721_v48 = vmul.f32 0.01, %v3593_v11  ;;  %v3722_v23 = vmul.f32 0.01, %v3594_v55  ;;  %v3600_v45 = vadd.f32 %v7016_v34, %v3535_v50 }
 0x44a   :  { %v3723_v49 = vmul.f32 0.01, %v3595_v15  ;;  %v3724_v10 = vmul.f32 0.01, %v3596_v1  ;;  %v3725_v18 = vmul.f32 0.01, %v3597_v9  ;;  %v7068_v61 = vsub.f32 %v6939_v44, %v3099_v51 }
 0x44b   :  { %v7026_v56 = vpop.f32.mrf.mxu3  ;;  %4315 = vmatmul.msk.f32.gmra.mxu1 %vm557_vm1, %v4424_v37  ;;  %vm3661_vm6 = vcmp.gt.f32.partialorder %v3597_v9, 0.0  ;;  %v3726_v28 = vmul.f32 0.01, %v3598_v26  ;;  %v3785_v27 = vsel %vm3657_vm15, %v3593_v11, %v3721_v48  ;;  %v3786_v37 = vsel %vm3658_vm0, %v3594_v55, %v3722_v23 }
 0x44c   :  { %vm3662_vm8 = vcmp.gt.f32.partialorder %v3598_v26, 0.0  ;;  %v3787_v35 = vsel %vm3659_vm4, %v3595_v15, %v3723_v49  ;;  %v3788_v60 = vsel %vm3660_vm5, %v3596_v1, %v3724_v10  ;;  %v7077_v50 = vsub.f32 %v6811_v24, %v3099_v51 }
 0x44d   :  { %vm3663_vm13 = vcmp.gt.f32.partialorder %v3599_v19, 0.0  ;;  %v3727_v44 = vmul.f32 0.01, %v3599_v19  ;;  %v3875_v11 = vsel %vm1078_vm2, %v3785_v27, 0.0  ;;  %v3876_v55 = vsel %vm1078_vm2, %v3786_v37, 0.0 }
 0x44e   :  { %vm3664_vm15 = vcmp.gt.f32.partialorder %v3600_v45, 0.0  ;;  %v3789_v48 = vsel %vm3661_vm6, %v3597_v9, %v3725_v18  ;;  %v3877_v23 = vadd.f32 %v3876_v55, %v3875_v11  ;;  %v3728_v36 = vmul.f32 0.01, %v3600_v45 }
 0x44f   :  { %v7061_v59 = vpop.f32.mrf.mxu1  ;;  %v3790_v17 = vsel %vm3662_vm8, %v3598_v26, %v3726_v28  ;;  %v3880_v15 = vsel %vm1078_vm2, %v3788_v60, 0.0  ;;  %v3192_v24 = vmul.f32 %v7056_v53, %v7056_v53  ;;  %v3193_v1 = vmul.f32 %v7059_v40, %v7059_v40 }
 0x450   :  { %v3194_v49 = vmul.f32 %v7077_v50, %v7077_v50  ;;  %v3195_v9 = vmul.f32 %v7005_v5, %v7005_v5  ;;  %v7094_v10 = vmul.f32 %v6977_v30, %v6741_v33  ;;  %v3791_v26 = vsel %vm3663_vm13, %v3599_v19, %v3727_v44 }
 0x451   :  { %v3882_v18 = vsel %vm1078_vm2, %v3789_v48, 0.0  ;;  %v3196_v28 = vmul.f32 %v7008_v42, %v7008_v42  ;;  %v3295_v37 = vsel %vm1078_vm2, %v3192_v24, 0.0  ;;  %v3497_v55 = vmul.f32 %v3435_v47, %v6964_v8 }
 0x452   :  { %v3298_v60 = vsel %vm1078_vm2, %v3194_v49, 0.0  ;;  %v3792_v33 = vsel %vm3664_vm15, %v3600_v45, %v3728_v36  ;;  %v3884_v19 = vsel %vm1078_vm2, %v3790_v17, 0.0  ;;  %v3300_v24 = vsel %vm1078_vm2, %v3195_v9, 0.0 }
 0x453   :  { %v2578_v4 = vpop.f32.mrf.mxu3  ;;  %4316 = vmatmul.msk.f32.gmra.mxu1 %vm557_vm1, %v4425_v22  ;;  %v3878_v22 = vsel %vm1078_vm2, %v3787_v35, 0.0  ;;  %v3296_v35 = vsel %vm1078_vm2, %v3193_v1, 0.0  ;;  %v2996_v47 = vsel %vm1078_vm2, %v6922_v41, 0.0  ;;  %v3886_v17 = vsel %vm1078_vm2, %v3791_v26, 0.0 }
 0x454   :  { %v3879_v51 = vadd.f32 %v3878_v22, %v3877_v23  ;;  %v3297_v44 = vadd.f32 %v3296_v35, %v3295_v37  ;;  %v4426_v23 = vld [vmem:[%s7775_s0 + $0x1b0] sm:$0xff]  ;;  %v2997_v45 = vsel %vm1078_vm2, %v6936_v7, 0.0  ;;  %v3198_v49 = vmul.f32 %v7064_v62, %v7064_v62 }
 0x455   :  { %v2998_v9 = vadd.f32 %v2997_v45, %v2996_v47  ;;  %v3888_v37 = vsel %vm1078_vm2, %v3792_v33, 0.0  ;;  %v3001_v35 = vsel %vm1078_vm2, %v6968_v52, 0.0  ;;  %v3003_v33 = vsel %vm1078_vm2, %v6987_v31, 0.0 }
 0x456   :  { %v3881_v27 = vadd.f32 %v3880_v15, %v3879_v51  ;;  %v3197_v15 = vmul.f32 %v7011_v25, %v7011_v25  ;;  %v3299_v36 = vadd.f32 %v3298_v60, %v3297_v44  ;;  %v2999_v51 = vsel %vm1078_vm2, %v6951_v13, 0.0 }
 0x457   :  { %v7103_v11 = vpop.f32.mrf.mxu1  ;;  %v3199_v44 = vmul.f32 %v7068_v61, %v7068_v61  ;;  %v3005_v47 = vsel %vm1078_vm2, %v7061_v59, 0.0 }
 0x458   :  { %v3883_v22 = vadd.f32 %v3882_v18, %v3881_v27  ;;  %v3302_v18 = vsel %vm1078_vm2, %v3196_v28, 0.0  ;;  %v7125_v27 = vperm.slane %v3497_v55, 0  ;;  %v3301_v26 = vadd.f32 %v3300_v24, %v3299_v36 }
 0x459   :  { %v3578_v28 = vadd.f32 %v7016_v34, %v6991_v16  ;;  %v3007_v45 = vsel %vm1078_vm2, %v7103_v11, 0.0 }
 0x45a   :  { %v3885_v1 = vadd.f32 %v3884_v19, %v3883_v22  ;;  %v3304_v19 = vsel %vm1078_vm2, %v3197_v15, 0.0  ;;  %v3303_v55 = vadd.f32 %v3302_v18, %v3301_v26  ;;  %v3306_v15 = vsel %vm1078_vm2, %v3198_v49, 0.0 }
 0x45b   :  { %v2581_v48 = vpop.f32.mrf.mxu3  ;;  %4317 = vmatmul.msk.f32.gmra.mxu1 %vm557_vm1, %v4426_v23  ;;  %v3519_v23 = vmul.f32 %v6977_v30, %v6757_v21  ;;  %v3521_v16 = vmul.f32 %v7125_v27, %v6731_v63  ;;  %v4427_v21 = vld [vmem:[%s7775_s0 + $0x1b8] sm:$0xff]  ;;  %v3579_v30 = vadd.f32 %v7016_v34, %v6995_v12  ;;  %vm3642_vm4 = vcmp.gt.f32.partialorder %v3578_v28, 0.0 }
 0x45c   :  { %2879 = vmatpush.msrb.mxu2 %v2581_v48  ;;  %v3887_v60 = vadd.f32 %v3886_v17, %v3885_v1  ;;  %v3000_v48 = vadd.f32 %v2999_v51, %v2998_v9  ;;  %v3706_v1 = vmul.f32 0.01, %v3578_v28  ;;  %v3522_v12 = vmul.f32 %v7125_v27, %v6748_v20 }
 0x45d   :  { %v3586_v18 = vadd.f32 %v7016_v34, %v3521_v16  ;;  %v7181_v26 = vadd.f32 %v7016_v34, %v7046_v0  ;;  %v7185_v20 = vadd.f32 %v7016_v34, %v7094_v10  ;;  %vm3643_vm5 = vcmp.gt.f32.partialorder %v3579_v30, 0.0 }
 0x45e   :  { %2880 = vmatpush.msrb.mxu2 %v2578_v4  ;;  %v3577_v4 = vadd.f32 %v7016_v34, %v6983_v14  ;;  %v7142_v22 = vadd.f32 %v3888_v37, %v3887_v60  ;;  %v3002_v24 = vadd.f32 %v3001_v35, %v3000_v48  ;;  %v3520_v14 = vmul.f32 %v7125_v27, %v6727_v3 }
 0x45f   :  { %v3308_v3 = vsel %vm1078_vm2, %v3199_v44, 0.0  ;;  %v7163_v17 = vpop.f32.mrf.mxu1  ;;  %v7177_v37 = vadd.f32 %v7016_v34, %v7042_v43  ;;  %v7189_v35 = vadd.f32 %v7016_v34, %v3519_v23  ;;  %v3770_v44 = vsel %vm3642_vm4, %v3578_v28, %v3706_v1 }
 0x460   :  { %2881 = vmatpush.msrb.mxu2 %v7026_v56  ;;  %v3305_v56 = vadd.f32 %v3304_v19, %v3303_v55  ;;  %v3004_v63 = vadd.f32 %v3003_v33, %v3002_v24  ;;  %vm3641_vm0 = vcmp.gt.f32.partialorder %v3577_v4, 0.0  ;;  %v3705_v51 = vmul.f32 0.01, %v3577_v4  ;;  %v4428_v33 = vld [vmem:[%s7775_s0 + $0x1c0] sm:$0xff] }
 0x461   :  { %v3585_v49 = vadd.f32 %v7016_v34, %v3520_v14  ;;  %v3523_v0 = vmul.f32 %v7125_v27, %v6764_v6  ;;  %v3587_v10 = vadd.f32 %v7016_v34, %v3522_v12  ;;  %v3714_v48 = vmul.f32 0.01, %v3586_v18 }
 0x462   :  { %2882 = vmatpush.msrb.mxu2 %v6971_v57  ;;  %v7160_v57 = vadd.f32 %v7016_v34, %v6999_v39  ;;  %v3307_v36 = vadd.f32 %v3306_v15, %v3305_v56  ;;  %v3006_v39 = vadd.f32 %v3005_v47, %v3004_v63  ;;  %v3769_v43 = vsel %vm3641_vm0, %v3577_v4, %v3705_v51 }
 0x463   :  { %4318 = vmatmul.msk.f32.gmra.mxu1 %vm557_vm1, %v4427_v21  ;;  %v3707_v4 = vmul.f32 0.01, %v3579_v30  ;;  %vm3649_vm8 = vcmp.gt.f32.partialorder %v3585_v49, 0.0  ;;  %vm3650_vm13 = vcmp.gt.f32.partialorder %v3586_v18, 0.0  ;;  %vm3645_vm15 = vcmp.gt.f32.partialorder %v7177_v37, 0.0 }
 0x464   :  { %2883 = vmatpush.msrb.mxu2 %v6955_v58  ;;  %v3309_v9 = vadd.f32 %v3308_v3, %v3307_v36  ;;  %v3009_v58 = vsel %vm1078_vm2, %v7163_v17, 0.0  ;;  %vm3644_vm6 = vcmp.gt.f32.partialorder %v7160_v57, 0.0  ;;  %vm3646_vm0 = vcmp.gt.f32.partialorder %v7181_v26, 0.0 }
 0x465   :  { %v3708_v6 = vmul.f32 0.01, %v7160_v57  ;;  %v3833_v23 = vsel %vm1078_vm2, %v3769_v43, 0.0  ;;  %v3834_v15 = vsel %vm1078_vm2, %v3770_v44, 0.0  ;;  %v3588_v24 = vadd.f32 %v7016_v34, %v3523_v0  ;;  %v4429_v43 = vld [vmem:[%s7775_s0 + $0x1c8] sm:$0xff] }
 0x466   :  { %2884 = vmatpush.msrb.mxu2 %v6941_v29  ;;  %v3008_v29 = vadd.f32 %v3007_v45, %v3006_v39  ;;  %v3310_v60 = vrot.slane %v3309_v9, 4  ;;  %v3715_v56 = vmul.f32 0.01, %v3587_v10  ;;  %v3778_v21 = vsel %vm3650_vm13, %v3586_v18, %v3714_v48  ;;  %v7790_v48 = vld [vmem:[#allocation5_spill] sm:$0xff] }
 0x467   :  { %vm3647_vm4 = vcmp.gt.f32.partialorder %v7185_v20, 0.0  ;;  %v3771_v63 = vsel %vm3643_vm5, %v3579_v30, %v3707_v4  ;;  %v3524_v36 = vmul.f32 %v7125_v27, %v6781_v54  ;;  %vm3651_vm7 = vcmp.gt.f32.partialorder %v3587_v10, 0.0 }
 0x468   :  { %2885 = vmatpush.msrb.mxu2 %v6927_v2  ;;  %v3010_v19 = vadd.f32 %v3009_v58, %v3008_v29  ;;  %v3713_v2 = vmul.f32 0.01, %v3585_v49  ;;  %v3311_v55 = vadd.f32 %v3310_v60, %v3309_v9  ;;  %v3709_v51 = vmul.f32 0.01, %v7177_v37 }
 0x469   :  { %v3710_v1 = vmul.f32 0.01, %v7181_v26  ;;  %v3772_v12 = vsel %vm3644_vm6, %v7160_v57, %v3708_v6  ;;  %v3855_v9 = vsel %vm1078_vm2, %v3778_v21, 0.0  ;;  %v3836_v58 = vsel %vm1078_vm2, %v3771_v63, 0.0 }
 0x46a   :  { %2886 = vmatpush.msrb.mxu2 %v6912_v46  ;;  %v3011_v28 = vrot.slane %v3010_v19, 4  ;;  %v3312_v46 = vrot.slane %v3311_v55, 2  ;;  %v3777_v47 = vsel %vm3649_vm8, %v3585_v49, %v3713_v2  ;;  %v3835_v49 = vadd.f32 %v3834_v15, %v3833_v23 }
 0x46b   :  { %4319 = vmatmul.msk.f32.vlgmr.msrb.gmra.mxu2 %vm557_vm1, %v4428_v33  ;;  %v3854_v18 = vsel %vm1078_vm2, %v3777_v47, 0.0  ;;  %v3716_v54 = vmul.f32 0.01, %v3588_v24  ;;  %v3779_v29 = vsel %vm3651_vm7, %v3587_v10, %v3715_v56  ;;  %v3525_v57 = vmul.f32 %v7125_v27, %v6791_v38 }
 0x46c   :  { %v3012_v14 = vadd.f32 %v3011_v28, %v3010_v19  ;;  %v3313_v3 = vadd.f32 %v3312_v46, %v3311_v55  ;;  %v3589_v44 = vadd.f32 %v7016_v34, %v3524_v36  ;;  %vm3652_vm5 = vcmp.gt.f32.partialorder %v3588_v24, 0.0  ;;  %v7792_v36 = vld [vmem:[#allocation7_spill] sm:$0xff] }
 0x46d   :  { %v3711_v19 = vmul.f32 0.01, %v7185_v20  ;;  %v3526_v2 = vmul.f32 %v7125_v27, %v6805_v32  ;;  %v3856_v10 = vadd.f32 %v3855_v9, %v3854_v18  ;;  %v3773_v33 = vsel %vm3645_vm15, %v7177_v37, %v3709_v51 }
 0x46e   :  { %v7208_v16 = vpop.f32.mrf.mxu2  ;;  %v3013_v45 = vrot.slane %v3012_v14, 2  ;;  %v3314_v39 = vrot.slane %v3313_v3, 1  ;;  %v3774_v38 = vsel %vm3646_vm0, %v7181_v26, %v3710_v1  ;;  %v3857_v4 = vsel %vm1078_vm2, %v3779_v29, 0.0 }
 0x46f   :  { %v3837_v46 = vadd.f32 %v3836_v58, %v3835_v49  ;;  %v3838_v23 = vsel %vm1078_vm2, %v3772_v12, 0.0  ;;  %v3780_v32 = vsel %vm3652_vm5, %v3588_v24, %v3716_v54  ;;  %v3590_v37 = vadd.f32 %v7016_v34, %v3525_v57 }
 0x470   :  { %v3014_v30 = vadd.f32 %v3013_v45, %v3012_v14  ;;  %v3315_v60 = vadd.f32 %v3314_v39, %v3313_v3  ;;  %v7791_v14 = vld [vmem:[#allocation8_spill] sm:$0xff]  ;;  %v3717_v47 = vmul.f32 0.01, %v3589_v44  ;;  %v3591_v26 = vadd.f32 %v7016_v34, %v3526_v2  ;;  %v4430_v39 = vld [vmem:[%s7775_s0 + $0x1d0] sm:$0xff] }
 0x471   :  { %v3527_v56 = vmul.f32 %v7125_v27, %v7791_v14  ;;  %vm3653_vm7 = vcmp.gt.f32.partialorder %v3589_v44, 0.0  ;;  %v3858_v3 = vadd.f32 %v3857_v4, %v3856_v10  ;;  %v7252_v63 = vmul.f32 0.01, %v7189_v35 }
 0x472   :  { %v3015_v0 = vrot.slane %v3014_v30, 1  ;;  %v3403_v55 = vmul.f32 %v3315_v60, %v7790_v48  ;;  %v3859_v24 = vsel %vm1078_vm2, %v3780_v32, 0.0  ;;  %v3775_v27 = vsel %vm3647_vm4, %v7185_v20, %v3711_v19 }
 0x473   :  { %4320 = vmatmul.msk.f32.gmra.mxu2 %vm557_vm1, %v4429_v43  ;;  %v3839_v51 = vadd.f32 %v3838_v23, %v3837_v46  ;;  %v3840_v1 = vsel %vm1078_vm2, %v3773_v33, 0.0  ;;  %v3842_v12 = vsel %vm1078_vm2, %v3774_v38, 0.0  ;;  %v3592_v49 = vadd.f32 %v7016_v34, %v3527_v56  ;;  %v4431_v56 = vld [vmem:[%s7775_s0 + $0x1d8] sm:$0xff] }
 0x474   :  { %v3016_v28 = vadd.f32 %v3015_v0, %v3014_v30  ;;  %v7243_v15 = vadd.f32 1e-05, %v3403_v55  ;;  %v3718_v18 = vmul.f32 0.01, %v3590_v37  ;;  %v3781_v9 = vsel %vm3653_vm7, %v3589_v44, %v3717_v47 }
 0x475   :  { %vm3648_vm6 = vcmp.gt.f32.partialorder %v7189_v35, 0.0  ;;  %vm3654_vm8 = vcmp.gt.f32.partialorder %v3590_v37, 0.0  ;;  %vm3655_vm13 = vcmp.gt.f32.partialorder %v3591_v26, 0.0  ;;  %v3719_v20 = vmul.f32 0.01, %v3591_v26 }
 0x476   :  { %v7240_v6 = vpop.f32.mrf.mxu2  ;;  %v3084_v21 = vmul.f32 %v3016_v28, %v7790_v48  ;;  %4356 = vrsqrt.f32 %v7243_v15  ;;  %v3860_v58 = vadd.f32 %v3859_v24, %v3858_v3  ;;  %v3861_v0 = vsel %vm1078_vm2, %v3781_v9, 0.0 }
 0x477   :  { %v3782_v2 = vsel %vm3654_vm8, %v3590_v37, %v3718_v18  ;;  %v3841_v55 = vadd.f32 %v3840_v1, %v3839_v51  ;;  %v3720_v33 = vmul.f32 0.01, %v3592_v49  ;;  %vm3452_vm15 = vweird.f32 %v7243_v15 }
 0x478   :  { %v3092_v45 = vmul.f32 %v3084_v21, %v7792_v36  ;;  %v3862_v38 = vadd.f32 %v3861_v0, %v3860_v58  ;;  %v3863_v46 = vsel %vm1078_vm2, %v3782_v2, 0.0  ;;  %vm3656_vm4 = vcmp.gt.f32.partialorder %v3592_v49, 0.0 }
 0x479   :  { %v3843_v21 = vadd.f32 %v3842_v12, %v3841_v55  ;;  %v3844_v24 = vsel %vm1078_vm2, %v3775_v27, 0.0  ;;  %v3776_v18 = vsel %vm3648_vm6, %v7189_v35, %v7252_v63  ;;  %v3784_v9 = vsel %vm3656_vm4, %v3592_v49, %v3720_v33  ;;  %v4432_v63 = vld [vmem:[%s7775_s0 + $0x1e0] sm:$0xff] }
 0x47a   :  { %v3100_v30 = vperm.slane %v3092_v45, 0  ;;  %v3864_v36 = vadd.f32 %v3863_v46, %v3862_v38  ;;  %v3846_v55 = vsel %vm1078_vm2, %v3776_v18, 0.0 }
 0x47b   :  { %4321 = vmatmul.msk.f32.gmra.mxu2 %vm557_vm1, %v4430_v39  ;;  %v3845_v58 = vadd.f32 %v3844_v24, %v3843_v21 }
 0x47c   :  { %v7268_v54 = vsub.f32 %v6922_v41, %v3100_v30  ;;  %v7271_v29 = vsub.f32 %v6936_v7, %v3100_v30  ;;  %v7274_v60 = vsub.f32 %v6951_v13, %v3100_v30  ;;  %v7277_v43 = vsub.f32 %v6968_v52, %v3100_v30  ;;  %v4357_v44 = vpop.eup %4356 }
 0x47d   :  { %v7283_v19 = vsub.f32 %v6987_v31, %v3100_v30  ;;  %v7286_v41 = vsub.f32 %v7061_v59, %v3100_v30  ;;  %v7289_v7 = vsub.f32 %v7103_v11, %v3100_v30  ;;  %v3447_v13 = vmul.f32 %v4357_v44, %v7243_v15 }
 0x47e   :  { %v7279_v57 = vpop.f32.mrf.mxu2  ;;  %v3200_v52 = vmul.f32 %v7268_v54, %v7268_v54  ;;  %v3201_v10 = vmul.f32 %v7271_v29, %v7271_v29  ;;  %v3202_v31 = vmul.f32 %v7274_v60, %v7274_v60  ;;  %v3203_v59 = vmul.f32 %v7277_v43, %v7277_v43 }
 0x47f   :  { %v3783_v11 = vsel %vm3655_vm13, %v3591_v26, %v3719_v20  ;;  %v3448_v4 = vmul.f32 %v4357_v44, %v3447_v13  ;;  %v3204_v23 = vmul.f32 %v7283_v19, %v7283_v19  ;;  %vm3453_vm0 = vweird.f32 %v4357_v44 }
 0x480   :  { %v3316_v28 = vsel %vm1078_vm2, %v3200_v52, 0.0  ;;  %v3317_v32 = vsel %vm1078_vm2, %v3201_v10, 0.0  ;;  %v3319_v14 = vsel %vm1078_vm2, %v3202_v31, 0.0  ;;  %v3205_v26 = vmul.f32 %v7286_v41, %v7286_v41  ;;  %vm3454_vm5 = vmor %vm3452_vm15, %vm3453_vm0 }
 0x481   :  { %v3449_v37 = vmul.f32 0.5, %v3448_v4  ;;  %v3318_v47 = vadd.f32 %v3317_v32, %v3316_v28  ;;  %v3321_v3 = vsel %vm1078_vm2, %v3203_v59, 0.0  ;;  %v3865_v39 = vsel %vm1078_vm2, %v3783_v11, 0.0 }
 0x482   :  { %v3206_v15 = vmul.f32 %v7289_v7, %v7289_v7  ;;  %v3323_v12 = vsel %vm1078_vm2, %v3204_v23, 0.0  ;;  %v3325_v0 = vsel %vm1078_vm2, %v3205_v26, 0.0  ;;  %v3866_v2 = vadd.f32 %v3865_v39, %v3864_v36 }
 0x483   :  { %4322 = vmatmul.msk.f32.gmra.mxu2 %vm557_vm1, %v4431_v56  ;;  %v3450_v45 = vsub.f32 1.5, %v3449_v37  ;;  %v3320_v51 = vadd.f32 %v3319_v14, %v3318_v47  ;;  %v7328_v52 = vsub.f32 %v7163_v17, %v3100_v30  ;;  %v3867_v31 = vsel %vm1078_vm2, %v3784_v9, 0.0 }
 0x484   :  { %v3327_v35 = vsel %vm1078_vm2, %v3206_v15, 0.0  ;;  %v3847_v33 = vadd.f32 %v3846_v55, %v3845_v58  ;;  %v3868_v17 = vadd.f32 %v3867_v31, %v3866_v2 }
 0x485   :  { %v3451_v27 = vmul.f32 %v4357_v44, %v3450_v45  ;;  %v3322_v20 = vadd.f32 %v3321_v3, %v3320_v51  ;;  %v3207_v30 = vmul.f32 %v7328_v52, %v7328_v52  ;;  %v4433_v3 = vld [vmem:[%s7775_s0 + $0x1e8] sm:$0xff] }
 0x486   :  { %v7316_v1 = vpop.f32.mrf.mxu2  ;;  %v3848_v26 = vrot.slane %v3847_v33, 4 }
 0x487   :  { %v3455_v13 = vsel %vm3454_vm5, %v4357_v44, %v3451_v27  ;;  %v3324_v10 = vadd.f32 %v3323_v12, %v3322_v20 }
 0x488   :  { %v3499_v59 = vmul.f32 %v3455_v13, %v6964_v8  ;;  %v3849_v39 = vadd.f32 %v3848_v26, %v3847_v33 }
 0x489   :  { %v3326_v49 = vadd.f32 %v3325_v0, %v3324_v10 }
 0x48a   :  { %v3507_v44 = vperm.slane %v3499_v59, 0 }
 0x48b   :  { %4323 = vmatmul.msk.f32.gmra.mxu2 %vm557_vm1, %v4432_v63  ;;  %v3328_v11 = vadd.f32 %v3327_v35, %v3326_v49 }
 0x48c   :  { %v3536_v4 = vmul.f32 %v3507_v44, %v7056_v53  ;;  %v3537_v28 = vmul.f32 %v3507_v44, %v7059_v40  ;;  %v3538_v46 = vmul.f32 %v3507_v44, %v7077_v50  ;;  %v3539_v23 = vmul.f32 %v3507_v44, %v7005_v5 }
 0x48d   :  { %v3540_v32 = vmul.f32 %v3507_v44, %v7008_v42  ;;  %v3541_v14 = vmul.f32 %v3507_v44, %v7011_v25  ;;  %v3542_v56 = vmul.f32 %v3507_v44, %v7064_v62  ;;  %v3543_v37 = vmul.f32 %v3507_v44, %v7068_v61 }
 0x48e   :  { %v7340_v38 = vpop.f32.mrf.mxu2  ;;  %v3601_v47 = vadd.f32 %v7016_v34, %v3536_v4  ;;  %v3602_v21 = vadd.f32 %v7016_v34, %v3537_v28  ;;  %v3603_v53 = vadd.f32 %v7016_v34, %v3538_v46  ;;  %v3604_v40 = vadd.f32 %v7016_v34, %v3539_v23 }
 0x48f   :  { %v3605_v50 = vadd.f32 %v7016_v34, %v3540_v32  ;;  %v3329_v5 = vsel %vm1078_vm2, %v3207_v30, 0.0  ;;  %v3869_v42 = vrot.slane %v3868_v17, 4  ;;  %v3890_v25 = vrot.slane %v7142_v22, 4 }
 0x490   :  { %v3606_v62 = vadd.f32 %v7016_v34, %v3541_v14  ;;  %v3607_v61 = vadd.f32 %v7016_v34, %v3542_v56  ;;  %vm3665_vm7 = vcmp.gt.f32.partialorder %v3601_v47, 0.0  ;;  %vm3666_vm6 = vcmp.gt.f32.partialorder %v3602_v21, 0.0 }
 0x491   :  { %vm3667_vm8 = vcmp.gt.f32.partialorder %v3603_v53, 0.0  ;;  %vm3668_vm13 = vcmp.gt.f32.partialorder %v3604_v40, 0.0  ;;  %v3729_v24 = vmul.f32 0.01, %v3601_v47  ;;  %v3730_v36 = vmul.f32 0.01, %v3602_v21 }
 0x492   :  { %v3731_v45 = vmul.f32 0.01, %v3603_v53  ;;  %v3330_v51 = vadd.f32 %v3329_v5, %v3328_v11  ;;  %v3608_v15 = vadd.f32 %v7016_v34, %v3543_v37  ;;  %v3732_v12 = vmul.f32 0.01, %v3604_v40  ;;  %v4434_v11 = vld [vmem:[%s7775_s0 + $0x1f0] sm:$0xff] }
 0x493   :  { %4324 = vmatmul.msk.f32.gmra.mxu2 %vm557_vm1, %v4433_v3  ;;  %v3733_v18 = vmul.f32 0.01, %v3605_v50  ;;  %vm3669_vm15 = vcmp.gt.f32.partialorder %v3605_v50, 0.0  ;;  %v3734_v27 = vmul.f32 0.01, %v3606_v62  ;;  %v3793_v20 = vsel %vm3665_vm7, %v3601_v47, %v3729_v24 }
 0x494   :  { %v3794_v58 = vsel %vm3666_vm6, %v3602_v21, %v3730_v36  ;;  %v3870_v0 = vadd.f32 %v3869_v42, %v3868_v17  ;;  %vm3670_vm0 = vcmp.gt.f32.partialorder %v3606_v62, 0.0  ;;  %v3795_v2 = vsel %vm3667_vm8, %v3603_v53, %v3731_v45 }
 0x495   :  { %v3796_v13 = vsel %vm3668_vm13, %v3604_v40, %v3732_v12  ;;  %v3891_v10 = vadd.f32 %v3890_v25, %v7142_v22  ;;  %vm3671_vm4 = vcmp.gt.f32.partialorder %v3607_v61, 0.0  ;;  %v3896_v55 = vsel %vm1078_vm2, %v3793_v20, 0.0 }
 0x496   :  { %v7364_v9 = vpop.f32.mrf.mxu2  ;;  %v3897_v31 = vsel %vm1078_vm2, %v3794_v58, 0.0  ;;  %v3735_v59 = vmul.f32 0.01, %v3607_v61  ;;  %v3797_v35 = vsel %vm3669_vm15, %v3605_v50, %v3733_v18  ;;  %v3899_v49 = vsel %vm1078_vm2, %v3795_v2, 0.0 }
 0x497   :  { %v3898_v63 = vadd.f32 %v3897_v31, %v3896_v55  ;;  %v3736_v44 = vmul.f32 0.01, %v3608_v15  ;;  %v3798_v33 = vsel %vm3670_vm0, %v3606_v62, %v3734_v27  ;;  %v3901_v17 = vsel %vm1078_vm2, %v3796_v13, 0.0 }
 0x498   :  { %v3331_v30 = vrot.slane %v3330_v51, 4  ;;  %v3017_v4 = vsel %vm1078_vm2, %v7208_v16, 0.0  ;;  %v3018_v28 = vsel %vm1078_vm2, %v7240_v6, 0.0  ;;  %v3020_v46 = vsel %vm1078_vm2, %v7279_v57, 0.0 }
 0x499   :  { %v3900_v22 = vadd.f32 %v3899_v49, %v3898_v63  ;;  %vm3672_vm5 = vcmp.gt.f32.partialorder %v3608_v15, 0.0  ;;  %v3903_v23 = vsel %vm1078_vm2, %v3797_v35, 0.0  ;;  %v3019_v14 = vadd.f32 %v3018_v28, %v3017_v4 }
 0x49a   :  { %v3332_v32 = vadd.f32 %v3331_v30, %v3330_v51  ;;  %v3799_v56 = vsel %vm3671_vm4, %v3607_v61, %v3735_v59  ;;  %v3022_v47 = vsel %vm1078_vm2, %v7316_v1, 0.0  ;;  %v3850_v53 = vrot.slane %v3849_v39, 2 }
 0x49b   :  { %4325 = vmatmul.msk.f32.gmra.mxu2 %vm557_vm1, %v4434_v11  ;;  %v3902_v37 = vadd.f32 %v3901_v17, %v3900_v22  ;;  %v3905_v40 = vsel %vm1078_vm2, %v3798_v33, 0.0  ;;  %v3021_v50 = vadd.f32 %v3020_v46, %v3019_v14  ;;  %v3871_v5 = vrot.slane %v3870_v0, 2 }
 0x49c   :  { %v3333_v26 = vrot.slane %v3332_v32, 2  ;;  %v3800_v42 = vsel %vm3672_vm5, %v3608_v15, %v3736_v44  ;;  %v3024_v62 = vsel %vm1078_vm2, %v7340_v38, 0.0  ;;  %v3892_v3 = vrot.slane %v3891_v10, 2  ;;  %v4435_v15 = vld [vmem:[%s7775_s0 + $0x1f8] sm:$0xff] }
 0x49d   :  { %v3904_v25 = vadd.f32 %v3903_v23, %v3902_v37  ;;  %v3907_v61 = vsel %vm1078_vm2, %v3799_v56, 0.0  ;;  %v3023_v36 = vadd.f32 %v3022_v47, %v3021_v50  ;;  %v3026_v51 = vsel %vm1078_vm2, %v7364_v9, 0.0 }
 0x49e   :  { %v7387_v21 = vpop.f32.mrf.mxu2  ;;  %v3334_v24 = vadd.f32 %v3333_v26, %v3332_v32  ;;  %v3909_v12 = vsel %vm1078_vm2, %v3800_v42, 0.0  ;;  %v3851_v20 = vadd.f32 %v3850_v53, %v3849_v39  ;;  %v3872_v58 = vadd.f32 %v3871_v5, %v3870_v0 }
 0x49f   :  { %v3906_v45 = vadd.f32 %v3905_v40, %v3904_v25  ;;  %v3025_v27 = vadd.f32 %v3024_v62, %v3023_v36  ;;  %v3028_v13 = vsel %vm1078_vm2, %v7387_v21, 0.0  ;;  %v3893_v55 = vadd.f32 %v3892_v3, %v3891_v10 }
 0x4a0   :  { %v3335_v18 = vrot.slane %v3334_v24, 1  ;;  %v3852_v17 = vrot.slane %v3851_v20, 1  ;;  %v3873_v30 = vrot.slane %v3872_v58, 1 }
 0x4a1   :  { %v3908_v2 = vadd.f32 %v3907_v61, %v3906_v45  ;;  %v3027_v59 = vadd.f32 %v3026_v51, %v3025_v27  ;;  %v3894_v11 = vrot.slane %v3893_v55, 1 }
 0x4a2   :  { %v3336_v31 = vadd.f32 %v3335_v18, %v3334_v24  ;;  %v3853_v46 = vadd.f32 %v3852_v17, %v3851_v20  ;;  %v3874_v23 = vadd.f32 %v3873_v30, %v3872_v58 }
 0x4a3   :  { %4326 = vmatmul.msk.f32.gmra.mxu2 %vm557_vm1, %v4435_v15  ;;  %v3910_v35 = vadd.f32 %v3909_v12, %v3908_v2  ;;  %v3029_v44 = vadd.f32 %v3028_v13, %v3027_v59  ;;  %v3895_v56 = vadd.f32 %v3894_v11, %v3893_v55  ;;  %v7426_v2 = vld [vmem:[%s7777_s2 + $0x35] sm:$0x1] }
 0x4a4   :  { %v3404_v49 = vmul.f32 %v3336_v31, %v7790_v48  ;;  %v4001_v26 = vmul.f32 %v3853_v46, %v7790_v48  ;;  %v4002_v50 = vmul.f32 %v3874_v23, %v7790_v48 }
 0x4a5   :  { %v3911_v39 = vrot.slane %v3910_v35, 4  ;;  %v4003_v25 = vmul.f32 %v3895_v56, %v7790_v48 }
 0x4a6   :  { %v7402_v63 = vpop.f32.mrf.mxu2  ;;  %v3412_v22 = vadd.f32 1e-05, %v3404_v49  ;;  %v4040_v45 = vsel %vm4017_vm12, %v4002_v50, %v4001_v26 }
 0x4a7   :  { %v3030_v33 = vsel %vm1078_vm2, %v7402_v63, 0.0  ;;  %v3912_v10 = vadd.f32 %v3911_v39, %v3910_v35  ;;  %v4041_v12 = vsel %vm4019_vm10, %v4003_v25, %v4040_v45 }
 0x4a8   :  { %v7407_v0 = vpop.f32.mrf.mxu1  ;;  %v3031_v4 = vadd.f32 %v3030_v33, %v3029_v44  ;;  %4358 = vrsqrt.f32 %v3412_v22  ;;  %vm3462_vm7 = vweird.f32 %v3412_v22 }
 0x4a9   :  { %v3913_v32 = vrot.slane %v3912_v10, 2 }
 0x4aa   :  { %v3032_v28 = vrot.slane %v3031_v4, 4 }
 0x4ab   :  { %v3914_v37 = vadd.f32 %v3913_v32, %v3912_v10 }
 0x4ac   :  { %v3033_v14 = vadd.f32 %v3032_v28, %v3031_v4 }
 0x4ad   :  { %v3915_v40 = vrot.slane %v3914_v37, 1 }
 0x4ae   :  { %v3034_v47 = vrot.slane %v3033_v14, 2  ;;  %v4359_v5 = vpop.eup %4358 }
 0x4af   :  { %v3457_v62 = vmul.f32 %v4359_v5, %v3412_v22  ;;  %v3916_v3 = vadd.f32 %v3915_v40, %v3914_v37  ;;  %vm3463_vm6 = vweird.f32 %v4359_v5 }
 0x4b0   :  { %v7409_v53 = vpop.f32.mrf.mxu1  ;;  %v3035_v42 = vadd.f32 %v3034_v47, %v3033_v14  ;;  %vm3464_vm8 = vmor %vm3462_vm7, %vm3463_vm6 }
 0x4b1   :  { %v3458_v24 = vmul.f32 %v4359_v5, %v3457_v62  ;;  %v4004_v36 = vmul.f32 %v3916_v3, %v7790_v48 }
 0x4b2   :  { %v3036_v61 = vrot.slane %v3035_v42, 1 }
 0x4b3   :  { %v3459_v18 = vmul.f32 0.5, %v3458_v24  ;;  %v7418_v27 = vsel %vm4021_vm9, %v4004_v36, %v4041_v12 }
 0x4b4   :  { %v3037_v51 = vadd.f32 %v3036_v61, %v3035_v42 }
 0x4b5   :  { %v3460_v20 = vsub.f32 1.5, %v3459_v18 }
 0x4b6   :  { %v3085_v15 = vmul.f32 %v3037_v51, %v7790_v48 }
 0x4b7   :  { %v3461_v55 = vmul.f32 %v4359_v5, %v3460_v20 }
 0x4b8   :  { %v7421_v58 = vpop.f32.mrf.mxu1  ;;  %v3093_v13 = vmul.f32 %v7426_v2, %v3085_v15 }
 0x4b9   :  { %v3465_v59 = vsel %vm3464_vm8, %v4359_v5, %v3461_v55 }
 0x4ba   :  { %v7429_v31 = vperm.slane %v3093_v13, 0  ;;  %v3500_v35 = vmul.f32 %v3465_v59, %v6964_v8 }
 0x4bc   :  { %v7434_v49 = vsub.f32 %v7240_v6, %v7429_v31  ;;  %v7438_v44 = vsub.f32 %v7279_v57, %v7429_v31  ;;  %v7442_v33 = vsub.f32 %v7316_v1, %v7429_v31  ;;  %v7446_v17 = vsub.f32 %v7340_v38, %v7429_v31 }
 0x4bd   :  { %v7450_v30 = vsub.f32 %v7364_v9, %v7429_v31  ;;  %v7454_v8 = vsub.f32 %v7387_v21, %v7429_v31  ;;  %v3508_v6 = vperm.slane %v3500_v35, 0  ;;  %v7458_v57 = vsub.f32 %v7208_v16, %v7429_v31 }
 0x4be   :  { %v3209_v46 = vmul.f32 %v7434_v49, %v7434_v49  ;;  %v3210_v56 = vmul.f32 %v7438_v44, %v7438_v44  ;;  %v3211_v25 = vmul.f32 %v7442_v33, %v7442_v33  ;;  %v3212_v61 = vmul.f32 %v7446_v17, %v7446_v17 }
 0x4bf   :  { %v3544_v1 = vmul.f32 %v3508_v6, %v7268_v54  ;;  %v3545_v38 = vmul.f32 %v3508_v6, %v7271_v29  ;;  %v3546_v11 = vmul.f32 %v3508_v6, %v7274_v60  ;;  %v3547_v9 = vmul.f32 %v3508_v6, %v7277_v43 }
 0x4c0   :  { %v7460_v39 = vpop.f32.mrf.mxu1  ;;  %v3548_v22 = vmul.f32 %v3508_v6, %v7283_v19  ;;  %v3549_v21 = vmul.f32 %v3508_v6, %v7286_v41  ;;  %v3550_v4 = vmul.f32 %v3508_v6, %v7289_v7  ;;  %v3551_v10 = vmul.f32 %v3508_v6, %v7328_v52 }
 0x4c1   :  { %v3609_v16 = vadd.f32 %v7016_v34, %v3544_v1  ;;  %v3610_v28 = vadd.f32 %v7016_v34, %v3545_v38  ;;  %v3611_v54 = vadd.f32 %v7016_v34, %v3546_v11  ;;  %v3612_v29 = vadd.f32 %v7016_v34, %v3547_v9 }
 0x4c2   :  { %v3613_v60 = vadd.f32 %v7016_v34, %v3548_v22  ;;  %v3614_v43 = vadd.f32 %v7016_v34, %v3549_v21  ;;  %v3208_v19 = vmul.f32 %v7458_v57, %v7458_v57  ;;  %v3615_v23 = vadd.f32 %v7016_v34, %v3550_v4 }
 0x4c3   :  { %vm3673_vm12 = vcmp.gt.f32.partialorder %v3609_v16, 0.0  ;;  %vm3674_vm10 = vcmp.gt.f32.partialorder %v3610_v28, 0.0  ;;  %vm3675_vm9 = vcmp.gt.f32.partialorder %v3611_v54, 0.0  ;;  %vm3676_vm13 = vcmp.gt.f32.partialorder %v3612_v29, 0.0 }
 0x4c4   :  { %v3737_v41 = vmul.f32 0.01, %v3609_v16  ;;  %v3738_v7 = vmul.f32 0.01, %v3610_v28  ;;  %v3739_v52 = vmul.f32 0.01, %v3611_v54  ;;  %v3616_v47 = vadd.f32 %v7016_v34, %v3551_v10 }
 0x4c5   :  { %v3740_v32 = vmul.f32 0.01, %v3612_v29  ;;  %v3741_v14 = vmul.f32 0.01, %v3613_v60  ;;  %vm3677_vm15 = vcmp.gt.f32.partialorder %v3613_v60, 0.0  ;;  %vm3678_vm0 = vcmp.gt.f32.partialorder %v3614_v43, 0.0 }
 0x4c6   :  { %v3801_v40 = vsel %vm3673_vm12, %v3609_v16, %v3737_v41  ;;  %v3802_v26 = vsel %vm3674_vm10, %v3610_v28, %v3738_v7  ;;  %v3742_v50 = vmul.f32 0.01, %v3614_v43  ;;  %v3803_v5 = vsel %vm3675_vm9, %v3611_v54, %v3739_v52 }
 0x4c7   :  { %v3804_v42 = vsel %vm3676_vm13, %v3612_v29, %v3740_v32  ;;  %v3917_v62 = vsel %vm1078_vm2, %v3801_v40, 0.0  ;;  %v3918_v3 = vsel %vm1078_vm2, %v3802_v26, 0.0  ;;  %v3743_v34 = vmul.f32 0.01, %v3615_v23 }
 0x4c8   :  { %v7483_v37 = vpop.f32.mrf.mxu1  ;;  %v3805_v24 = vsel %vm3677_vm15, %v3613_v60, %v3741_v14  ;;  %v3919_v36 = vadd.f32 %v3918_v3, %v3917_v62  ;;  %v3920_v45 = vsel %vm1078_vm2, %v3803_v5, 0.0  ;;  %vm3679_vm4 = vcmp.gt.f32.partialorder %v3615_v23, 0.0 }
 0x4c9   :  { %v3744_v51 = vmul.f32 0.01, %v3616_v47  ;;  %v3922_v12 = vsel %vm1078_vm2, %v3804_v42, 0.0  ;;  %v3337_v18 = vsel %vm1078_vm2, %v3208_v19, 0.0  ;;  %v3806_v15 = vsel %vm3678_vm0, %v3614_v43, %v3742_v50 }
 0x4ca   :  { %v3921_v20 = vadd.f32 %v3920_v45, %v3919_v36  ;;  %v3338_v13 = vsel %vm1078_vm2, %v3209_v46, 0.0  ;;  %v3340_v55 = vsel %vm1078_vm2, %v3210_v56, 0.0  ;;  %vm3680_vm5 = vcmp.gt.f32.partialorder %v3616_v47, 0.0 }
 0x4cb   :  { %v3924_v59 = vsel %vm1078_vm2, %v3805_v24, 0.0  ;;  %v7502_v35 = vsub.f32 %v7402_v63, %v7429_v31  ;;  %v3339_v6 = vadd.f32 %v3338_v13, %v3337_v18  ;;  %v3807_v1 = vsel %vm3679_vm4, %v3615_v23, %v3743_v34 }
 0x4cc   :  { %v3923_v38 = vadd.f32 %v3922_v12, %v3921_v20  ;;  %v3213_v11 = vmul.f32 %v7450_v30, %v7450_v30  ;;  %v3342_v9 = vsel %vm1078_vm2, %v3211_v25, 0.0  ;;  %v3926_v21 = vsel %vm1078_vm2, %v3806_v15, 0.0 }
 0x4cd   :  { %v3341_v4 = vadd.f32 %v3340_v55, %v3339_v6  ;;  %v3808_v10 = vsel %vm3680_vm5, %v3616_v47, %v3744_v51  ;;  %v3214_v28 = vmul.f32 %v7454_v8, %v7454_v8  ;;  %v3344_v63 = vsel %vm1078_vm2, %v3212_v61, 0.0 }
 0x4ce   :  { %v3925_v16 = vadd.f32 %v3924_v59, %v3923_v38  ;;  %v3928_v31 = vsel %vm1078_vm2, %v3807_v1, 0.0  ;;  %v3215_v54 = vmul.f32 %v7502_v35, %v7502_v35  ;;  %v3346_v43 = vsel %vm1078_vm2, %v3213_v11, 0.0 }
 0x4cf   :  { %v3343_v29 = vadd.f32 %v3342_v9, %v3341_v4  ;;  %v3038_v19 = vsel %vm1078_vm2, %v7407_v0, 0.0  ;;  %v3039_v41 = vsel %vm1078_vm2, %v7409_v53, 0.0  ;;  %v3930_v7 = vsel %vm1078_vm2, %v3808_v10, 0.0 }
 0x4d0   :  { %v7507_v22 = vpop.f32.mrf.mxu1  ;;  %v3927_v60 = vadd.f32 %v3926_v21, %v3925_v16  ;;  %v3040_v46 = vadd.f32 %v3039_v41, %v3038_v19  ;;  %v3348_v32 = vsel %vm1078_vm2, %v3214_v28, 0.0  ;;  %v3041_v14 = vsel %vm1078_vm2, %v7421_v58, 0.0 }
 0x4d1   :  { %v3345_v52 = vadd.f32 %v3344_v63, %v3343_v29  ;;  %v3350_v26 = vsel %vm1078_vm2, %v3215_v54, 0.0  ;;  %v3043_v50 = vsel %vm1078_vm2, %v7460_v39, 0.0  ;;  %v3045_v3 = vsel %vm1078_vm2, %v7483_v37, 0.0 }
 0x4d2   :  { %v3929_v23 = vadd.f32 %v3928_v31, %v3927_v60  ;;  %v3042_v47 = vadd.f32 %v3041_v14, %v3040_v46  ;;  %v3047_v36 = vsel %vm1078_vm2, %v7507_v22, 0.0 }
 0x4d3   :  { %v3347_v56 = vadd.f32 %v3346_v43, %v3345_v52 }
 0x4d4   :  { %v3931_v40 = vadd.f32 %v3930_v7, %v3929_v23  ;;  %v3044_v25 = vadd.f32 %v3043_v50, %v3042_v47 }
 0x4d5   :  { %v3349_v42 = vadd.f32 %v3348_v32, %v3347_v56 }
 0x4d6   :  { %v3932_v62 = vrot.slane %v3931_v40, 4  ;;  %v3046_v34 = vadd.f32 %v3045_v3, %v3044_v25 }
 0x4d7   :  { %v3351_v61 = vadd.f32 %v3350_v26, %v3349_v42 }
 0x4d8   :  { %v7528_v5 = vpop.f32.mrf.mxu1  ;;  %v3933_v24 = vadd.f32 %v3932_v62, %v3931_v40  ;;  %v3048_v51 = vadd.f32 %v3047_v36, %v3046_v34 }
 0x4d9   :  { %v3352_v45 = vrot.slane %v3351_v61, 4  ;;  %v3049_v18 = vsel %vm1078_vm2, %v7528_v5, 0.0 }
 0x4da   :  { %v3934_v12 = vrot.slane %v3933_v24, 2  ;;  %v3050_v20 = vadd.f32 %v3049_v18, %v3048_v51 }
 0x4db   :  { %v3353_v15 = vadd.f32 %v3352_v45, %v3351_v61 }
 0x4dc   :  { %v3935_v55 = vadd.f32 %v3934_v12, %v3933_v24 }
 0x4dd   :  { %v3354_v59 = vrot.slane %v3353_v15, 2 }
 0x4de   :  { %v3936_v38 = vrot.slane %v3935_v55, 1 }
 0x4df   :  { %v3355_v11 = vadd.f32 %v3354_v59, %v3353_v15 }
 0x4e0   :  { %v7536_v13 = vpop.f32.mrf.mxu1  ;;  %v3937_v21 = vadd.f32 %v3936_v38, %v3935_v55 }
 0x4e1   :  { %v3051_v6 = vsel %vm1078_vm2, %v7536_v13, 0.0  ;;  %v3356_v4 = vrot.slane %v3355_v11, 1 }
 0x4e2   :  { %v3052_v1 = vadd.f32 %v3051_v6, %v3050_v20  ;;  %v4005_v16 = vmul.f32 %v3937_v21, %v7790_v48 }
 0x4e3   :  { %v3357_v28 = vadd.f32 %v3356_v4, %v3355_v11 }
 0x4e4   :  { %v3053_v9 = vrot.slane %v3052_v1, 4  ;;  %v7543_v31 = vsel %vm4023_vm11, %v4005_v16, %v7418_v27 }
 0x4e5   :  { %v3405_v54 = vmul.f32 %v3357_v28, %v7790_v48  ;;  %v7609_v28 = vld [vmem:[%s7777_s2 + $0x34] ss:$0 sm:$0xff] }
 0x4e6   :  { %v3054_v10 = vadd.f32 %v3053_v9, %v3052_v1 }
 0x4e7   :  { %v3413_v60 = vadd.f32 1e-05, %v3405_v54 }
 0x4e8   :  { %v3055_v63 = vrot.slane %v3054_v10, 2 }
 0x4e9   :  { %4360 = vrsqrt.f32 %v3413_v60  ;;  %vm3472_vm7 = vweird.f32 %v3413_v60 }
 0x4ea   :  { %v3056_v29 = vadd.f32 %v3055_v63, %v3054_v10 }
 0x4ec   :  { %v3057_v43 = vrot.slane %v3056_v29, 1 }
 0x4ee   :  { %v3058_v19 = vadd.f32 %v3057_v43, %v3056_v29  ;;  %v7546_v41 = vpop.f32.mrf.mxu2 }
 0x4ef   :  { %v4361_v46 = vpop.eup %4360 }
 0x4f0   :  { %v3086_v7 = vmul.f32 %v3058_v19, %v7790_v48  ;;  %v3467_v23 = vmul.f32 %v4361_v46, %v3413_v60  ;;  %vm3473_vm11 = vweird.f32 %v4361_v46 }
 0x4f1   :  { %vm3474_vm6 = vmor %vm3472_vm7, %vm3473_vm11 }
 0x4f2   :  { %v3094_v52 = vmul.f32 %v7426_v2, %v3086_v7  ;;  %v3468_v14 = vmul.f32 %v4361_v46, %v3467_v23 }
 0x4f4   :  { %v3102_v32 = vperm.slane %v3094_v52, 0  ;;  %v3469_v26 = vmul.f32 0.5, %v3468_v14 }
 0x4f6   :  { %v7551_v27 = vsub.f32 %v7407_v0, %v3102_v32  ;;  %v7554_v56 = vsub.f32 %v7409_v53, %v3102_v32  ;;  %v7556_v47 = vpop.f32.mrf.mxu2  ;;  %v7559_v40 = vsub.f32 %v7421_v58, %v3102_v32  ;;  %v7566_v25 = vsub.f32 %v7460_v39, %v3102_v32 }
 0x4f7   :  { %v3470_v53 = vsub.f32 1.5, %v3469_v26  ;;  %v7573_v3 = vsub.f32 %v7483_v37, %v3102_v32  ;;  %v7579_v45 = vsub.f32 %v7507_v22, %v3102_v32  ;;  %v7588_v37 = vld [vmem:[%s7777_s2 + $0x33] sm:$0x1]  ;;  %v7593_v59 = vsub.f32 %v7528_v5, %v3102_v32  ;;  %s4466_s2 = smov 32  }
 0x4f8   :  { %v3216_v50 = vmul.f32 %v7551_v27, %v7551_v27  ;;  %v3217_v42 = vmul.f32 %v7554_v56, %v7554_v56  ;;  %v3218_v0 = vmul.f32 %v7559_v40, %v7559_v40  ;;  %v3219_v61 = vmul.f32 %v7566_v25, %v7566_v25 }
 0x4f9   :  { %v3471_v39 = vmul.f32 %v4361_v46, %v3470_v53  ;;  %v3220_v51 = vmul.f32 %v7573_v3, %v7573_v3  ;;  %v3221_v22 = vmul.f32 %v7579_v45, %v7579_v45 }
 0x4fa   :  { %v3358_v62 = vsel %vm1078_vm2, %v3216_v50, 0.0  ;;  %v3359_v58 = vsel %vm1078_vm2, %v3217_v42, 0.0  ;;  %v3361_v24 = vsel %vm1078_vm2, %v3218_v0, 0.0  ;;  %v3363_v20 = vsel %vm1078_vm2, %v3219_v61, 0.0 }
 0x4fb   :  { %v3360_v34 = vadd.f32 %v3359_v58, %v3358_v62  ;;  %v3475_v36 = vsel %vm3474_vm6, %v4361_v46, %v3471_v39  ;;  %v3365_v1 = vsel %vm1078_vm2, %v3220_v51, 0.0  ;;  %v3367_v63 = vsel %vm1078_vm2, %v3221_v22, 0.0 }
 0x4fc   :  { %v3501_v15 = vmul.f32 %v7588_v37, %v3475_v36 }
 0x4fd   :  { %v3362_v12 = vadd.f32 %v3361_v24, %v3360_v34 }
 0x4fe   :  { %v7583_v18 = vpop.f32.mrf.mxu2  ;;  %v3509_v55 = vperm.slane %v3501_v15, 0 }
 0x4ff   :  { %v3364_v6 = vadd.f32 %v3363_v20, %v3362_v12 }
 0x500   :  { %v3552_v38 = vmul.f32 %v3509_v55, %v7458_v57  ;;  %v3553_v11 = vmul.f32 %v3509_v55, %v7434_v49  ;;  %v3554_v9 = vmul.f32 %v3509_v55, %v7438_v44  ;;  %v3555_v21 = vmul.f32 %v3509_v55, %v7442_v33 }
 0x501   :  { %v3556_v4 = vmul.f32 %v3509_v55, %v7446_v17  ;;  %v3557_v10 = vmul.f32 %v3509_v55, %v7450_v30  ;;  %v3558_v5 = vmul.f32 %v3509_v55, %v7454_v8  ;;  %v3559_v16 = vmul.f32 %v3509_v55, %v7502_v35 }
 0x502   :  { %v3617_v57 = vadd.f32 %v7609_v28, %v3552_v38  ;;  %v3618_v49 = vadd.f32 %v7609_v28, %v3553_v11  ;;  %v3619_v44 = vadd.f32 %v7609_v28, %v3554_v9  ;;  %v7615_v33 = vsub.f32 %v7536_v13, %v3102_v32 }
 0x503   :  { %v3620_v17 = vadd.f32 %v7609_v28, %v3555_v21  ;;  %v3222_v8 = vmul.f32 %v7593_v59, %v7593_v59  ;;  %v3366_v35 = vadd.f32 %v3365_v1, %v3364_v6  ;;  %v3621_v54 = vadd.f32 %v7609_v28, %v3556_v4 }
 0x504   :  { %vm3681_vm8 = vcmp.gt.f32.partialorder %v3617_v57, 0.0  ;;  %vm3682_vm12 = vcmp.gt.f32.partialorder %v3618_v49, 0.0  ;;  %vm3683_vm10 = vcmp.gt.f32.partialorder %v3619_v44, 0.0  ;;  %v3745_v29 = vmul.f32 0.01, %v3617_v57 }
 0x505   :  { %v3746_v60 = vmul.f32 0.01, %v3618_v49  ;;  %v3747_v43 = vmul.f32 0.01, %v3619_v44  ;;  %v3223_v13 = vmul.f32 %v7615_v33, %v7615_v33  ;;  %v3622_v19 = vadd.f32 %v7609_v28, %v3557_v10 }
 0x506   :  { %v7618_v30 = vpop.f32.mrf.mxu2  ;;  %v3748_v7 = vmul.f32 0.01, %v3620_v17  ;;  %vm3684_vm9 = vcmp.gt.f32.partialorder %v3620_v17, 0.0  ;;  %v3809_v52 = vsel %vm3681_vm8, %v3617_v57, %v3745_v29  ;;  %v3368_v23 = vadd.f32 %v3367_v63, %v3366_v35 }
 0x507   :  { %v3810_v46 = vsel %vm3682_vm12, %v3618_v49, %v3746_v60  ;;  %v3623_v32 = vadd.f32 %v7609_v28, %v3558_v5  ;;  %v3749_v14 = vmul.f32 0.01, %v3621_v54  ;;  %v3811_v26 = vsel %vm3683_vm10, %v3619_v44, %v3747_v43 }
 0x508   :  { %v3369_v50 = vsel %vm1078_vm2, %v3222_v8, 0.0  ;;  %vm3685_vm13 = vcmp.gt.f32.partialorder %v3621_v54, 0.0  ;;  %v3938_v42 = vsel %vm1078_vm2, %v3809_v52, 0.0  ;;  %v3939_v0 = vsel %vm1078_vm2, %v3810_v46, 0.0 }
 0x509   :  { %v3371_v53 = vsel %vm1078_vm2, %v3223_v13, 0.0  ;;  %v3624_v62 = vadd.f32 %v7609_v28, %v3559_v16  ;;  %v3750_v58 = vmul.f32 0.01, %v3622_v19  ;;  %v3812_v61 = vsel %vm3684_vm9, %v3620_v17, %v3748_v7 }
 0x50a   :  { %v3940_v34 = vadd.f32 %v3939_v0, %v3938_v42  ;;  %vm3686_vm15 = vcmp.gt.f32.partialorder %v3622_v19, 0.0  ;;  %v3941_v39 = vsel %vm1078_vm2, %v3811_v26, 0.0  ;;  %v3370_v36 = vadd.f32 %v3369_v50, %v3368_v23 }
 0x50b   :  { %v3751_v51 = vmul.f32 0.01, %v3623_v32  ;;  %v3813_v12 = vsel %vm3685_vm13, %v3621_v54, %v3749_v14  ;;  %vm3687_vm0 = vcmp.gt.f32.partialorder %v3623_v32, 0.0  ;;  %v3943_v20 = vsel %vm1078_vm2, %v3812_v61, 0.0 }
 0x50c   :  { %v3942_v15 = vadd.f32 %v3941_v39, %v3940_v34  ;;  %v3372_v55 = vadd.f32 %v3371_v53, %v3370_v36  ;;  %v3752_v22 = vmul.f32 0.01, %v3624_v62  ;;  %v3814_v6 = vsel %vm3686_vm15, %v3622_v19, %v3750_v58 }
 0x50d   :  { %vm3688_vm4 = vcmp.gt.f32.partialorder %v3624_v62, 0.0  ;;  %v3945_v38 = vsel %vm1078_vm2, %v3813_v12, 0.0  ;;  %v3815_v9 = vsel %vm3687_vm0, %v3623_v32, %v3751_v51  ;;  %v3947_v4 = vsel %vm1078_vm2, %v3814_v6, 0.0 }
 0x50e   :  { %v7633_v24 = vpop.f32.mrf.mxu2  ;;  %v3944_v1 = vadd.f32 %v3943_v20, %v3942_v15  ;;  %v3373_v11 = vrot.slane %v3372_v55, 4  ;;  %v3816_v5 = vsel %vm3688_vm4, %v3624_v62, %v3752_v22  ;;  %v3949_v49 = vsel %vm1078_vm2, %v3815_v9, 0.0 }
 0x50f   :  { %v3951_v8 = vsel %vm1078_vm2, %v3816_v5, 0.0  ;;  %v3060_v63 = vsel %vm1078_vm2, %v7556_v47, 0.0  ;;  %v3059_v60 = vsel %vm1078_vm2, %v7546_v41, 0.0  ;;  %v3062_v43 = vsel %vm1078_vm2, %v7583_v18, 0.0 }
 0x510   :  { %v3946_v21 = vadd.f32 %v3945_v38, %v3944_v1  ;;  %v3374_v10 = vadd.f32 %v3373_v11, %v3372_v55  ;;  %v3061_v19 = vadd.f32 %v3060_v63, %v3059_v60  ;;  %v3064_v52 = vsel %vm1078_vm2, %v7618_v30, 0.0 }
 0x511   :  { %v3066_v26 = vsel %vm1078_vm2, %v7633_v24, 0.0 }
 0x512   :  { %v3948_v16 = vadd.f32 %v3947_v4, %v3946_v21  ;;  %v3375_v44 = vrot.slane %v3374_v10, 2  ;;  %v3063_v23 = vadd.f32 %v3062_v43, %v3061_v19 }
 0x514   :  { %v3950_v17 = vadd.f32 %v3949_v49, %v3948_v16  ;;  %v3376_v35 = vadd.f32 %v3375_v44, %v3374_v10  ;;  %v3065_v50 = vadd.f32 %v3064_v52, %v3063_v23 }
 0x516   :  { %v7639_v57 = vpop.f32.mrf.mxu2  ;;  %v3952_v54 = vadd.f32 %v3951_v8, %v3950_v17  ;;  %v3377_v29 = vrot.slane %v3376_v35, 1  ;;  %v3067_v62 = vadd.f32 %v3066_v26, %v3065_v50 }
 0x517   :  { %v3068_v53 = vsel %vm1078_vm2, %v7639_v57, 0.0 }
 0x518   :  { %v3953_v13 = vrot.slane %v3952_v54, 4  ;;  %v3378_v7 = vadd.f32 %v3377_v29, %v3376_v35  ;;  %v3069_v34 = vadd.f32 %v3068_v53, %v3067_v62 }
 0x51a   :  { %v3954_v46 = vadd.f32 %v3953_v13, %v3952_v54  ;;  %v3406_v14 = vmul.f32 %v3378_v7, %v7790_v48 }
 0x51c   :  { %v3955_v42 = vrot.slane %v3954_v46, 2  ;;  %v3414_v0 = vadd.f32 1e-05, %v3406_v14 }
 0x51e   :  { %v7651_v32 = vpop.f32.mrf.mxu2  ;;  %v3956_v58 = vadd.f32 %v3955_v42, %v3954_v46  ;;  %4362 = vrsqrt.f32 %v3414_v0  ;;  %vm3482_vm11 = vweird.f32 %v3414_v0 }
 0x51f   :  { %v3070_v61 = vsel %vm1078_vm2, %v7651_v32, 0.0 }
 0x520   :  { %v3957_v39 = vrot.slane %v3956_v58, 1  ;;  %v3071_v36 = vadd.f32 %v3070_v61, %v3069_v34 }
 0x522   :  { %v3958_v12 = vadd.f32 %v3957_v39, %v3956_v58 }
 0x524   :  { %v4006_v55 = vmul.f32 %v3958_v12, %v7790_v48  ;;  %v4363_v22 = vpop.eup %4362 }
 0x525   :  { %v3477_v6 = vmul.f32 %v4363_v22, %v3414_v0  ;;  %vm3483_vm5 = vweird.f32 %v4363_v22 }
 0x526   :  { %v7660_v51 = vpop.f32.mrf.mxu2  ;;  %v7667_v38 = vsel %vm4025_vm14, %v4006_v55, %v7543_v31  ;;  %vm3484_vm7 = vmor %vm3482_vm11, %vm3483_vm5 }
 0x527   :  { %v3072_v15 = vsel %vm1078_vm2, %v7660_v51, 0.0  ;;  %v3478_v11 = vmul.f32 %v4363_v22, %v3477_v6 }
 0x528   :  { %v3073_v20 = vadd.f32 %v3072_v15, %v3071_v36 }
 0x529   :  { %v3479_v21 = vmul.f32 0.5, %v3478_v11 }
 0x52a   :  { %v3074_v1 = vrot.slane %v3073_v20, 4 }
 0x52b   :  { %v3480_v10 = vsub.f32 1.5, %v3479_v21 }
 0x52c   :  { %v3075_v9 = vadd.f32 %v3074_v1, %v3073_v20 }
 0x52d   :  { %v3481_v16 = vmul.f32 %v4363_v22, %v3480_v10 }
 0x52e   :  { %v3076_v4 = vrot.slane %v3075_v9, 2 }
 0x52f   :  { %v3485_v49 = vsel %vm3484_vm7, %v4363_v22, %v3481_v16 }
 0x530   :  { %v3077_v5 = vadd.f32 %v3076_v4, %v3075_v9  ;;  %v3502_v17 = vmul.f32 %v7588_v37, %v3485_v49 }
 0x532   :  { %v3078_v44 = vrot.slane %v3077_v5, 1  ;;  %v3510_v8 = vperm.slane %v3502_v17, 0 }
 0x534   :  { %v3079_v35 = vadd.f32 %v3078_v44, %v3077_v5  ;;  %v3560_v63 = vmul.f32 %v3510_v8, %v7551_v27  ;;  %v3561_v31 = vmul.f32 %v3510_v8, %v7554_v56  ;;  %v3562_v54 = vmul.f32 %v3510_v8, %v7559_v40 }
 0x535   :  { %v3563_v29 = vmul.f32 %v3510_v8, %v7566_v25  ;;  %v3564_v60 = vmul.f32 %v3510_v8, %v7573_v3  ;;  %v3565_v43 = vmul.f32 %v3510_v8, %v7579_v45  ;;  %v3566_v56 = vmul.f32 %v3510_v8, %v7593_v59 }
 0x536   :  { %v3625_v13 = vadd.f32 %v7609_v28, %v3560_v63  ;;  %v3626_v19 = vadd.f32 %v7609_v28, %v3561_v31  ;;  %v3627_v7 = vadd.f32 %v7609_v28, %v3562_v54  ;;  %v3087_v27 = vmul.f32 %v3079_v35, %v7790_v48 }
 0x537   :  { %v3628_v52 = vadd.f32 %v7609_v28, %v3563_v29  ;;  %v3629_v40 = vadd.f32 %v7609_v28, %v3564_v60  ;;  %v3630_v25 = vadd.f32 %v7609_v28, %v3565_v43  ;;  %v3567_v23 = vmul.f32 %v3510_v8, %v7615_v33 }
 0x538   :  { %vm3689_vm14 = vcmp.gt.f32.partialorder %v3625_v13, 0.0  ;;  %vm3690_vm6 = vcmp.gt.f32.partialorder %v3626_v19, 0.0  ;;  %vm3691_vm8 = vcmp.gt.f32.partialorder %v3627_v7, 0.0  ;;  %v3753_v3 = vmul.f32 0.01, %v3625_v13 }
 0x539   :  { %v3754_v45 = vmul.f32 0.01, %v3626_v19  ;;  %v3755_v46 = vmul.f32 0.01, %v3627_v7  ;;  %vm3692_vm12 = vcmp.gt.f32.partialorder %v3628_v52, 0.0  ;;  %v3095_v26 = vmul.f32 %v7426_v2, %v3087_v27 }
 0x53a   :  { %v3756_v14 = vmul.f32 0.01, %v3628_v52  ;;  %v3631_v50 = vadd.f32 %v7609_v28, %v3566_v56  ;;  %v3757_v42 = vmul.f32 0.01, %v3629_v40  ;;  %v3817_v59 = vsel %vm3689_vm14, %v3625_v13, %v3753_v3 }
 0x53b   :  { %v3818_v0 = vsel %vm3690_vm6, %v3626_v19, %v3754_v45  ;;  %vm3693_vm10 = vcmp.gt.f32.partialorder %v3629_v40, 0.0  ;;  %v3758_v53 = vmul.f32 0.01, %v3630_v25  ;;  %v3819_v62 = vsel %vm3691_vm8, %v3627_v7, %v3755_v46 }
 0x53c   :  { %vm3694_vm9 = vcmp.gt.f32.partialorder %v3630_v25, 0.0  ;;  %v3820_v58 = vsel %vm3692_vm12, %v3628_v52, %v3756_v14  ;;  %v3959_v61 = vsel %vm1078_vm2, %v3817_v59, 0.0  ;;  %v3960_v34 = vsel %vm1078_vm2, %v3818_v0, 0.0 }
 0x53d   :  { %v3632_v33 = vadd.f32 %v7609_v28, %v3567_v23  ;;  %v3961_v39 = vadd.f32 %v3960_v34, %v3959_v61  ;;  %vm3695_vm13 = vcmp.gt.f32.partialorder %v3631_v50, 0.0  ;;  %v3821_v36 = vsel %vm3693_vm10, %v3629_v40, %v3757_v42 }
 0x53e   :  { %v3962_v2 = vsel %vm1078_vm2, %v3819_v62, 0.0  ;;  %v3103_v12 = vperm.slane %v3095_v26, 0  ;;  %v3759_v15 = vmul.f32 0.01, %v3631_v50  ;;  %v3822_v20 = vsel %vm3694_vm9, %v3630_v25, %v3758_v53 }
 0x53f   :  { %v3963_v55 = vadd.f32 %v3962_v2, %v3961_v39  ;;  %v3964_v22 = vsel %vm1078_vm2, %v3820_v58, 0.0  ;;  %vm3696_vm15 = vcmp.gt.f32.partialorder %v3632_v33, 0.0  ;;  %v3760_v21 = vmul.f32 0.01, %v3632_v33 }
 0x540   :  { %v7693_v6 = vsub.f32 %v7546_v41, %v3103_v12  ;;  %v7696_v1 = vsub.f32 %v7556_v47, %v3103_v12  ;;  %v7699_v11 = vsub.f32 %v7583_v18, %v3103_v12  ;;  %v7702_v9 = vsub.f32 %v7618_v30, %v3103_v12 }
 0x541   :  { %v3965_v4 = vadd.f32 %v3964_v22, %v3963_v55  ;;  %v3966_v10 = vsel %vm1078_vm2, %v3821_v36, 0.0  ;;  %v7706_v5 = vsub.f32 %v7633_v24, %v3103_v12  ;;  %v3823_v30 = vsel %vm3695_vm13, %v3631_v50, %v3759_v15 }
 0x542   :  { %v3224_v41 = vmul.f32 %v7693_v6, %v7693_v6  ;;  %v3225_v47 = vmul.f32 %v7696_v1, %v7696_v1  ;;  %v3226_v18 = vmul.f32 %v7699_v11, %v7699_v11  ;;  %v3968_v49 = vsel %vm1078_vm2, %v3822_v20, 0.0 }
 0x543   :  { %v3967_v16 = vadd.f32 %v3966_v10, %v3965_v4  ;;  %v7717_v44 = vsub.f32 %v7639_v57, %v3103_v12  ;;  %v3227_v24 = vmul.f32 %v7702_v9, %v7702_v9  ;;  %v3824_v35 = vsel %vm3696_vm15, %v3632_v33, %v3760_v21 }
 0x544   :  { %v3379_v17 = vsel %vm1078_vm2, %v3224_v41, 0.0  ;;  %v3380_v8 = vsel %vm1078_vm2, %v3225_v47, 0.0  ;;  %v3970_v54 = vsel %vm1078_vm2, %v3823_v30, 0.0  ;;  %v3166_v29 = vsub.f32 %v7651_v32, %v3103_v12 }
 0x545   :  { %v3969_v63 = vadd.f32 %v3968_v49, %v3967_v16  ;;  %v3381_v31 = vadd.f32 %v3380_v8, %v3379_v17  ;;  %v3228_v60 = vmul.f32 %v7706_v5, %v7706_v5  ;;  %v3382_v57 = vsel %vm1078_vm2, %v3226_v18, 0.0 }
 0x546   :  { %v3972_v19 = vsel %vm1078_vm2, %v3824_v35, 0.0  ;;  %v3167_v7 = vsub.f32 %v7660_v51, %v3103_v12  ;;  %v3229_v52 = vmul.f32 %v7717_v44, %v7717_v44  ;;  %v3384_v27 = vsel %vm1078_vm2, %v3227_v24, 0.0 }
 0x547   :  { %v3971_v43 = vadd.f32 %v3970_v54, %v3969_v63  ;;  %v3383_v13 = vadd.f32 %v3382_v57, %v3381_v31  ;;  %v3230_v25 = vmul.f32 %v3166_v29, %v3166_v29  ;;  %v3386_v32 = vsel %vm1078_vm2, %v3228_v60, 0.0 }
 0x548   :  { %v3231_v46 = vmul.f32 %v3167_v7, %v3167_v7  ;;  %v3388_v23 = vsel %vm1078_vm2, %v3229_v52, 0.0  ;;  %vm7793_vm9 = vcmask 1047559  }
 0x549   :  { %v3973_v56 = vadd.f32 %v3972_v19, %v3971_v43  ;;  %v3385_v40 = vadd.f32 %v3384_v27, %v3383_v13  ;;  %v3390_v50 = vsel %vm1078_vm2, %v3230_v25, 0.0 }
 0x54a   :  { %v3392_v59 = vsel %vm1078_vm2, %v3231_v46, 0.0 }
 0x54b   :  { %v3974_v3 = vrot.slane %v3973_v56, 4  ;;  %v3387_v45 = vadd.f32 %v3386_v32, %v3385_v40 }
 0x54d   :  { %v3975_v14 = vadd.f32 %v3974_v3, %v3973_v56  ;;  %v3389_v26 = vadd.f32 %v3388_v23, %v3387_v45 }
 0x54f   :  { %v3391_v51 = vadd.f32 %v3390_v50, %v3389_v26  ;;  %v3976_v42 = vrot.slane %v3975_v14, 2 }
 0x551   :  { %v3393_v0 = vadd.f32 %v3392_v59, %v3391_v51  ;;  %v3977_v53 = vadd.f32 %v3976_v42, %v3975_v14 }
 0x553   :  { %v3394_v62 = vrot.slane %v3393_v0, 4  ;;  %v3978_v58 = vrot.slane %v3977_v53, 1 }
 0x555   :  { %v3395_v61 = vadd.f32 %v3394_v62, %v3393_v0  ;;  %v3979_v34 = vadd.f32 %v3978_v58, %v3977_v53 }
 0x557   :  { %v3396_v33 = vrot.slane %v3395_v61, 2  ;;  %v4007_v39 = vmul.f32 %v3979_v34, %v7790_v48 }
 0x559   :  { %v3397_v36 = vadd.f32 %v3396_v33, %v3395_v61  ;;  %v7740_v2 = vsel %vm4027_vm3, %v4007_v39, %v7667_v38 }
 0x55b   :  { %v3398_v12 = vrot.slane %v3397_v36, 1 }
 0x55d   :  { %v3399_v15 = vadd.f32 %v3398_v12, %v3397_v36 }
 0x55f   :  { %v3407_v20 = vmul.f32 %v3399_v15, %v7790_v48 }
 0x561   :  { %v3415_v55 = vadd.f32 1e-05, %v3407_v20 }
 0x563   :  { %4364 = vrsqrt.f32 %v3415_v55  ;;  %vm3492_vm4 = vweird.f32 %v3415_v55 }
 0x569   :  { %v4365_v22 = vpop.eup %4364 }
 0x56a   :  { %v3487_v21 = vmul.f32 %v4365_v22, %v3415_v55  ;;  %vm3493_vm0 = vweird.f32 %v4365_v22 }
 0x56b   :  { %vm3494_vm5 = vmor %vm3492_vm4, %vm3493_vm0 }
 0x56c   :  { %v3488_v4 = vmul.f32 %v4365_v22, %v3487_v21 }
 0x56e   :  { %v3489_v10 = vmul.f32 0.5, %v3488_v4 }
 0x570   :  { %v3490_v41 = vsub.f32 1.5, %v3489_v10  ;;  %v7794_v10 = vld [vmem:[#allocation6_spill] sm:$0xff] }
 0x572   :  { %v3491_v47 = vmul.f32 %v4365_v22, %v3490_v41 }
 0x574   :  { %v3495_v18 = vsel %vm3494_vm5, %v4365_v22, %v3491_v47 }
 0x575   :  { %v3503_v30 = vmul.f32 %v7588_v37, %v3495_v18 }
 0x577   :  { %v3511_v38 = vperm.slane %v3503_v30, 0 }
 0x579   :  { %v3568_v16 = vmul.f32 %v3511_v38, %v7693_v6  ;;  %v3569_v49 = vmul.f32 %v3511_v38, %v7696_v1  ;;  %v3570_v24 = vmul.f32 %v3511_v38, %v7699_v11  ;;  %v3571_v17 = vmul.f32 %v3511_v38, %v7702_v9 }
 0x57a   :  { %v3572_v8 = vmul.f32 %v3511_v38, %v7706_v5  ;;  %v3573_v54 = vmul.f32 %v3511_v38, %v7717_v44  ;;  %v3574_v60 = vmul.f32 %v3511_v38, %v3166_v29  ;;  %v3575_v5 = vmul.f32 %v3511_v38, %v3167_v7 }
 0x57b   :  { %v3633_v35 = vadd.f32 %v7609_v28, %v3568_v16  ;;  %v3634_v63 = vadd.f32 %v7609_v28, %v3569_v49  ;;  %v3635_v31 = vadd.f32 %v7609_v28, %v3570_v24  ;;  %v3636_v37 = vadd.f32 %v7609_v28, %v3571_v17 }
 0x57c   :  { %v3637_v6 = vadd.f32 %v7609_v28, %v3572_v8  ;;  %v3638_v57 = vadd.f32 %v7609_v28, %v3573_v54  ;;  %v3639_v44 = vadd.f32 %v7609_v28, %v3574_v60  ;;  %v3640_v40 = vadd.f32 %v7609_v28, %v3575_v5 }
 0x57d   :  { %vm3697_vm3 = vcmp.gt.f32.partialorder %v3633_v35, 0.0  ;;  %vm3698_vm11 = vcmp.gt.f32.partialorder %v3634_v63, 0.0  ;;  %vm3699_vm7 = vcmp.gt.f32.partialorder %v3635_v31, 0.0  ;;  %v3761_v1 = vmul.f32 0.01, %v3633_v35 }
 0x57e   :  { %v3762_v11 = vmul.f32 0.01, %v3634_v63  ;;  %v3763_v9 = vmul.f32 0.01, %v3635_v31  ;;  %v3764_v43 = vmul.f32 0.01, %v3636_v37 }
 0x57f   :  { %vm3700_vm14 = vcmp.gt.f32.partialorder %v3636_v37, 0.0  ;;  %v3825_v13 = vsel %vm3697_vm3, %v3633_v35, %v3761_v1  ;;  %v3765_v52 = vmul.f32 0.01, %v3637_v6  ;;  %vm3701_vm6 = vcmp.gt.f32.partialorder %v3637_v6, 0.0 }
 0x580   :  { %v3826_v19 = vsel %vm3698_vm11, %v3634_v63, %v3762_v11  ;;  %v3827_v27 = vsel %vm3699_vm7, %v3635_v31, %v3763_v9  ;;  %v3980_v29 = vsel %vm1078_vm2, %v3825_v13, 0.0  ;;  %v3766_v25 = vmul.f32 0.01, %v3638_v57 }
 0x581   :  { %v3981_v56 = vsel %vm1078_vm2, %v3826_v19, 0.0  ;;  %v3828_v32 = vsel %vm3700_vm14, %v3636_v37, %v3764_v43  ;;  %vm3702_vm8 = vcmp.gt.f32.partialorder %v3638_v57, 0.0  ;;  %v3983_v3 = vsel %vm1078_vm2, %v3827_v27, 0.0 }
 0x582   :  { %v3982_v7 = vadd.f32 %v3981_v56, %v3980_v29  ;;  %v3767_v45 = vmul.f32 0.01, %v3639_v44  ;;  %v3829_v46 = vsel %vm3701_vm6, %v3637_v6, %v3765_v52  ;;  %vm3703_vm12 = vcmp.gt.f32.partialorder %v3639_v44, 0.0 }
 0x583   :  { %v3985_v14 = vsel %vm1078_vm2, %v3828_v32, 0.0  ;;  %v3768_v26 = vmul.f32 0.01, %v3640_v40  ;;  %v3830_v50 = vsel %vm3702_vm8, %v3638_v57, %v3766_v25  ;;  %vm3704_vm10 = vcmp.gt.f32.partialorder %v3640_v40, 0.0 }
 0x584   :  { %v3984_v23 = vadd.f32 %v3983_v3, %v3982_v7  ;;  %v3987_v42 = vsel %vm1078_vm2, %v3829_v46, 0.0  ;;  %v3831_v59 = vsel %vm3703_vm12, %v3639_v44, %v3767_v45  ;;  %v3989_v0 = vsel %vm1078_vm2, %v3830_v50, 0.0 }
 0x585   :  { %v3832_v53 = vsel %vm3704_vm10, %v3640_v40, %v3768_v26  ;;  %v3991_v58 = vsel %vm1078_vm2, %v3831_v59, 0.0 }
 0x586   :  { %v3986_v51 = vadd.f32 %v3985_v14, %v3984_v23  ;;  %v3993_v34 = vsel %vm1078_vm2, %v3832_v53, 0.0 }
 0x588   :  { %v3988_v28 = vadd.f32 %v3987_v42, %v3986_v51 }
 0x58a   :  { %v3990_v62 = vadd.f32 %v3989_v0, %v3988_v28 }
 0x58c   :  { %v3992_v61 = vadd.f32 %v3991_v58, %v3990_v62 }
 0x58e   :  { %v3994_v33 = vadd.f32 %v3993_v34, %v3992_v61 }
 0x590   :  { %v3995_v39 = vrot.slane %v3994_v33, 4 }
 0x592   :  { %v3996_v36 = vadd.f32 %v3995_v39, %v3994_v33 }
 0x594   :  { %v3997_v12 = vrot.slane %v3996_v36, 2 }
 0x596   :  { %v3998_v15 = vadd.f32 %v3997_v12, %v3996_v36 }
 0x598   :  { %v3999_v20 = vrot.slane %v3998_v15, 1 }
 0x59a   :  { %v4000_v55 = vadd.f32 %v3999_v20, %v3998_v15 }
 0x59c   :  { %v4008_v22 = vmul.f32 %v4000_v55, %v7790_v48 }
 0x59e   :  { %v4046_v21 = vsel %vm7793_vm9, %v4008_v22, %v7740_v2 }
 0x59f   :  { %4047 = vrot.lane.b32.xlu0 %v4046_v21, %s4466_s2 }
 0x611   :  { %v4048_v4 = vpop.permute.xlu0 %4047 }
 0x612   :  { %v4050_v41 = vsel %vm1078_vm2, %v7794_v10, %v4048_v4 }
 0x613   :  { %vm4051_vm13 = vcmp.gt.f32.partialorder %v4050_v41, 0.0  ;;  %v4052_v47 = vmul.f32 0.01, %v4050_v41 }
 0x615   :  { %v4053_v48 = vsel %vm4051_vm13, %v4050_v41, %v4052_v47 }
 0x616   :  { %4054 = vst.msk [vmem:[#allocation2] sm:$0xff] %vm557_vm1, %v4053_v48 }
 0x617   :  { %4065 = dma.vmem_to_hbm [thread:$0]  %s4061_s25, 128, %s4063_s28, [#allocation3]  }
 0x618   :  { %4463 = dma.done.wait [#allocation3], 128  }
 0x619   :  { %4464 = vsyncadd [#allocation3], 4294967168 }
 0x61a   :  { %4070 = vsyncpa [#allocation3], 1 }

</bundles_post_ra>
